<compile_context>
chip_gen: v5e
topology: v5e:2x2
jax: 0.10.0
libtpu: 0.0.40
codegen_flags: <defaults>
</compile_context>

<pallas_src>
import functools
import math

import jax
import jax.numpy as jnp
from jax.experimental import pallas as pl
from jax.experimental.pallas import tpu as pltpu


# ------------------------------ fused kernel -------------------------------


def _fused_decoder_kernel(
    mem_ref, x_ref,
    sa_qkv_w_ref, sa_qkv_b_ref, sa_o_w_ref, sa_o_b_ref,
    ca_q_w_ref, ca_q_b_ref, ca_kv_w_ref, ca_kv_b_ref, ca_o_w_ref, ca_o_b_ref,
    ff_w1_ref, ff_b1_ref, ff_w2_ref, ff_b2_ref,
    ln1_g_ref, ln1_b_ref, ln2_g_ref, ln2_b_ref, ln3_g_ref, ln3_b_ref,
    out_w_ref, out_b_ref,
    o_ref,
    *, B, S_src, S_tgt, nhead, eps,
):
    D = x_ref.shape[1]
    L = sa_qkv_w_ref.shape[0]
    H = nhead
    hd = D // H
    scale = 1.0 / math.sqrt(hd)

    mem2 = mem_ref[...].astype(jnp.float32)   # (B*S_src, D)
    x2 = x_ref[...].astype(jnp.float32)       # (B*S_tgt, D)

    def dense(x, w, b, relu=False):
        # bf16 MXU operands, f32 accumulation; bias add / ReLU in f32 on the VPU.
        y = jnp.dot(x.astype(jnp.bfloat16), w.astype(jnp.bfloat16),
                    preferred_element_type=jnp.float32) + b
        if relu:
            y = jnp.maximum(y, 0.0)
        return y

    def layer_norm(x, g, b):
        mu = jnp.mean(x, axis=-1, keepdims=True)
        xc = x - mu
        var = jnp.mean(xc * xc, axis=-1, keepdims=True)
        return xc * jax.lax.rsqrt(var + eps) * g + b

    def split_heads(x, S, col0):
        # (B*S, ...) columns [col0 : col0+D] -> (H*B, S, hd): static lane slices per head,
        # stacked along the *leading* (batch) axis so attention is one batched einsum.
        parts = [x[:, col0 + h * hd: col0 + (h + 1) * hd].reshape(B, S, hd)
                 for h in range(H)]
        return jnp.concatenate(parts, axis=0).astype(jnp.bfloat16)   # (H*B, S, hd)

    def mha(qh, kh, vh, wo, bo, Sq):
        # qh: (H*B, Sq, hd), kh/vh: (H*B, Sk, hd) -> (B*Sq, D)   (one batched einsum pair)
        s = jnp.einsum("bqd,bkd->bqk", qh, kh,
                       preferred_element_type=jnp.float32) * scale
        s = s - jnp.max(s, axis=-1, keepdims=True)
        p = jnp.exp(s)
        p = p * pl.reciprocal(jnp.sum(p, axis=-1, keepdims=True), approx=True)
        o = jnp.einsum("bqk,bkd->bqd", p.astype(jnp.bfloat16), vh,
                       preferred_element_type=jnp.float32)           # (H*B, Sq, hd)
        # Fold the head-merge concat into the output projection:
        #   concat_h(o_h) @ Wo  ==  sum_h o_h @ Wo[h*hd:(h+1)*hd, :]
        acc = bo                                                      # (1, D) broadcasts
        for h in range(H):
            oh = o[h * B:(h + 1) * B].reshape(B * Sq, hd)             # major-axis slice
            acc = acc + jnp.dot(oh.astype(jnp.bfloat16),
                                wo[h * hd:(h + 1) * hd, :].astype(jnp.bfloat16),
                                preferred_element_type=jnp.float32)
        return acc                                                    # (B*Sq, D)

    # Layer-invariant cross-attention K/V projection of memory, hoisted out of the loop:
    # one lane-dense (D, L*2D) matmul instead of L narrow ones on the x2 dependency chain.
    kv_all = dense(mem2, ca_kv_w_ref[...], ca_kv_b_ref[...])          # (B*S_src, L*2D)

    for l in range(L):  # L is small and static -> unrolled at trace time
        # --- self-attention block (post-LN), fused QKV projection ---
        qkv = dense(x2, sa_qkv_w_ref[l], sa_qkv_b_ref[l])             # (B*S_tgt, 3D)
        sa = mha(split_heads(qkv, S_tgt, 0),
                 split_heads(qkv, S_tgt, D),
                 split_heads(qkv, S_tgt, 2 * D),
                 sa_o_w_ref[l], sa_o_b_ref[l], S_tgt)
        x2 = layer_norm(x2 + sa, ln1_g_ref[l], ln1_b_ref[l])

        # --- cross-attention block (memory K/V precomputed above) ---
        q = dense(x2, ca_q_w_ref[l], ca_q_b_ref[l])                   # (B*S_tgt, D)
        base = l * 2 * D
        ca = mha(split_heads(q, S_tgt, 0),
                 split_heads(kv_all, S_src, base),
                 split_heads(kv_all, S_src, base + D),
                 ca_o_w_ref[l], ca_o_b_ref[l], S_tgt)
        x2 = layer_norm(x2 + ca, ln2_g_ref[l], ln2_b_ref[l])

        # --- feed-forward block ---
        h1 = dense(x2, ff_w1_ref[l], ff_b1_ref[l], relu=True)
        x2 = layer_norm(x2 + dense(h1, ff_w2_ref[l], ff_b2_ref[l]),
                        ln3_g_ref[l], ln3_b_ref[l])

    # Lane-dense (128-wide, zero-padded) final projection and store.
    o_ref[...] = dense(x2, out_w_ref[...], out_b_ref[...]).astype(o_ref.dtype)


# ------------------------------ model wrapper -------------------------------


def model_forward(params, input_ids, target_ids, *, nhead, out_dim):
    # Embedding gathers are plain-JAX glue; everything else is one fused pallas_call.
    mem = jnp.take(params["encoder_embed"], input_ids, axis=0)   # (B, S_src, D)
    tgt = jnp.take(params["decoder_embed"], target_ids, axis=0)  # (B, S_tgt, D)
    B, S_src, D = mem.shape
    _, S_tgt, _ = tgt.shape
    mem2 = mem.reshape(B * S_src, D)     # pre-flatten: no in-kernel 3-D reshape
    tgt2 = tgt.reshape(B * S_tgt, D)

    L = params["sa_qkv_w"].shape[0]
    FF = params["ff_w1"].shape[-1]
    out_pad = params["out_w"].shape[1]   # lane-dense padded width (>= 128)
    hd = D // nhead
    BT, BS = B * S_tgt, B * S_src

    args = (
        mem2, tgt2,
        params["sa_qkv_w"], params["sa_qkv_b"], params["sa_o_w"], params["sa_o_b"],
        params["ca_q_w"], params["ca_q_b"], params["ca_kv_w_all"], params["ca_kv_b_all"],
        params["ca_o_w"], params["ca_o_b"],
        params["ff_w1"], params["ff_b1"], params["ff_w2"], params["ff_b2"],
        params["ln1_g"], params["ln1_b"], params["ln2_g"], params["ln2_b"],
        params["ln3_g"], params["ln3_b"],
        params["out_w"], params["out_b"],
    )

    # Advisory cost estimate for XLA's scheduler around the custom call.
    flops = 2 * BS * D * (L * 2 * D)                        # hoisted cross-attn K/V
    flops += L * (
        2 * BT * D * 3 * D                                  # fused QKV
        + 2 * 2 * nhead * B * S_tgt * S_tgt * hd            # self-attn score + weighted V
        + 2 * BT * D * D                                    # self-attn out proj
        + 2 * BT * D * D                                    # cross-attn Q
        + 2 * 2 * nhead * B * S_tgt * S_src * hd            # cross-attn score + weighted V
        + 2 * BT * D * D                                    # cross-attn out proj
        + 2 * 2 * BT * D * FF                               # FFN
    )
    flops += 2 * BT * D * out_pad
    transcendentals = L * nhead * B * S_tgt * (S_tgt + S_src)
    bytes_accessed = sum(int(a.size) * a.dtype.itemsize for a in args) + BT * out_pad * 4

    logits2d = pl.pallas_call(
        functools.partial(_fused_decoder_kernel, B=B, S_src=S_src, S_tgt=S_tgt,
                          nhead=nhead, eps=1e-5),
        out_shape=jax.ShapeDtypeStruct((BT, out_pad), jnp.float32),
        in_specs=[pl.BlockSpec(memory_space=pltpu.MemorySpace.VMEM)] * len(args),
        out_specs=pl.BlockSpec(memory_space=pltpu.MemorySpace.VMEM),
        compiler_params=pltpu.CompilerParams(vmem_limit_bytes=32 * 1024 * 1024),
        cost_estimate=pl.CostEstimate(flops=int(flops),
                                      transcendentals=int(transcendentals),
                                      bytes_accessed=int(bytes_accessed)),
    )(*args)

    return logits2d[:, :out_dim].reshape(B, S_tgt, out_dim)


# ------------------------------- param init ---------------------------------


def _dense_init(key, fan_in, fan_out):
    kw, kb = jax.random.split(key)
    lim = 1.0 / math.sqrt(fan_in)
    w = jax.random.uniform(kw, (fan_in, fan_out), jnp.float32, -lim, lim)
    b = jax.random.uniform(kb, (fan_out,), jnp.float32, -lim, lim)
    return w, b


def init_params(key, vocab, D, num_layers, dim_ff, out_dim, out_pad=128):
    keys = jax.random.split(key, 3 + num_layers)
    params = {
        "encoder_embed": jax.random.normal(keys[0], (vocab, D), jnp.float32),
        "decoder_embed": jax.random.normal(keys[1], (vocab, D), jnp.float32),
    }
    names = [
        "sa_qkv_w", "sa_qkv_b", "sa_o_w", "sa_o_b",
        "ca_q_w", "ca_q_b", "ca_o_w", "ca_o_b",
        "ff_w1", "ff_b1", "ff_w2", "ff_b2",
        "ln1_g", "ln1_b", "ln2_g", "ln2_b", "ln3_g", "ln3_b",
    ]
    acc = {n: [] for n in names}
    ca_kv_w_layers, ca_kv_b_layers = [], []
    for li in range(num_layers):
        lk = jax.random.split(keys[2 + li], 10)
        # self-attention (fused QKV weight)
        wq, bq = _dense_init(lk[0], D, D)
        wk, bk = _dense_init(lk[1], D, D)
        wv, bv = _dense_init(lk[2], D, D)
        wo, bo = _dense_init(lk[3], D, D)
        acc["sa_qkv_w"].append(jnp.concatenate([wq, wk, wv], axis=1))
        acc["sa_qkv_b"].append(jnp.concatenate([bq, bk, bv]).reshape(1, 3 * D))
        acc["sa_o_w"].append(wo)
        acc["sa_o_b"].append(bo.reshape(1, D))
        # cross-attention (K/V fused across *all layers* -> hoisted matmul in kernel)
        wq, bq = _dense_init(lk[4], D, D)
        wk, bk = _dense_init(lk[5], D, D)
        wv, bv = _dense_init(lk[6], D, D)
        wo, bo = _dense_init(lk[7], D, D)
        acc["ca_q_w"].append(wq)
        acc["ca_q_b"].append(bq.reshape(1, D))
        ca_kv_w_layers.append(jnp.concatenate([wk, wv], axis=1))      # (D, 2D)
        ca_kv_b_layers.append(jnp.concatenate([bk, bv]))              # (2D,)
        acc["ca_o_w"].append(wo)
        acc["ca_o_b"].append(bo.reshape(1, D))
        # feed-forward
        w1, b1 = _dense_init(lk[8], D, dim_ff)
        w2, b2 = _dense_init(lk[9], dim_ff, D)
        acc["ff_w1"].append(w1)
        acc["ff_b1"].append(b1.reshape(1, dim_ff))
        acc["ff_w2"].append(w2)
        acc["ff_b2"].append(b2.reshape(1, D))
        # layer norms
        for nm in ("ln1", "ln2", "ln3"):
            acc[nm + "_g"].append(jnp.ones((1, D), jnp.float32))
            acc[nm + "_b"].append(jnp.zeros((1, D), jnp.float32))

    for name, vals in acc.items():
        params[name] = jnp.stack(vals, axis=0)

    params["ca_kv_w_all"] = jnp.concatenate(ca_kv_w_layers, axis=1)           # (D, L*2D)
    params["ca_kv_b_all"] = jnp.concatenate(ca_kv_b_layers).reshape(1, -1)    # (1, L*2D)

    # final projection, zero-padded to a lane-dense width (out_pad >= 128)
    out_pad = max(out_pad, ((out_dim + 127) // 128) * 128)
    ow, ob = _dense_init(keys[2 + num_layers], D, out_dim)
    params["out_w"] = jnp.zeros((D, out_pad), jnp.float32).at[:, :out_dim].set(ow)
    params["out_b"] = jnp.zeros((1, out_pad), jnp.float32).at[0, :out_dim].set(ob)
    return params


# ----------------------------------- main -----------------------------------

if __name__ == "__main__":
    # small config consistent with the module's structure
    VOCAB = 256
    EMBED_DIM = 32
    NHEAD = 4           # head_dim = 8
    NUM_DEC_LAYERS = 2
    DIM_FF = 64
    OUT_DIM = 8
    B, S_SRC, S_TGT = 2, 16, 8

    key = jax.random.PRNGKey(0)
    k_par, k_in, k_tgt = jax.random.split(key, 3)

    params = init_params(k_par, VOCAB, EMBED_DIM, NUM_DEC_LAYERS, DIM_FF, OUT_DIM)
    input_ids = jax.random.randint(k_in, (B, S_SRC), 0, VOCAB, dtype=jnp.int32)
    target_ids = jax.random.randint(k_tgt, (B, S_TGT), 0, VOCAB, dtype=jnp.int32)

    # TODO(synk): jnp.take clamps out-of-range token ids instead of erroring like nn.Embedding.
    fwd = jax.jit(functools.partial(model_forward, nhead=NHEAD, out_dim=OUT_DIM))
    out = fwd(params, input_ids, target_ids)
    jax.block_until_ready(out)

    assert out.shape == (B, S_TGT, OUT_DIM), out.shape
    assert bool(jnp.all(jnp.isfinite(out)))
    print("KERNEL_OK")
</pallas_src>

<mosaic_0001>
module attributes {stable_mosaic.version = 11 : i64} {
  func.func @_fused_decoder_kernel(%arg0: memref<32x32xf32, #tpu.memory_space<vmem>>, %arg1: memref<16x32xf32, #tpu.memory_space<vmem>>, %arg2: memref<2x32x96xf32, #tpu.memory_space<vmem>>, %arg3: memref<2x1x96xf32, #tpu.memory_space<vmem>>, %arg4: memref<2x32x32xf32, #tpu.memory_space<vmem>>, %arg5: memref<2x1x32xf32, #tpu.memory_space<vmem>>, %arg6: memref<2x32x32xf32, #tpu.memory_space<vmem>>, %arg7: memref<2x1x32xf32, #tpu.memory_space<vmem>>, %arg8: memref<32x128xf32, #tpu.memory_space<vmem>>, %arg9: memref<1x128xf32, #tpu.memory_space<vmem>>, %arg10: memref<2x32x32xf32, #tpu.memory_space<vmem>>, %arg11: memref<2x1x32xf32, #tpu.memory_space<vmem>>, %arg12: memref<2x32x64xf32, #tpu.memory_space<vmem>>, %arg13: memref<2x1x64xf32, #tpu.memory_space<vmem>>, %arg14: memref<2x64x32xf32, #tpu.memory_space<vmem>>, %arg15: memref<2x1x32xf32, #tpu.memory_space<vmem>>, %arg16: memref<2x1x32xf32, #tpu.memory_space<vmem>>, %arg17: memref<2x1x32xf32, #tpu.memory_space<vmem>>, %arg18: memref<2x1x32xf32, #tpu.memory_space<vmem>>, %arg19: memref<2x1x32xf32, #tpu.memory_space<vmem>>, %arg20: memref<2x1x32xf32, #tpu.memory_space<vmem>>, %arg21: memref<2x1x32xf32, #tpu.memory_space<vmem>>, %arg22: memref<32x128xf32, #tpu.memory_space<vmem>>, %arg23: memref<1x128xf32, #tpu.memory_space<vmem>>, %arg24: memref<16x128xf32, #tpu.memory_space<vmem>>) attributes {dimension_semantics = [], scalar_prefetch = 0 : i64, scratch_operands = 0 : i64, tpu.core_type = #tpu.core_type<tc>} {
    %c0 = arith.constant 0 : index
    %c0_0 = arith.constant 0 : index
    %0 = vector.load %arg0[%c0, %c0_0] : memref<32x32xf32, #tpu.memory_space<vmem>>, vector<32x32xf32>
    %c0_1 = arith.constant 0 : index
    %c0_2 = arith.constant 0 : index
    %1 = vector.load %arg1[%c0_1, %c0_2] : memref<16x32xf32, #tpu.memory_space<vmem>>, vector<16x32xf32>
    %c0_3 = arith.constant 0 : index
    %c0_4 = arith.constant 0 : index
    %2 = vector.load %arg8[%c0_3, %c0_4] : memref<32x128xf32, #tpu.memory_space<vmem>>, vector<32x128xf32>
    %c0_5 = arith.constant 0 : index
    %c0_6 = arith.constant 0 : index
    %3 = vector.load %arg9[%c0_5, %c0_6] : memref<1x128xf32, #tpu.memory_space<vmem>>, vector<1x128xf32>
    %4 = arith.truncf %0 : vector<32x32xf32> to vector<32x32xbf16>
    %5 = arith.truncf %2 : vector<32x128xf32> to vector<32x128xbf16>
    %cst = arith.constant dense<0.000000e+00> : vector<32x128xf32>
    %6 = tpu.matmul %4, %5, %cst {dimension_numbers = #tpu.dot_dimension_numbers<[1], [0], [0], [1], [0, 0, 1, 1], [], []>} : vector<32x32xbf16>, vector<32x128xbf16>, vector<32x128xf32> -> vector<32x128xf32>
    %7 = vector.broadcast %3 : vector<1x128xf32> to vector<32x128xf32>
    %8 = arith.addf %6, %7 : vector<32x128xf32>
    %c0_7 = arith.constant 0 : index
    %c0_8 = arith.constant 0 : index
    %c0_9 = arith.constant 0 : index
    %9 = vector.load %arg2[%c0_7, %c0_8, %c0_9] : memref<2x32x96xf32, #tpu.memory_space<vmem>>, vector<1x32x96xf32>
    %10 = vector.shape_cast %9 : vector<1x32x96xf32> to vector<32x96xf32>
    %c0_10 = arith.constant 0 : index
    %c0_11 = arith.constant 0 : index
    %c0_12 = arith.constant 0 : index
    %11 = vector.load %arg3[%c0_10, %c0_11, %c0_12] : memref<2x1x96xf32, #tpu.memory_space<vmem>>, vector<1x1x96xf32>
    %12 = vector.shape_cast %11 : vector<1x1x96xf32> to vector<1x96xf32>
    %13 = arith.truncf %1 : vector<16x32xf32> to vector<16x32xbf16>
    %14 = arith.truncf %10 : vector<32x96xf32> to vector<32x96xbf16>
    %cst_13 = arith.constant dense<0.000000e+00> : vector<16x96xf32>
    %15 = tpu.matmul %13, %14, %cst_13 {dimension_numbers = #tpu.dot_dimension_numbers<[1], [0], [0], [1], [0, 0, 1, 1], [], []>} : vector<16x32xbf16>, vector<32x96xbf16>, vector<16x96xf32> -> vector<16x96xf32>
    %16 = vector.broadcast %12 : vector<1x96xf32> to vector<16x96xf32>
    %17 = arith.addf %15, %16 : vector<16x96xf32>
    %18 = vector.extract_strided_slice %17 {offsets = [0, 0], sizes = [16, 8], strides = [1, 1]} : vector<16x96xf32> to vector<16x8xf32>
    %19 = vector.shape_cast %18 : vector<16x8xf32> to vector<2x8x8xf32>
    %20 = vector.extract_strided_slice %17 {offsets = [0, 8], sizes = [16, 8], strides = [1, 1]} : vector<16x96xf32> to vector<16x8xf32>
    %21 = vector.shape_cast %20 : vector<16x8xf32> to vector<2x8x8xf32>
    %22 = vector.extract_strided_slice %17 {offsets = [0, 16], sizes = [16, 8], strides = [1, 1]} : vector<16x96xf32> to vector<16x8xf32>
    %23 = vector.shape_cast %22 : vector<16x8xf32> to vector<2x8x8xf32>
    %24 = vector.extract_strided_slice %17 {offsets = [0, 24], sizes = [16, 8], strides = [1, 1]} : vector<16x96xf32> to vector<16x8xf32>
    %25 = vector.shape_cast %24 : vector<16x8xf32> to vector<2x8x8xf32>
    %26 = tpu.concatenate %19, %21, %23, %25 in 0 : vector<2x8x8xf32>, vector<2x8x8xf32>, vector<2x8x8xf32>, vector<2x8x8xf32> -> vector<8x8x8xf32>
    %27 = arith.truncf %26 : vector<8x8x8xf32> to vector<8x8x8xbf16>
    %28 = vector.extract_strided_slice %17 {offsets = [0, 32], sizes = [16, 8], strides = [1, 1]} : vector<16x96xf32> to vector<16x8xf32>
    %29 = vector.shape_cast %28 : vector<16x8xf32> to vector<2x8x8xf32>
    %30 = vector.extract_strided_slice %17 {offsets = [0, 40], sizes = [16, 8], strides = [1, 1]} : vector<16x96xf32> to vector<16x8xf32>
    %31 = vector.shape_cast %30 : vector<16x8xf32> to vector<2x8x8xf32>
    %32 = vector.extract_strided_slice %17 {offsets = [0, 48], sizes = [16, 8], strides = [1, 1]} : vector<16x96xf32> to vector<16x8xf32>
    %33 = vector.shape_cast %32 : vector<16x8xf32> to vector<2x8x8xf32>
    %34 = vector.extract_strided_slice %17 {offsets = [0, 56], sizes = [16, 8], strides = [1, 1]} : vector<16x96xf32> to vector<16x8xf32>
    %35 = vector.shape_cast %34 : vector<16x8xf32> to vector<2x8x8xf32>
    %36 = tpu.concatenate %29, %31, %33, %35 in 0 : vector<2x8x8xf32>, vector<2x8x8xf32>, vector<2x8x8xf32>, vector<2x8x8xf32> -> vector<8x8x8xf32>
    %37 = arith.truncf %36 : vector<8x8x8xf32> to vector<8x8x8xbf16>
    %38 = vector.extract_strided_slice %17 {offsets = [0, 64], sizes = [16, 8], strides = [1, 1]} : vector<16x96xf32> to vector<16x8xf32>
    %39 = vector.shape_cast %38 : vector<16x8xf32> to vector<2x8x8xf32>
    %40 = vector.extract_strided_slice %17 {offsets = [0, 72], sizes = [16, 8], strides = [1, 1]} : vector<16x96xf32> to vector<16x8xf32>
    %41 = vector.shape_cast %40 : vector<16x8xf32> to vector<2x8x8xf32>
    %42 = vector.extract_strided_slice %17 {offsets = [0, 80], sizes = [16, 8], strides = [1, 1]} : vector<16x96xf32> to vector<16x8xf32>
    %43 = vector.shape_cast %42 : vector<16x8xf32> to vector<2x8x8xf32>
    %44 = vector.extract_strided_slice %17 {offsets = [0, 88], sizes = [16, 8], strides = [1, 1]} : vector<16x96xf32> to vector<16x8xf32>
    %45 = vector.shape_cast %44 : vector<16x8xf32> to vector<2x8x8xf32>
    %46 = tpu.concatenate %39, %41, %43, %45 in 0 : vector<2x8x8xf32>, vector<2x8x8xf32>, vector<2x8x8xf32>, vector<2x8x8xf32> -> vector<8x8x8xf32>
    %47 = arith.truncf %46 : vector<8x8x8xf32> to vector<8x8x8xbf16>
    %c0_14 = arith.constant 0 : index
    %c0_15 = arith.constant 0 : index
    %c0_16 = arith.constant 0 : index
    %48 = vector.load %arg4[%c0_14, %c0_15, %c0_16] : memref<2x32x32xf32, #tpu.memory_space<vmem>>, vector<1x32x32xf32>
    %49 = vector.shape_cast %48 : vector<1x32x32xf32> to vector<32x32xf32>
    %c0_17 = arith.constant 0 : index
    %c0_18 = arith.constant 0 : index
    %c0_19 = arith.constant 0 : index
    %50 = vector.load %arg5[%c0_17, %c0_18, %c0_19] : memref<2x1x32xf32, #tpu.memory_space<vmem>>, vector<1x1x32xf32>
    %51 = vector.shape_cast %50 : vector<1x1x32xf32> to vector<1x32xf32>
    "tpu.trace_start"() <{level = 10 : i32, message = "bqd,bkd->bqk"}> : () -> ()
    %cst_20 = arith.constant dense<0.000000e+00> : vector<8x8x8xf32>
    %52 = tpu.matmul %27, %37, %cst_20 {dimension_numbers = #tpu.dot_dimension_numbers<[2], [2], [1], [1], [0, 0, 0, 1, 1, 1], [0], [0]>} : vector<8x8x8xbf16>, vector<8x8x8xbf16>, vector<8x8x8xf32> -> vector<8x8x8xf32>
    "tpu.trace_stop"() : () -> ()
    %cst_21 = arith.constant 0.353553385 : f32
    %53 = vector.broadcast %cst_21 : f32 to vector<8x8x8xf32>
    %54 = arith.mulf %52, %53 : vector<8x8x8xf32>
    %cst_22 = arith.constant dense<0xFF800000> : vector<8x8xf32>
    %55 = vector.multi_reduction <maximumf>, %54, %cst_22 [2] : vector<8x8x8xf32> to vector<8x8xf32>
    %56 = vector.shape_cast %55 : vector<8x8xf32> to vector<8x8x1xf32>
    %57 = vector.broadcast %56 : vector<8x8x1xf32> to vector<8x8x8xf32>
    %58 = arith.subf %54, %57 : vector<8x8x8xf32>
    %59 = math.exp %58 : vector<8x8x8xf32>
    %cst_23 = arith.constant dense<0.000000e+00> : vector<8x8xf32>
    %60 = vector.multi_reduction <add>, %59, %cst_23 [2] : vector<8x8x8xf32> to vector<8x8xf32>
    %61 = vector.shape_cast %60 : vector<8x8xf32> to vector<8x8x1xf32>
    %62 = tpu.reciprocal %61 {approx = true} : vector<8x8x1xf32> -> vector<8x8x1xf32>
    %63 = vector.broadcast %62 : vector<8x8x1xf32> to vector<8x8x8xf32>
    %64 = arith.mulf %59, %63 : vector<8x8x8xf32>
    %65 = arith.truncf %64 : vector<8x8x8xf32> to vector<8x8x8xbf16>
    "tpu.trace_start"() <{level = 10 : i32, message = "bqk,bkd->bqd"}> : () -> ()
    %cst_24 = arith.constant dense<0.000000e+00> : vector<8x8x8xf32>
    %66 = tpu.matmul %65, %47, %cst_24 {dimension_numbers = #tpu.dot_dimension_numbers<[2], [1], [1], [2], [0, 0, 0, 1, 1, 2], [0], [0]>} : vector<8x8x8xbf16>, vector<8x8x8xbf16>, vector<8x8x8xf32> -> vector<8x8x8xf32>
    "tpu.trace_stop"() : () -> ()
    %67 = vector.extract_strided_slice %66 {offsets = [0, 0, 0], sizes = [2, 8, 8], strides = [1, 1, 1]} : vector<8x8x8xf32> to vector<2x8x8xf32>
    %68 = vector.shape_cast %67 : vector<2x8x8xf32> to vector<16x8xf32>
    %69 = arith.truncf %68 : vector<16x8xf32> to vector<16x8xbf16>
    %70 = vector.extract_strided_slice %49 {offsets = [0, 0], sizes = [8, 32], strides = [1, 1]} : vector<32x32xf32> to vector<8x32xf32>
    %71 = arith.truncf %70 : vector<8x32xf32> to vector<8x32xbf16>
    %cst_25 = arith.constant dense<0.000000e+00> : vector<16x32xf32>
    %72 = tpu.matmul %69, %71, %cst_25 {dimension_numbers = #tpu.dot_dimension_numbers<[1], [0], [0], [1], [0, 0, 1, 1], [], []>} : vector<16x8xbf16>, vector<8x32xbf16>, vector<16x32xf32> -> vector<16x32xf32>
    %73 = vector.broadcast %51 : vector<1x32xf32> to vector<16x32xf32>
    %74 = arith.addf %73, %72 : vector<16x32xf32>
    %75 = vector.extract_strided_slice %66 {offsets = [2, 0, 0], sizes = [2, 8, 8], strides = [1, 1, 1]} : vector<8x8x8xf32> to vector<2x8x8xf32>
    %76 = vector.shape_cast %75 : vector<2x8x8xf32> to vector<16x8xf32>
    %77 = arith.truncf %76 : vector<16x8xf32> to vector<16x8xbf16>
    %78 = vector.extract_strided_slice %49 {offsets = [8, 0], sizes = [8, 32], strides = [1, 1]} : vector<32x32xf32> to vector<8x32xf32>
    %79 = arith.truncf %78 : vector<8x32xf32> to vector<8x32xbf16>
    %cst_26 = arith.constant dense<0.000000e+00> : vector<16x32xf32>
    %80 = tpu.matmul %77, %79, %cst_26 {dimension_numbers = #tpu.dot_dimension_numbers<[1], [0], [0], [1], [0, 0, 1, 1], [], []>} : vector<16x8xbf16>, vector<8x32xbf16>, vector<16x32xf32> -> vector<16x32xf32>
    %81 = arith.addf %74, %80 : vector<16x32xf32>
    %82 = vector.extract_strided_slice %66 {offsets = [4, 0, 0], sizes = [2, 8, 8], strides = [1, 1, 1]} : vector<8x8x8xf32> to vector<2x8x8xf32>
    %83 = vector.shape_cast %82 : vector<2x8x8xf32> to vector<16x8xf32>
    %84 = arith.truncf %83 : vector<16x8xf32> to vector<16x8xbf16>
    %85 = vector.extract_strided_slice %49 {offsets = [16, 0], sizes = [8, 32], strides = [1, 1]} : vector<32x32xf32> to vector<8x32xf32>
    %86 = arith.truncf %85 : vector<8x32xf32> to vector<8x32xbf16>
    %cst_27 = arith.constant dense<0.000000e+00> : vector<16x32xf32>
    %87 = tpu.matmul %84, %86, %cst_27 {dimension_numbers = #tpu.dot_dimension_numbers<[1], [0], [0], [1], [0, 0, 1, 1], [], []>} : vector<16x8xbf16>, vector<8x32xbf16>, vector<16x32xf32> -> vector<16x32xf32>
    %88 = arith.addf %81, %87 : vector<16x32xf32>
    %89 = vector.extract_strided_slice %66 {offsets = [6, 0, 0], sizes = [2, 8, 8], strides = [1, 1, 1]} : vector<8x8x8xf32> to vector<2x8x8xf32>
    %90 = vector.shape_cast %89 : vector<2x8x8xf32> to vector<16x8xf32>
    %91 = arith.truncf %90 : vector<16x8xf32> to vector<16x8xbf16>
    %92 = vector.extract_strided_slice %49 {offsets = [24, 0], sizes = [8, 32], strides = [1, 1]} : vector<32x32xf32> to vector<8x32xf32>
    %93 = arith.truncf %92 : vector<8x32xf32> to vector<8x32xbf16>
    %cst_28 = arith.constant dense<0.000000e+00> : vector<16x32xf32>
    %94 = tpu.matmul %91, %93, %cst_28 {dimension_numbers = #tpu.dot_dimension_numbers<[1], [0], [0], [1], [0, 0, 1, 1], [], []>} : vector<16x8xbf16>, vector<8x32xbf16>, vector<16x32xf32> -> vector<16x32xf32>
    %95 = arith.addf %88, %94 : vector<16x32xf32>
    %96 = arith.addf %1, %95 : vector<16x32xf32>
    %c0_29 = arith.constant 0 : index
    %c0_30 = arith.constant 0 : index
    %c0_31 = arith.constant 0 : index
    %97 = vector.load %arg16[%c0_29, %c0_30, %c0_31] : memref<2x1x32xf32, #tpu.memory_space<vmem>>, vector<1x1x32xf32>
    %98 = vector.shape_cast %97 : vector<1x1x32xf32> to vector<1x32xf32>
    %c0_32 = arith.constant 0 : index
    %c0_33 = arith.constant 0 : index
    %c0_34 = arith.constant 0 : index
    %99 = vector.load %arg17[%c0_32, %c0_33, %c0_34] : memref<2x1x32xf32, #tpu.memory_space<vmem>>, vector<1x1x32xf32>
    %100 = vector.shape_cast %99 : vector<1x1x32xf32> to vector<1x32xf32>
    %cst_35 = arith.constant dense<0.000000e+00> : vector<16xf32>
    %101 = vector.multi_reduction <add>, %96, %cst_35 [1] : vector<16x32xf32> to vector<16xf32>
    %102 = vector.shape_cast %101 : vector<16xf32> to vector<16x1xf32>
    %cst_36 = arith.constant 3.200000e+01 : f32
    %103 = vector.broadcast %cst_36 : f32 to vector<16x1xf32>
    %104 = arith.divf %102, %103 : vector<16x1xf32>
    %105 = vector.broadcast %104 : vector<16x1xf32> to vector<16x32xf32>
    %106 = arith.subf %96, %105 : vector<16x32xf32>
    %107 = arith.mulf %106, %106 : vector<16x32xf32>
    %cst_37 = arith.constant dense<0.000000e+00> : vector<16xf32>
    %108 = vector.multi_reduction <add>, %107, %cst_37 [1] : vector<16x32xf32> to vector<16xf32>
    %109 = vector.shape_cast %108 : vector<16xf32> to vector<16x1xf32>
    %cst_38 = arith.constant 3.200000e+01 : f32
    %110 = vector.broadcast %cst_38 : f32 to vector<16x1xf32>
    %111 = arith.divf %109, %110 : vector<16x1xf32>
    %cst_39 = arith.constant 9.99999974E-6 : f32
    %112 = vector.broadcast %cst_39 : f32 to vector<16x1xf32>
    %113 = arith.addf %111, %112 : vector<16x1xf32>
    %114 = math.rsqrt %113 : vector<16x1xf32>
    %115 = vector.broadcast %114 : vector<16x1xf32> to vector<16x32xf32>
    %116 = arith.mulf %106, %115 : vector<16x32xf32>
    %117 = vector.broadcast %98 : vector<1x32xf32> to vector<16x32xf32>
    %118 = arith.mulf %116, %117 : vector<16x32xf32>
    %119 = vector.broadcast %100 : vector<1x32xf32> to vector<16x32xf32>
    %120 = arith.addf %118, %119 : vector<16x32xf32>
    %c0_40 = arith.constant 0 : index
    %c0_41 = arith.constant 0 : index
    %c0_42 = arith.constant 0 : index
    %121 = vector.load %arg6[%c0_40, %c0_41, %c0_42] : memref<2x32x32xf32, #tpu.memory_space<vmem>>, vector<1x32x32xf32>
    %122 = vector.shape_cast %121 : vector<1x32x32xf32> to vector<32x32xf32>
    %c0_43 = arith.constant 0 : index
    %c0_44 = arith.constant 0 : index
    %c0_45 = arith.constant 0 : index
    %123 = vector.load %arg7[%c0_43, %c0_44, %c0_45] : memref<2x1x32xf32, #tpu.memory_space<vmem>>, vector<1x1x32xf32>
    %124 = vector.shape_cast %123 : vector<1x1x32xf32> to vector<1x32xf32>
    %125 = arith.truncf %120 : vector<16x32xf32> to vector<16x32xbf16>
    %126 = arith.truncf %122 : vector<32x32xf32> to vector<32x32xbf16>
    %cst_46 = arith.constant dense<0.000000e+00> : vector<16x32xf32>
    %127 = tpu.matmul %125, %126, %cst_46 {dimension_numbers = #tpu.dot_dimension_numbers<[1], [0], [0], [1], [0, 0, 1, 1], [], []>} : vector<16x32xbf16>, vector<32x32xbf16>, vector<16x32xf32> -> vector<16x32xf32>
    %128 = vector.broadcast %124 : vector<1x32xf32> to vector<16x32xf32>
    %129 = arith.addf %127, %128 : vector<16x32xf32>
    %130 = vector.extract_strided_slice %129 {offsets = [0, 0], sizes = [16, 8], strides = [1, 1]} : vector<16x32xf32> to vector<16x8xf32>
    %131 = vector.shape_cast %130 : vector<16x8xf32> to vector<2x8x8xf32>
    %132 = vector.extract_strided_slice %129 {offsets = [0, 8], sizes = [16, 8], strides = [1, 1]} : vector<16x32xf32> to vector<16x8xf32>
    %133 = vector.shape_cast %132 : vector<16x8xf32> to vector<2x8x8xf32>
    %134 = vector.extract_strided_slice %129 {offsets = [0, 16], sizes = [16, 8], strides = [1, 1]} : vector<16x32xf32> to vector<16x8xf32>
    %135 = vector.shape_cast %134 : vector<16x8xf32> to vector<2x8x8xf32>
    %136 = vector.extract_strided_slice %129 {offsets = [0, 24], sizes = [16, 8], strides = [1, 1]} : vector<16x32xf32> to vector<16x8xf32>
    %137 = vector.shape_cast %136 : vector<16x8xf32> to vector<2x8x8xf32>
    %138 = tpu.concatenate %131, %133, %135, %137 in 0 : vector<2x8x8xf32>, vector<2x8x8xf32>, vector<2x8x8xf32>, vector<2x8x8xf32> -> vector<8x8x8xf32>
    %139 = arith.truncf %138 : vector<8x8x8xf32> to vector<8x8x8xbf16>
    %140 = vector.extract_strided_slice %8 {offsets = [0, 0], sizes = [32, 8], strides = [1, 1]} : vector<32x128xf32> to vector<32x8xf32>
    %141 = vector.shape_cast %140 : vector<32x8xf32> to vector<2x16x8xf32>
    %142 = vector.extract_strided_slice %8 {offsets = [0, 8], sizes = [32, 8], strides = [1, 1]} : vector<32x128xf32> to vector<32x8xf32>
    %143 = vector.shape_cast %142 : vector<32x8xf32> to vector<2x16x8xf32>
    %144 = vector.extract_strided_slice %8 {offsets = [0, 16], sizes = [32, 8], strides = [1, 1]} : vector<32x128xf32> to vector<32x8xf32>
    %145 = vector.shape_cast %144 : vector<32x8xf32> to vector<2x16x8xf32>
    %146 = vector.extract_strided_slice %8 {offsets = [0, 24], sizes = [32, 8], strides = [1, 1]} : vector<32x128xf32> to vector<32x8xf32>
    %147 = vector.shape_cast %146 : vector<32x8xf32> to vector<2x16x8xf32>
    %148 = tpu.concatenate %141, %143, %145, %147 in 0 : vector<2x16x8xf32>, vector<2x16x8xf32>, vector<2x16x8xf32>, vector<2x16x8xf32> -> vector<8x16x8xf32>
    %149 = arith.truncf %148 : vector<8x16x8xf32> to vector<8x16x8xbf16>
    %150 = vector.extract_strided_slice %8 {offsets = [0, 32], sizes = [32, 8], strides = [1, 1]} : vector<32x128xf32> to vector<32x8xf32>
    %151 = vector.shape_cast %150 : vector<32x8xf32> to vector<2x16x8xf32>
    %152 = vector.extract_strided_slice %8 {offsets = [0, 40], sizes = [32, 8], strides = [1, 1]} : vector<32x128xf32> to vector<32x8xf32>
    %153 = vector.shape_cast %152 : vector<32x8xf32> to vector<2x16x8xf32>
    %154 = vector.extract_strided_slice %8 {offsets = [0, 48], sizes = [32, 8], strides = [1, 1]} : vector<32x128xf32> to vector<32x8xf32>
    %155 = vector.shape_cast %154 : vector<32x8xf32> to vector<2x16x8xf32>
    %156 = vector.extract_strided_slice %8 {offsets = [0, 56], sizes = [32, 8], strides = [1, 1]} : vector<32x128xf32> to vector<32x8xf32>
    %157 = vector.shape_cast %156 : vector<32x8xf32> to vector<2x16x8xf32>
    %158 = tpu.concatenate %151, %153, %155, %157 in 0 : vector<2x16x8xf32>, vector<2x16x8xf32>, vector<2x16x8xf32>, vector<2x16x8xf32> -> vector<8x16x8xf32>
    %159 = arith.truncf %158 : vector<8x16x8xf32> to vector<8x16x8xbf16>
    %c0_47 = arith.constant 0 : index
    %c0_48 = arith.constant 0 : index
    %c0_49 = arith.constant 0 : index
    %160 = vector.load %arg10[%c0_47, %c0_48, %c0_49] : memref<2x32x32xf32, #tpu.memory_space<vmem>>, vector<1x32x32xf32>
    %161 = vector.shape_cast %160 : vector<1x32x32xf32> to vector<32x32xf32>
    %c0_50 = arith.constant 0 : index
    %c0_51 = arith.constant 0 : index
    %c0_52 = arith.constant 0 : index
    %162 = vector.load %arg11[%c0_50, %c0_51, %c0_52] : memref<2x1x32xf32, #tpu.memory_space<vmem>>, vector<1x1x32xf32>
    %163 = vector.shape_cast %162 : vector<1x1x32xf32> to vector<1x32xf32>
    "tpu.trace_start"() <{level = 10 : i32, message = "bqd,bkd->bqk"}> : () -> ()
    %cst_53 = arith.constant dense<0.000000e+00> : vector<8x8x16xf32>
    %164 = tpu.matmul %139, %149, %cst_53 {dimension_numbers = #tpu.dot_dimension_numbers<[2], [2], [1], [1], [0, 0, 0, 1, 1, 1], [0], [0]>} : vector<8x8x8xbf16>, vector<8x16x8xbf16>, vector<8x8x16xf32> -> vector<8x8x16xf32>
    "tpu.trace_stop"() : () -> ()
    %cst_54 = arith.constant 0.353553385 : f32
    %165 = vector.broadcast %cst_54 : f32 to vector<8x8x16xf32>
    %166 = arith.mulf %164, %165 : vector<8x8x16xf32>
    %cst_55 = arith.constant dense<0xFF800000> : vector<8x8xf32>
    %167 = vector.multi_reduction <maximumf>, %166, %cst_55 [2] : vector<8x8x16xf32> to vector<8x8xf32>
    %168 = vector.shape_cast %167 : vector<8x8xf32> to vector<8x8x1xf32>
    %169 = vector.broadcast %168 : vector<8x8x1xf32> to vector<8x8x16xf32>
    %170 = arith.subf %166, %169 : vector<8x8x16xf32>
    %171 = math.exp %170 : vector<8x8x16xf32>
    %cst_56 = arith.constant dense<0.000000e+00> : vector<8x8xf32>
    %172 = vector.multi_reduction <add>, %171, %cst_56 [2] : vector<8x8x16xf32> to vector<8x8xf32>
    %173 = vector.shape_cast %172 : vector<8x8xf32> to vector<8x8x1xf32>
    %174 = tpu.reciprocal %173 {approx = true} : vector<8x8x1xf32> -> vector<8x8x1xf32>
    %175 = vector.broadcast %174 : vector<8x8x1xf32> to vector<8x8x16xf32>
    %176 = arith.mulf %171, %175 : vector<8x8x16xf32>
    %177 = arith.truncf %176 : vector<8x8x16xf32> to vector<8x8x16xbf16>
    "tpu.trace_start"() <{level = 10 : i32, message = "bqk,bkd->bqd"}> : () -> ()
    %cst_57 = arith.constant dense<0.000000e+00> : vector<8x8x8xf32>
    %178 = tpu.matmul %177, %159, %cst_57 {dimension_numbers = #tpu.dot_dimension_numbers<[2], [1], [1], [2], [0, 0, 0, 1, 1, 2], [0], [0]>} : vector<8x8x16xbf16>, vector<8x16x8xbf16>, vector<8x8x8xf32> -> vector<8x8x8xf32>
    "tpu.trace_stop"() : () -> ()
    %179 = vector.extract_strided_slice %178 {offsets = [0, 0, 0], sizes = [2, 8, 8], strides = [1, 1, 1]} : vector<8x8x8xf32> to vector<2x8x8xf32>
    %180 = vector.shape_cast %179 : vector<2x8x8xf32> to vector<16x8xf32>
    %181 = arith.truncf %180 : vector<16x8xf32> to vector<16x8xbf16>
    %182 = vector.extract_strided_slice %161 {offsets = [0, 0], sizes = [8, 32], strides = [1, 1]} : vector<32x32xf32> to vector<8x32xf32>
    %183 = arith.truncf %182 : vector<8x32xf32> to vector<8x32xbf16>
    %cst_58 = arith.constant dense<0.000000e+00> : vector<16x32xf32>
    %184 = tpu.matmul %181, %183, %cst_58 {dimension_numbers = #tpu.dot_dimension_numbers<[1], [0], [0], [1], [0, 0, 1, 1], [], []>} : vector<16x8xbf16>, vector<8x32xbf16>, vector<16x32xf32> -> vector<16x32xf32>
    %185 = vector.broadcast %163 : vector<1x32xf32> to vector<16x32xf32>
    %186 = arith.addf %185, %184 : vector<16x32xf32>
    %187 = vector.extract_strided_slice %178 {offsets = [2, 0, 0], sizes = [2, 8, 8], strides = [1, 1, 1]} : vector<8x8x8xf32> to vector<2x8x8xf32>
    %188 = vector.shape_cast %187 : vector<2x8x8xf32> to vector<16x8xf32>
    %189 = arith.truncf %188 : vector<16x8xf32> to vector<16x8xbf16>
    %190 = vector.extract_strided_slice %161 {offsets = [8, 0], sizes = [8, 32], strides = [1, 1]} : vector<32x32xf32> to vector<8x32xf32>
    %191 = arith.truncf %190 : vector<8x32xf32> to vector<8x32xbf16>
    %cst_59 = arith.constant dense<0.000000e+00> : vector<16x32xf32>
    %192 = tpu.matmul %189, %191, %cst_59 {dimension_numbers = #tpu.dot_dimension_numbers<[1], [0], [0], [1], [0, 0, 1, 1], [], []>} : vector<16x8xbf16>, vector<8x32xbf16>, vector<16x32xf32> -> vector<16x32xf32>
    %193 = arith.addf %186, %192 : vector<16x32xf32>
    %194 = vector.extract_strided_slice %178 {offsets = [4, 0, 0], sizes = [2, 8, 8], strides = [1, 1, 1]} : vector<8x8x8xf32> to vector<2x8x8xf32>
    %195 = vector.shape_cast %194 : vector<2x8x8xf32> to vector<16x8xf32>
    %196 = arith.truncf %195 : vector<16x8xf32> to vector<16x8xbf16>
    %197 = vector.extract_strided_slice %161 {offsets = [16, 0], sizes = [8, 32], strides = [1, 1]} : vector<32x32xf32> to vector<8x32xf32>
    %198 = arith.truncf %197 : vector<8x32xf32> to vector<8x32xbf16>
    %cst_60 = arith.constant dense<0.000000e+00> : vector<16x32xf32>
    %199 = tpu.matmul %196, %198, %cst_60 {dimension_numbers = #tpu.dot_dimension_numbers<[1], [0], [0], [1], [0, 0, 1, 1], [], []>} : vector<16x8xbf16>, vector<8x32xbf16>, vector<16x32xf32> -> vector<16x32xf32>
    %200 = arith.addf %193, %199 : vector<16x32xf32>
    %201 = vector.extract_strided_slice %178 {offsets = [6, 0, 0], sizes = [2, 8, 8], strides = [1, 1, 1]} : vector<8x8x8xf32> to vector<2x8x8xf32>
    %202 = vector.shape_cast %201 : vector<2x8x8xf32> to vector<16x8xf32>
    %203 = arith.truncf %202 : vector<16x8xf32> to vector<16x8xbf16>
    %204 = vector.extract_strided_slice %161 {offsets = [24, 0], sizes = [8, 32], strides = [1, 1]} : vector<32x32xf32> to vector<8x32xf32>
    %205 = arith.truncf %204 : vector<8x32xf32> to vector<8x32xbf16>
    %cst_61 = arith.constant dense<0.000000e+00> : vector<16x32xf32>
    %206 = tpu.matmul %203, %205, %cst_61 {dimension_numbers = #tpu.dot_dimension_numbers<[1], [0], [0], [1], [0, 0, 1, 1], [], []>} : vector<16x8xbf16>, vector<8x32xbf16>, vector<16x32xf32> -> vector<16x32xf32>
    %207 = arith.addf %200, %206 : vector<16x32xf32>
    %208 = arith.addf %120, %207 : vector<16x32xf32>
    %c0_62 = arith.constant 0 : index
    %c0_63 = arith.constant 0 : index
    %c0_64 = arith.constant 0 : index
    %209 = vector.load %arg18[%c0_62, %c0_63, %c0_64] : memref<2x1x32xf32, #tpu.memory_space<vmem>>, vector<1x1x32xf32>
    %210 = vector.shape_cast %209 : vector<1x1x32xf32> to vector<1x32xf32>
    %c0_65 = arith.constant 0 : index
    %c0_66 = arith.constant 0 : index
    %c0_67 = arith.constant 0 : index
    %211 = vector.load %arg19[%c0_65, %c0_66, %c0_67] : memref<2x1x32xf32, #tpu.memory_space<vmem>>, vector<1x1x32xf32>
    %212 = vector.shape_cast %211 : vector<1x1x32xf32> to vector<1x32xf32>
    %cst_68 = arith.constant dense<0.000000e+00> : vector<16xf32>
    %213 = vector.multi_reduction <add>, %208, %cst_68 [1] : vector<16x32xf32> to vector<16xf32>
    %214 = vector.shape_cast %213 : vector<16xf32> to vector<16x1xf32>
    %cst_69 = arith.constant 3.200000e+01 : f32
    %215 = vector.broadcast %cst_69 : f32 to vector<16x1xf32>
    %216 = arith.divf %214, %215 : vector<16x1xf32>
    %217 = vector.broadcast %216 : vector<16x1xf32> to vector<16x32xf32>
    %218 = arith.subf %208, %217 : vector<16x32xf32>
    %219 = arith.mulf %218, %218 : vector<16x32xf32>
    %cst_70 = arith.constant dense<0.000000e+00> : vector<16xf32>
    %220 = vector.multi_reduction <add>, %219, %cst_70 [1] : vector<16x32xf32> to vector<16xf32>
    %221 = vector.shape_cast %220 : vector<16xf32> to vector<16x1xf32>
    %cst_71 = arith.constant 3.200000e+01 : f32
    %222 = vector.broadcast %cst_71 : f32 to vector<16x1xf32>
    %223 = arith.divf %221, %222 : vector<16x1xf32>
    %cst_72 = arith.constant 9.99999974E-6 : f32
    %224 = vector.broadcast %cst_72 : f32 to vector<16x1xf32>
    %225 = arith.addf %223, %224 : vector<16x1xf32>
    %226 = math.rsqrt %225 : vector<16x1xf32>
    %227 = vector.broadcast %226 : vector<16x1xf32> to vector<16x32xf32>
    %228 = arith.mulf %218, %227 : vector<16x32xf32>
    %229 = vector.broadcast %210 : vector<1x32xf32> to vector<16x32xf32>
    %230 = arith.mulf %228, %229 : vector<16x32xf32>
    %231 = vector.broadcast %212 : vector<1x32xf32> to vector<16x32xf32>
    %232 = arith.addf %230, %231 : vector<16x32xf32>
    %c0_73 = arith.constant 0 : index
    %c0_74 = arith.constant 0 : index
    %c0_75 = arith.constant 0 : index
    %233 = vector.load %arg12[%c0_73, %c0_74, %c0_75] : memref<2x32x64xf32, #tpu.memory_space<vmem>>, vector<1x32x64xf32>
    %234 = vector.shape_cast %233 : vector<1x32x64xf32> to vector<32x64xf32>
    %c0_76 = arith.constant 0 : index
    %c0_77 = arith.constant 0 : index
    %c0_78 = arith.constant 0 : index
    %235 = vector.load %arg13[%c0_76, %c0_77, %c0_78] : memref<2x1x64xf32, #tpu.memory_space<vmem>>, vector<1x1x64xf32>
    %236 = vector.shape_cast %235 : vector<1x1x64xf32> to vector<1x64xf32>
    %237 = arith.truncf %232 : vector<16x32xf32> to vector<16x32xbf16>
    %238 = arith.truncf %234 : vector<32x64xf32> to vector<32x64xbf16>
    %cst_79 = arith.constant dense<0.000000e+00> : vector<16x64xf32>
    %239 = tpu.matmul %237, %238, %cst_79 {dimension_numbers = #tpu.dot_dimension_numbers<[1], [0], [0], [1], [0, 0, 1, 1], [], []>} : vector<16x32xbf16>, vector<32x64xbf16>, vector<16x64xf32> -> vector<16x64xf32>
    %240 = vector.broadcast %236 : vector<1x64xf32> to vector<16x64xf32>
    %241 = arith.addf %239, %240 : vector<16x64xf32>
    %cst_80 = arith.constant 0.000000e+00 : f32
    %242 = vector.broadcast %cst_80 : f32 to vector<16x64xf32>
    %243 = arith.maximumf %241, %242 : vector<16x64xf32>
    %c0_81 = arith.constant 0 : index
    %c0_82 = arith.constant 0 : index
    %c0_83 = arith.constant 0 : index
    %244 = vector.load %arg14[%c0_81, %c0_82, %c0_83] : memref<2x64x32xf32, #tpu.memory_space<vmem>>, vector<1x64x32xf32>
    %245 = vector.shape_cast %244 : vector<1x64x32xf32> to vector<64x32xf32>
    %c0_84 = arith.constant 0 : index
    %c0_85 = arith.constant 0 : index
    %c0_86 = arith.constant 0 : index
    %246 = vector.load %arg15[%c0_84, %c0_85, %c0_86] : memref<2x1x32xf32, #tpu.memory_space<vmem>>, vector<1x1x32xf32>
    %247 = vector.shape_cast %246 : vector<1x1x32xf32> to vector<1x32xf32>
    %248 = arith.truncf %243 : vector<16x64xf32> to vector<16x64xbf16>
    %249 = arith.truncf %245 : vector<64x32xf32> to vector<64x32xbf16>
    %cst_87 = arith.constant dense<0.000000e+00> : vector<16x32xf32>
    %250 = tpu.matmul %248, %249, %cst_87 {dimension_numbers = #tpu.dot_dimension_numbers<[1], [0], [0], [1], [0, 0, 1, 1], [], []>} : vector<16x64xbf16>, vector<64x32xbf16>, vector<16x32xf32> -> vector<16x32xf32>
    %251 = vector.broadcast %247 : vector<1x32xf32> to vector<16x32xf32>
    %252 = arith.addf %250, %251 : vector<16x32xf32>
    %253 = arith.addf %232, %252 : vector<16x32xf32>
    %c0_88 = arith.constant 0 : index
    %c0_89 = arith.constant 0 : index
    %c0_90 = arith.constant 0 : index
    %254 = vector.load %arg20[%c0_88, %c0_89, %c0_90] : memref<2x1x32xf32, #tpu.memory_space<vmem>>, vector<1x1x32xf32>
    %255 = vector.shape_cast %254 : vector<1x1x32xf32> to vector<1x32xf32>
    %c0_91 = arith.constant 0 : index
    %c0_92 = arith.constant 0 : index
    %c0_93 = arith.constant 0 : index
    %256 = vector.load %arg21[%c0_91, %c0_92, %c0_93] : memref<2x1x32xf32, #tpu.memory_space<vmem>>, vector<1x1x32xf32>
    %257 = vector.shape_cast %256 : vector<1x1x32xf32> to vector<1x32xf32>
    %cst_94 = arith.constant dense<0.000000e+00> : vector<16xf32>
    %258 = vector.multi_reduction <add>, %253, %cst_94 [1] : vector<16x32xf32> to vector<16xf32>
    %259 = vector.shape_cast %258 : vector<16xf32> to vector<16x1xf32>
    %cst_95 = arith.constant 3.200000e+01 : f32
    %260 = vector.broadcast %cst_95 : f32 to vector<16x1xf32>
    %261 = arith.divf %259, %260 : vector<16x1xf32>
    %262 = vector.broadcast %261 : vector<16x1xf32> to vector<16x32xf32>
    %263 = arith.subf %253, %262 : vector<16x32xf32>
    %264 = arith.mulf %263, %263 : vector<16x32xf32>
    %cst_96 = arith.constant dense<0.000000e+00> : vector<16xf32>
    %265 = vector.multi_reduction <add>, %264, %cst_96 [1] : vector<16x32xf32> to vector<16xf32>
    %266 = vector.shape_cast %265 : vector<16xf32> to vector<16x1xf32>
    %cst_97 = arith.constant 3.200000e+01 : f32
    %267 = vector.broadcast %cst_97 : f32 to vector<16x1xf32>
    %268 = arith.divf %266, %267 : vector<16x1xf32>
    %cst_98 = arith.constant 9.99999974E-6 : f32
    %269 = vector.broadcast %cst_98 : f32 to vector<16x1xf32>
    %270 = arith.addf %268, %269 : vector<16x1xf32>
    %271 = math.rsqrt %270 : vector<16x1xf32>
    %272 = vector.broadcast %271 : vector<16x1xf32> to vector<16x32xf32>
    %273 = arith.mulf %263, %272 : vector<16x32xf32>
    %274 = vector.broadcast %255 : vector<1x32xf32> to vector<16x32xf32>
    %275 = arith.mulf %273, %274 : vector<16x32xf32>
    %276 = vector.broadcast %257 : vector<1x32xf32> to vector<16x32xf32>
    %277 = arith.addf %275, %276 : vector<16x32xf32>
    %c1 = arith.constant 1 : index
    %c0_99 = arith.constant 0 : index
    %c0_100 = arith.constant 0 : index
    %278 = vector.load %arg2[%c1, %c0_99, %c0_100] : memref<2x32x96xf32, #tpu.memory_space<vmem>>, vector<1x32x96xf32>
    %279 = vector.shape_cast %278 : vector<1x32x96xf32> to vector<32x96xf32>
    %c1_101 = arith.constant 1 : index
    %c0_102 = arith.constant 0 : index
    %c0_103 = arith.constant 0 : index
    %280 = vector.load %arg3[%c1_101, %c0_102, %c0_103] : memref<2x1x96xf32, #tpu.memory_space<vmem>>, vector<1x1x96xf32>
    %281 = vector.shape_cast %280 : vector<1x1x96xf32> to vector<1x96xf32>
    %282 = arith.truncf %277 : vector<16x32xf32> to vector<16x32xbf16>
    %283 = arith.truncf %279 : vector<32x96xf32> to vector<32x96xbf16>
    %cst_104 = arith.constant dense<0.000000e+00> : vector<16x96xf32>
    %284 = tpu.matmul %282, %283, %cst_104 {dimension_numbers = #tpu.dot_dimension_numbers<[1], [0], [0], [1], [0, 0, 1, 1], [], []>} : vector<16x32xbf16>, vector<32x96xbf16>, vector<16x96xf32> -> vector<16x96xf32>
    %285 = vector.broadcast %281 : vector<1x96xf32> to vector<16x96xf32>
    %286 = arith.addf %284, %285 : vector<16x96xf32>
    %287 = vector.extract_strided_slice %286 {offsets = [0, 0], sizes = [16, 8], strides = [1, 1]} : vector<16x96xf32> to vector<16x8xf32>
    %288 = vector.shape_cast %287 : vector<16x8xf32> to vector<2x8x8xf32>
    %289 = vector.extract_strided_slice %286 {offsets = [0, 8], sizes = [16, 8], strides = [1, 1]} : vector<16x96xf32> to vector<16x8xf32>
    %290 = vector.shape_cast %289 : vector<16x8xf32> to vector<2x8x8xf32>
    %291 = vector.extract_strided_slice %286 {offsets = [0, 16], sizes = [16, 8], strides = [1, 1]} : vector<16x96xf32> to vector<16x8xf32>
    %292 = vector.shape_cast %291 : vector<16x8xf32> to vector<2x8x8xf32>
    %293 = vector.extract_strided_slice %286 {offsets = [0, 24], sizes = [16, 8], strides = [1, 1]} : vector<16x96xf32> to vector<16x8xf32>
    %294 = vector.shape_cast %293 : vector<16x8xf32> to vector<2x8x8xf32>
    %295 = tpu.concatenate %288, %290, %292, %294 in 0 : vector<2x8x8xf32>, vector<2x8x8xf32>, vector<2x8x8xf32>, vector<2x8x8xf32> -> vector<8x8x8xf32>
    %296 = arith.truncf %295 : vector<8x8x8xf32> to vector<8x8x8xbf16>
    %297 = vector.extract_strided_slice %286 {offsets = [0, 32], sizes = [16, 8], strides = [1, 1]} : vector<16x96xf32> to vector<16x8xf32>
    %298 = vector.shape_cast %297 : vector<16x8xf32> to vector<2x8x8xf32>
    %299 = vector.extract_strided_slice %286 {offsets = [0, 40], sizes = [16, 8], strides = [1, 1]} : vector<16x96xf32> to vector<16x8xf32>
    %300 = vector.shape_cast %299 : vector<16x8xf32> to vector<2x8x8xf32>
    %301 = vector.extract_strided_slice %286 {offsets = [0, 48], sizes = [16, 8], strides = [1, 1]} : vector<16x96xf32> to vector<16x8xf32>
    %302 = vector.shape_cast %301 : vector<16x8xf32> to vector<2x8x8xf32>
    %303 = vector.extract_strided_slice %286 {offsets = [0, 56], sizes = [16, 8], strides = [1, 1]} : vector<16x96xf32> to vector<16x8xf32>
    %304 = vector.shape_cast %303 : vector<16x8xf32> to vector<2x8x8xf32>
    %305 = tpu.concatenate %298, %300, %302, %304 in 0 : vector<2x8x8xf32>, vector<2x8x8xf32>, vector<2x8x8xf32>, vector<2x8x8xf32> -> vector<8x8x8xf32>
    %306 = arith.truncf %305 : vector<8x8x8xf32> to vector<8x8x8xbf16>
    %307 = vector.extract_strided_slice %286 {offsets = [0, 64], sizes = [16, 8], strides = [1, 1]} : vector<16x96xf32> to vector<16x8xf32>
    %308 = vector.shape_cast %307 : vector<16x8xf32> to vector<2x8x8xf32>
    %309 = vector.extract_strided_slice %286 {offsets = [0, 72], sizes = [16, 8], strides = [1, 1]} : vector<16x96xf32> to vector<16x8xf32>
    %310 = vector.shape_cast %309 : vector<16x8xf32> to vector<2x8x8xf32>
    %311 = vector.extract_strided_slice %286 {offsets = [0, 80], sizes = [16, 8], strides = [1, 1]} : vector<16x96xf32> to vector<16x8xf32>
    %312 = vector.shape_cast %311 : vector<16x8xf32> to vector<2x8x8xf32>
    %313 = vector.extract_strided_slice %286 {offsets = [0, 88], sizes = [16, 8], strides = [1, 1]} : vector<16x96xf32> to vector<16x8xf32>
    %314 = vector.shape_cast %313 : vector<16x8xf32> to vector<2x8x8xf32>
    %315 = tpu.concatenate %308, %310, %312, %314 in 0 : vector<2x8x8xf32>, vector<2x8x8xf32>, vector<2x8x8xf32>, vector<2x8x8xf32> -> vector<8x8x8xf32>
    %316 = arith.truncf %315 : vector<8x8x8xf32> to vector<8x8x8xbf16>
    %c1_105 = arith.constant 1 : index
    %c0_106 = arith.constant 0 : index
    %c0_107 = arith.constant 0 : index
    %317 = vector.load %arg4[%c1_105, %c0_106, %c0_107] : memref<2x32x32xf32, #tpu.memory_space<vmem>>, vector<1x32x32xf32>
    %318 = vector.shape_cast %317 : vector<1x32x32xf32> to vector<32x32xf32>
    %c1_108 = arith.constant 1 : index
    %c0_109 = arith.constant 0 : index
    %c0_110 = arith.constant 0 : index
    %319 = vector.load %arg5[%c1_108, %c0_109, %c0_110] : memref<2x1x32xf32, #tpu.memory_space<vmem>>, vector<1x1x32xf32>
    %320 = vector.shape_cast %319 : vector<1x1x32xf32> to vector<1x32xf32>
    "tpu.trace_start"() <{level = 10 : i32, message = "bqd,bkd->bqk"}> : () -> ()
    %cst_111 = arith.constant dense<0.000000e+00> : vector<8x8x8xf32>
    %321 = tpu.matmul %296, %306, %cst_111 {dimension_numbers = #tpu.dot_dimension_numbers<[2], [2], [1], [1], [0, 0, 0, 1, 1, 1], [0], [0]>} : vector<8x8x8xbf16>, vector<8x8x8xbf16>, vector<8x8x8xf32> -> vector<8x8x8xf32>
    "tpu.trace_stop"() : () -> ()
    %cst_112 = arith.constant 0.353553385 : f32
    %322 = vector.broadcast %cst_112 : f32 to vector<8x8x8xf32>
    %323 = arith.mulf %321, %322 : vector<8x8x8xf32>
    %cst_113 = arith.constant dense<0xFF800000> : vector<8x8xf32>
    %324 = vector.multi_reduction <maximumf>, %323, %cst_113 [2] : vector<8x8x8xf32> to vector<8x8xf32>
    %325 = vector.shape_cast %324 : vector<8x8xf32> to vector<8x8x1xf32>
    %326 = vector.broadcast %325 : vector<8x8x1xf32> to vector<8x8x8xf32>
    %327 = arith.subf %323, %326 : vector<8x8x8xf32>
    %328 = math.exp %327 : vector<8x8x8xf32>
    %cst_114 = arith.constant dense<0.000000e+00> : vector<8x8xf32>
    %329 = vector.multi_reduction <add>, %328, %cst_114 [2] : vector<8x8x8xf32> to vector<8x8xf32>
    %330 = vector.shape_cast %329 : vector<8x8xf32> to vector<8x8x1xf32>
    %331 = tpu.reciprocal %330 {approx = true} : vector<8x8x1xf32> -> vector<8x8x1xf32>
    %332 = vector.broadcast %331 : vector<8x8x1xf32> to vector<8x8x8xf32>
    %333 = arith.mulf %328, %332 : vector<8x8x8xf32>
    %334 = arith.truncf %333 : vector<8x8x8xf32> to vector<8x8x8xbf16>
    "tpu.trace_start"() <{level = 10 : i32, message = "bqk,bkd->bqd"}> : () -> ()
    %cst_115 = arith.constant dense<0.000000e+00> : vector<8x8x8xf32>
    %335 = tpu.matmul %334, %316, %cst_115 {dimension_numbers = #tpu.dot_dimension_numbers<[2], [1], [1], [2], [0, 0, 0, 1, 1, 2], [0], [0]>} : vector<8x8x8xbf16>, vector<8x8x8xbf16>, vector<8x8x8xf32> -> vector<8x8x8xf32>
    "tpu.trace_stop"() : () -> ()
    %336 = vector.extract_strided_slice %335 {offsets = [0, 0, 0], sizes = [2, 8, 8], strides = [1, 1, 1]} : vector<8x8x8xf32> to vector<2x8x8xf32>
    %337 = vector.shape_cast %336 : vector<2x8x8xf32> to vector<16x8xf32>
    %338 = arith.truncf %337 : vector<16x8xf32> to vector<16x8xbf16>
    %339 = vector.extract_strided_slice %318 {offsets = [0, 0], sizes = [8, 32], strides = [1, 1]} : vector<32x32xf32> to vector<8x32xf32>
    %340 = arith.truncf %339 : vector<8x32xf32> to vector<8x32xbf16>
    %cst_116 = arith.constant dense<0.000000e+00> : vector<16x32xf32>
    %341 = tpu.matmul %338, %340, %cst_116 {dimension_numbers = #tpu.dot_dimension_numbers<[1], [0], [0], [1], [0, 0, 1, 1], [], []>} : vector<16x8xbf16>, vector<8x32xbf16>, vector<16x32xf32> -> vector<16x32xf32>
    %342 = vector.broadcast %320 : vector<1x32xf32> to vector<16x32xf32>
    %343 = arith.addf %342, %341 : vector<16x32xf32>
    %344 = vector.extract_strided_slice %335 {offsets = [2, 0, 0], sizes = [2, 8, 8], strides = [1, 1, 1]} : vector<8x8x8xf32> to vector<2x8x8xf32>
    %345 = vector.shape_cast %344 : vector<2x8x8xf32> to vector<16x8xf32>
    %346 = arith.truncf %345 : vector<16x8xf32> to vector<16x8xbf16>
    %347 = vector.extract_strided_slice %318 {offsets = [8, 0], sizes = [8, 32], strides = [1, 1]} : vector<32x32xf32> to vector<8x32xf32>
    %348 = arith.truncf %347 : vector<8x32xf32> to vector<8x32xbf16>
    %cst_117 = arith.constant dense<0.000000e+00> : vector<16x32xf32>
    %349 = tpu.matmul %346, %348, %cst_117 {dimension_numbers = #tpu.dot_dimension_numbers<[1], [0], [0], [1], [0, 0, 1, 1], [], []>} : vector<16x8xbf16>, vector<8x32xbf16>, vector<16x32xf32> -> vector<16x32xf32>
    %350 = arith.addf %343, %349 : vector<16x32xf32>
    %351 = vector.extract_strided_slice %335 {offsets = [4, 0, 0], sizes = [2, 8, 8], strides = [1, 1, 1]} : vector<8x8x8xf32> to vector<2x8x8xf32>
    %352 = vector.shape_cast %351 : vector<2x8x8xf32> to vector<16x8xf32>
    %353 = arith.truncf %352 : vector<16x8xf32> to vector<16x8xbf16>
    %354 = vector.extract_strided_slice %318 {offsets = [16, 0], sizes = [8, 32], strides = [1, 1]} : vector<32x32xf32> to vector<8x32xf32>
    %355 = arith.truncf %354 : vector<8x32xf32> to vector<8x32xbf16>
    %cst_118 = arith.constant dense<0.000000e+00> : vector<16x32xf32>
    %356 = tpu.matmul %353, %355, %cst_118 {dimension_numbers = #tpu.dot_dimension_numbers<[1], [0], [0], [1], [0, 0, 1, 1], [], []>} : vector<16x8xbf16>, vector<8x32xbf16>, vector<16x32xf32> -> vector<16x32xf32>
    %357 = arith.addf %350, %356 : vector<16x32xf32>
    %358 = vector.extract_strided_slice %335 {offsets = [6, 0, 0], sizes = [2, 8, 8], strides = [1, 1, 1]} : vector<8x8x8xf32> to vector<2x8x8xf32>
    %359 = vector.shape_cast %358 : vector<2x8x8xf32> to vector<16x8xf32>
    %360 = arith.truncf %359 : vector<16x8xf32> to vector<16x8xbf16>
    %361 = vector.extract_strided_slice %318 {offsets = [24, 0], sizes = [8, 32], strides = [1, 1]} : vector<32x32xf32> to vector<8x32xf32>
    %362 = arith.truncf %361 : vector<8x32xf32> to vector<8x32xbf16>
    %cst_119 = arith.constant dense<0.000000e+00> : vector<16x32xf32>
    %363 = tpu.matmul %360, %362, %cst_119 {dimension_numbers = #tpu.dot_dimension_numbers<[1], [0], [0], [1], [0, 0, 1, 1], [], []>} : vector<16x8xbf16>, vector<8x32xbf16>, vector<16x32xf32> -> vector<16x32xf32>
    %364 = arith.addf %357, %363 : vector<16x32xf32>
    %365 = arith.addf %277, %364 : vector<16x32xf32>
    %c1_120 = arith.constant 1 : index
    %c0_121 = arith.constant 0 : index
    %c0_122 = arith.constant 0 : index
    %366 = vector.load %arg16[%c1_120, %c0_121, %c0_122] : memref<2x1x32xf32, #tpu.memory_space<vmem>>, vector<1x1x32xf32>
    %367 = vector.shape_cast %366 : vector<1x1x32xf32> to vector<1x32xf32>
    %c1_123 = arith.constant 1 : index
    %c0_124 = arith.constant 0 : index
    %c0_125 = arith.constant 0 : index
    %368 = vector.load %arg17[%c1_123, %c0_124, %c0_125] : memref<2x1x32xf32, #tpu.memory_space<vmem>>, vector<1x1x32xf32>
    %369 = vector.shape_cast %368 : vector<1x1x32xf32> to vector<1x32xf32>
    %cst_126 = arith.constant dense<0.000000e+00> : vector<16xf32>
    %370 = vector.multi_reduction <add>, %365, %cst_126 [1] : vector<16x32xf32> to vector<16xf32>
    %371 = vector.shape_cast %370 : vector<16xf32> to vector<16x1xf32>
    %cst_127 = arith.constant 3.200000e+01 : f32
    %372 = vector.broadcast %cst_127 : f32 to vector<16x1xf32>
    %373 = arith.divf %371, %372 : vector<16x1xf32>
    %374 = vector.broadcast %373 : vector<16x1xf32> to vector<16x32xf32>
    %375 = arith.subf %365, %374 : vector<16x32xf32>
    %376 = arith.mulf %375, %375 : vector<16x32xf32>
    %cst_128 = arith.constant dense<0.000000e+00> : vector<16xf32>
    %377 = vector.multi_reduction <add>, %376, %cst_128 [1] : vector<16x32xf32> to vector<16xf32>
    %378 = vector.shape_cast %377 : vector<16xf32> to vector<16x1xf32>
    %cst_129 = arith.constant 3.200000e+01 : f32
    %379 = vector.broadcast %cst_129 : f32 to vector<16x1xf32>
    %380 = arith.divf %378, %379 : vector<16x1xf32>
    %cst_130 = arith.constant 9.99999974E-6 : f32
    %381 = vector.broadcast %cst_130 : f32 to vector<16x1xf32>
    %382 = arith.addf %380, %381 : vector<16x1xf32>
    %383 = math.rsqrt %382 : vector<16x1xf32>
    %384 = vector.broadcast %383 : vector<16x1xf32> to vector<16x32xf32>
    %385 = arith.mulf %375, %384 : vector<16x32xf32>
    %386 = vector.broadcast %367 : vector<1x32xf32> to vector<16x32xf32>
    %387 = arith.mulf %385, %386 : vector<16x32xf32>
    %388 = vector.broadcast %369 : vector<1x32xf32> to vector<16x32xf32>
    %389 = arith.addf %387, %388 : vector<16x32xf32>
    %c1_131 = arith.constant 1 : index
    %c0_132 = arith.constant 0 : index
    %c0_133 = arith.constant 0 : index
    %390 = vector.load %arg6[%c1_131, %c0_132, %c0_133] : memref<2x32x32xf32, #tpu.memory_space<vmem>>, vector<1x32x32xf32>
    %391 = vector.shape_cast %390 : vector<1x32x32xf32> to vector<32x32xf32>
    %c1_134 = arith.constant 1 : index
    %c0_135 = arith.constant 0 : index
    %c0_136 = arith.constant 0 : index
    %392 = vector.load %arg7[%c1_134, %c0_135, %c0_136] : memref<2x1x32xf32, #tpu.memory_space<vmem>>, vector<1x1x32xf32>
    %393 = vector.shape_cast %392 : vector<1x1x32xf32> to vector<1x32xf32>
    %394 = arith.truncf %389 : vector<16x32xf32> to vector<16x32xbf16>
    %395 = arith.truncf %391 : vector<32x32xf32> to vector<32x32xbf16>
    %cst_137 = arith.constant dense<0.000000e+00> : vector<16x32xf32>
    %396 = tpu.matmul %394, %395, %cst_137 {dimension_numbers = #tpu.dot_dimension_numbers<[1], [0], [0], [1], [0, 0, 1, 1], [], []>} : vector<16x32xbf16>, vector<32x32xbf16>, vector<16x32xf32> -> vector<16x32xf32>
    %397 = vector.broadcast %393 : vector<1x32xf32> to vector<16x32xf32>
    %398 = arith.addf %396, %397 : vector<16x32xf32>
    %399 = vector.extract_strided_slice %398 {offsets = [0, 0], sizes = [16, 8], strides = [1, 1]} : vector<16x32xf32> to vector<16x8xf32>
    %400 = vector.shape_cast %399 : vector<16x8xf32> to vector<2x8x8xf32>
    %401 = vector.extract_strided_slice %398 {offsets = [0, 8], sizes = [16, 8], strides = [1, 1]} : vector<16x32xf32> to vector<16x8xf32>
    %402 = vector.shape_cast %401 : vector<16x8xf32> to vector<2x8x8xf32>
    %403 = vector.extract_strided_slice %398 {offsets = [0, 16], sizes = [16, 8], strides = [1, 1]} : vector<16x32xf32> to vector<16x8xf32>
    %404 = vector.shape_cast %403 : vector<16x8xf32> to vector<2x8x8xf32>
    %405 = vector.extract_strided_slice %398 {offsets = [0, 24], sizes = [16, 8], strides = [1, 1]} : vector<16x32xf32> to vector<16x8xf32>
    %406 = vector.shape_cast %405 : vector<16x8xf32> to vector<2x8x8xf32>
    %407 = tpu.concatenate %400, %402, %404, %406 in 0 : vector<2x8x8xf32>, vector<2x8x8xf32>, vector<2x8x8xf32>, vector<2x8x8xf32> -> vector<8x8x8xf32>
    %408 = arith.truncf %407 : vector<8x8x8xf32> to vector<8x8x8xbf16>
    %409 = vector.extract_strided_slice %8 {offsets = [0, 64], sizes = [32, 8], strides = [1, 1]} : vector<32x128xf32> to vector<32x8xf32>
    %410 = vector.shape_cast %409 : vector<32x8xf32> to vector<2x16x8xf32>
    %411 = vector.extract_strided_slice %8 {offsets = [0, 72], sizes = [32, 8], strides = [1, 1]} : vector<32x128xf32> to vector<32x8xf32>
    %412 = vector.shape_cast %411 : vector<32x8xf32> to vector<2x16x8xf32>
    %413 = vector.extract_strided_slice %8 {offsets = [0, 80], sizes = [32, 8], strides = [1, 1]} : vector<32x128xf32> to vector<32x8xf32>
    %414 = vector.shape_cast %413 : vector<32x8xf32> to vector<2x16x8xf32>
    %415 = vector.extract_strided_slice %8 {offsets = [0, 88], sizes = [32, 8], strides = [1, 1]} : vector<32x128xf32> to vector<32x8xf32>
    %416 = vector.shape_cast %415 : vector<32x8xf32> to vector<2x16x8xf32>
    %417 = tpu.concatenate %410, %412, %414, %416 in 0 : vector<2x16x8xf32>, vector<2x16x8xf32>, vector<2x16x8xf32>, vector<2x16x8xf32> -> vector<8x16x8xf32>
    %418 = arith.truncf %417 : vector<8x16x8xf32> to vector<8x16x8xbf16>
    %419 = vector.extract_strided_slice %8 {offsets = [0, 96], sizes = [32, 8], strides = [1, 1]} : vector<32x128xf32> to vector<32x8xf32>
    %420 = vector.shape_cast %419 : vector<32x8xf32> to vector<2x16x8xf32>
    %421 = vector.extract_strided_slice %8 {offsets = [0, 104], sizes = [32, 8], strides = [1, 1]} : vector<32x128xf32> to vector<32x8xf32>
    %422 = vector.shape_cast %421 : vector<32x8xf32> to vector<2x16x8xf32>
    %423 = vector.extract_strided_slice %8 {offsets = [0, 112], sizes = [32, 8], strides = [1, 1]} : vector<32x128xf32> to vector<32x8xf32>
    %424 = vector.shape_cast %423 : vector<32x8xf32> to vector<2x16x8xf32>
    %425 = vector.extract_strided_slice %8 {offsets = [0, 120], sizes = [32, 8], strides = [1, 1]} : vector<32x128xf32> to vector<32x8xf32>
    %426 = vector.shape_cast %425 : vector<32x8xf32> to vector<2x16x8xf32>
    %427 = tpu.concatenate %420, %422, %424, %426 in 0 : vector<2x16x8xf32>, vector<2x16x8xf32>, vector<2x16x8xf32>, vector<2x16x8xf32> -> vector<8x16x8xf32>
    %428 = arith.truncf %427 : vector<8x16x8xf32> to vector<8x16x8xbf16>
    %c1_138 = arith.constant 1 : index
    %c0_139 = arith.constant 0 : index
    %c0_140 = arith.constant 0 : index
    %429 = vector.load %arg10[%c1_138, %c0_139, %c0_140] : memref<2x32x32xf32, #tpu.memory_space<vmem>>, vector<1x32x32xf32>
    %430 = vector.shape_cast %429 : vector<1x32x32xf32> to vector<32x32xf32>
    %c1_141 = arith.constant 1 : index
    %c0_142 = arith.constant 0 : index
    %c0_143 = arith.constant 0 : index
    %431 = vector.load %arg11[%c1_141, %c0_142, %c0_143] : memref<2x1x32xf32, #tpu.memory_space<vmem>>, vector<1x1x32xf32>
    %432 = vector.shape_cast %431 : vector<1x1x32xf32> to vector<1x32xf32>
    "tpu.trace_start"() <{level = 10 : i32, message = "bqd,bkd->bqk"}> : () -> ()
    %cst_144 = arith.constant dense<0.000000e+00> : vector<8x8x16xf32>
    %433 = tpu.matmul %408, %418, %cst_144 {dimension_numbers = #tpu.dot_dimension_numbers<[2], [2], [1], [1], [0, 0, 0, 1, 1, 1], [0], [0]>} : vector<8x8x8xbf16>, vector<8x16x8xbf16>, vector<8x8x16xf32> -> vector<8x8x16xf32>
    "tpu.trace_stop"() : () -> ()
    %cst_145 = arith.constant 0.353553385 : f32
    %434 = vector.broadcast %cst_145 : f32 to vector<8x8x16xf32>
    %435 = arith.mulf %433, %434 : vector<8x8x16xf32>
    %cst_146 = arith.constant dense<0xFF800000> : vector<8x8xf32>
    %436 = vector.multi_reduction <maximumf>, %435, %cst_146 [2] : vector<8x8x16xf32> to vector<8x8xf32>
    %437 = vector.shape_cast %436 : vector<8x8xf32> to vector<8x8x1xf32>
    %438 = vector.broadcast %437 : vector<8x8x1xf32> to vector<8x8x16xf32>
    %439 = arith.subf %435, %438 : vector<8x8x16xf32>
    %440 = math.exp %439 : vector<8x8x16xf32>
    %cst_147 = arith.constant dense<0.000000e+00> : vector<8x8xf32>
    %441 = vector.multi_reduction <add>, %440, %cst_147 [2] : vector<8x8x16xf32> to vector<8x8xf32>
    %442 = vector.shape_cast %441 : vector<8x8xf32> to vector<8x8x1xf32>
    %443 = tpu.reciprocal %442 {approx = true} : vector<8x8x1xf32> -> vector<8x8x1xf32>
    %444 = vector.broadcast %443 : vector<8x8x1xf32> to vector<8x8x16xf32>
    %445 = arith.mulf %440, %444 : vector<8x8x16xf32>
    %446 = arith.truncf %445 : vector<8x8x16xf32> to vector<8x8x16xbf16>
    "tpu.trace_start"() <{level = 10 : i32, message = "bqk,bkd->bqd"}> : () -> ()
    %cst_148 = arith.constant dense<0.000000e+00> : vector<8x8x8xf32>
    %447 = tpu.matmul %446, %428, %cst_148 {dimension_numbers = #tpu.dot_dimension_numbers<[2], [1], [1], [2], [0, 0, 0, 1, 1, 2], [0], [0]>} : vector<8x8x16xbf16>, vector<8x16x8xbf16>, vector<8x8x8xf32> -> vector<8x8x8xf32>
    "tpu.trace_stop"() : () -> ()
    %448 = vector.extract_strided_slice %447 {offsets = [0, 0, 0], sizes = [2, 8, 8], strides = [1, 1, 1]} : vector<8x8x8xf32> to vector<2x8x8xf32>
    %449 = vector.shape_cast %448 : vector<2x8x8xf32> to vector<16x8xf32>
    %450 = arith.truncf %449 : vector<16x8xf32> to vector<16x8xbf16>
    %451 = vector.extract_strided_slice %430 {offsets = [0, 0], sizes = [8, 32], strides = [1, 1]} : vector<32x32xf32> to vector<8x32xf32>
    %452 = arith.truncf %451 : vector<8x32xf32> to vector<8x32xbf16>
    %cst_149 = arith.constant dense<0.000000e+00> : vector<16x32xf32>
    %453 = tpu.matmul %450, %452, %cst_149 {dimension_numbers = #tpu.dot_dimension_numbers<[1], [0], [0], [1], [0, 0, 1, 1], [], []>} : vector<16x8xbf16>, vector<8x32xbf16>, vector<16x32xf32> -> vector<16x32xf32>
    %454 = vector.broadcast %432 : vector<1x32xf32> to vector<16x32xf32>
    %455 = arith.addf %454, %453 : vector<16x32xf32>
    %456 = vector.extract_strided_slice %447 {offsets = [2, 0, 0], sizes = [2, 8, 8], strides = [1, 1, 1]} : vector<8x8x8xf32> to vector<2x8x8xf32>
    %457 = vector.shape_cast %456 : vector<2x8x8xf32> to vector<16x8xf32>
    %458 = arith.truncf %457 : vector<16x8xf32> to vector<16x8xbf16>
    %459 = vector.extract_strided_slice %430 {offsets = [8, 0], sizes = [8, 32], strides = [1, 1]} : vector<32x32xf32> to vector<8x32xf32>
    %460 = arith.truncf %459 : vector<8x32xf32> to vector<8x32xbf16>
    %cst_150 = arith.constant dense<0.000000e+00> : vector<16x32xf32>
    %461 = tpu.matmul %458, %460, %cst_150 {dimension_numbers = #tpu.dot_dimension_numbers<[1], [0], [0], [1], [0, 0, 1, 1], [], []>} : vector<16x8xbf16>, vector<8x32xbf16>, vector<16x32xf32> -> vector<16x32xf32>
    %462 = arith.addf %455, %461 : vector<16x32xf32>
    %463 = vector.extract_strided_slice %447 {offsets = [4, 0, 0], sizes = [2, 8, 8], strides = [1, 1, 1]} : vector<8x8x8xf32> to vector<2x8x8xf32>
    %464 = vector.shape_cast %463 : vector<2x8x8xf32> to vector<16x8xf32>
    %465 = arith.truncf %464 : vector<16x8xf32> to vector<16x8xbf16>
    %466 = vector.extract_strided_slice %430 {offsets = [16, 0], sizes = [8, 32], strides = [1, 1]} : vector<32x32xf32> to vector<8x32xf32>
    %467 = arith.truncf %466 : vector<8x32xf32> to vector<8x32xbf16>
    %cst_151 = arith.constant dense<0.000000e+00> : vector<16x32xf32>
    %468 = tpu.matmul %465, %467, %cst_151 {dimension_numbers = #tpu.dot_dimension_numbers<[1], [0], [0], [1], [0, 0, 1, 1], [], []>} : vector<16x8xbf16>, vector<8x32xbf16>, vector<16x32xf32> -> vector<16x32xf32>
    %469 = arith.addf %462, %468 : vector<16x32xf32>
    %470 = vector.extract_strided_slice %447 {offsets = [6, 0, 0], sizes = [2, 8, 8], strides = [1, 1, 1]} : vector<8x8x8xf32> to vector<2x8x8xf32>
    %471 = vector.shape_cast %470 : vector<2x8x8xf32> to vector<16x8xf32>
    %472 = arith.truncf %471 : vector<16x8xf32> to vector<16x8xbf16>
    %473 = vector.extract_strided_slice %430 {offsets = [24, 0], sizes = [8, 32], strides = [1, 1]} : vector<32x32xf32> to vector<8x32xf32>
    %474 = arith.truncf %473 : vector<8x32xf32> to vector<8x32xbf16>
    %cst_152 = arith.constant dense<0.000000e+00> : vector<16x32xf32>
    %475 = tpu.matmul %472, %474, %cst_152 {dimension_numbers = #tpu.dot_dimension_numbers<[1], [0], [0], [1], [0, 0, 1, 1], [], []>} : vector<16x8xbf16>, vector<8x32xbf16>, vector<16x32xf32> -> vector<16x32xf32>
    %476 = arith.addf %469, %475 : vector<16x32xf32>
    %477 = arith.addf %389, %476 : vector<16x32xf32>
    %c1_153 = arith.constant 1 : index
    %c0_154 = arith.constant 0 : index
    %c0_155 = arith.constant 0 : index
    %478 = vector.load %arg18[%c1_153, %c0_154, %c0_155] : memref<2x1x32xf32, #tpu.memory_space<vmem>>, vector<1x1x32xf32>
    %479 = vector.shape_cast %478 : vector<1x1x32xf32> to vector<1x32xf32>
    %c1_156 = arith.constant 1 : index
    %c0_157 = arith.constant 0 : index
    %c0_158 = arith.constant 0 : index
    %480 = vector.load %arg19[%c1_156, %c0_157, %c0_158] : memref<2x1x32xf32, #tpu.memory_space<vmem>>, vector<1x1x32xf32>
    %481 = vector.shape_cast %480 : vector<1x1x32xf32> to vector<1x32xf32>
    %cst_159 = arith.constant dense<0.000000e+00> : vector<16xf32>
    %482 = vector.multi_reduction <add>, %477, %cst_159 [1] : vector<16x32xf32> to vector<16xf32>
    %483 = vector.shape_cast %482 : vector<16xf32> to vector<16x1xf32>
    %cst_160 = arith.constant 3.200000e+01 : f32
    %484 = vector.broadcast %cst_160 : f32 to vector<16x1xf32>
    %485 = arith.divf %483, %484 : vector<16x1xf32>
    %486 = vector.broadcast %485 : vector<16x1xf32> to vector<16x32xf32>
    %487 = arith.subf %477, %486 : vector<16x32xf32>
    %488 = arith.mulf %487, %487 : vector<16x32xf32>
    %cst_161 = arith.constant dense<0.000000e+00> : vector<16xf32>
    %489 = vector.multi_reduction <add>, %488, %cst_161 [1] : vector<16x32xf32> to vector<16xf32>
    %490 = vector.shape_cast %489 : vector<16xf32> to vector<16x1xf32>
    %cst_162 = arith.constant 3.200000e+01 : f32
    %491 = vector.broadcast %cst_162 : f32 to vector<16x1xf32>
    %492 = arith.divf %490, %491 : vector<16x1xf32>
    %cst_163 = arith.constant 9.99999974E-6 : f32
    %493 = vector.broadcast %cst_163 : f32 to vector<16x1xf32>
    %494 = arith.addf %492, %493 : vector<16x1xf32>
    %495 = math.rsqrt %494 : vector<16x1xf32>
    %496 = vector.broadcast %495 : vector<16x1xf32> to vector<16x32xf32>
    %497 = arith.mulf %487, %496 : vector<16x32xf32>
    %498 = vector.broadcast %479 : vector<1x32xf32> to vector<16x32xf32>
    %499 = arith.mulf %497, %498 : vector<16x32xf32>
    %500 = vector.broadcast %481 : vector<1x32xf32> to vector<16x32xf32>
    %501 = arith.addf %499, %500 : vector<16x32xf32>
    %c1_164 = arith.constant 1 : index
    %c0_165 = arith.constant 0 : index
    %c0_166 = arith.constant 0 : index
    %502 = vector.load %arg12[%c1_164, %c0_165, %c0_166] : memref<2x32x64xf32, #tpu.memory_space<vmem>>, vector<1x32x64xf32>
    %503 = vector.shape_cast %502 : vector<1x32x64xf32> to vector<32x64xf32>
    %c1_167 = arith.constant 1 : index
    %c0_168 = arith.constant 0 : index
    %c0_169 = arith.constant 0 : index
    %504 = vector.load %arg13[%c1_167, %c0_168, %c0_169] : memref<2x1x64xf32, #tpu.memory_space<vmem>>, vector<1x1x64xf32>
    %505 = vector.shape_cast %504 : vector<1x1x64xf32> to vector<1x64xf32>
    %506 = arith.truncf %501 : vector<16x32xf32> to vector<16x32xbf16>
    %507 = arith.truncf %503 : vector<32x64xf32> to vector<32x64xbf16>
    %cst_170 = arith.constant dense<0.000000e+00> : vector<16x64xf32>
    %508 = tpu.matmul %506, %507, %cst_170 {dimension_numbers = #tpu.dot_dimension_numbers<[1], [0], [0], [1], [0, 0, 1, 1], [], []>} : vector<16x32xbf16>, vector<32x64xbf16>, vector<16x64xf32> -> vector<16x64xf32>
    %509 = vector.broadcast %505 : vector<1x64xf32> to vector<16x64xf32>
    %510 = arith.addf %508, %509 : vector<16x64xf32>
    %cst_171 = arith.constant 0.000000e+00 : f32
    %511 = vector.broadcast %cst_171 : f32 to vector<16x64xf32>
    %512 = arith.maximumf %510, %511 : vector<16x64xf32>
    %c1_172 = arith.constant 1 : index
    %c0_173 = arith.constant 0 : index
    %c0_174 = arith.constant 0 : index
    %513 = vector.load %arg14[%c1_172, %c0_173, %c0_174] : memref<2x64x32xf32, #tpu.memory_space<vmem>>, vector<1x64x32xf32>
    %514 = vector.shape_cast %513 : vector<1x64x32xf32> to vector<64x32xf32>
    %c1_175 = arith.constant 1 : index
    %c0_176 = arith.constant 0 : index
    %c0_177 = arith.constant 0 : index
    %515 = vector.load %arg15[%c1_175, %c0_176, %c0_177] : memref<2x1x32xf32, #tpu.memory_space<vmem>>, vector<1x1x32xf32>
    %516 = vector.shape_cast %515 : vector<1x1x32xf32> to vector<1x32xf32>
    %517 = arith.truncf %512 : vector<16x64xf32> to vector<16x64xbf16>
    %518 = arith.truncf %514 : vector<64x32xf32> to vector<64x32xbf16>
    %cst_178 = arith.constant dense<0.000000e+00> : vector<16x32xf32>
    %519 = tpu.matmul %517, %518, %cst_178 {dimension_numbers = #tpu.dot_dimension_numbers<[1], [0], [0], [1], [0, 0, 1, 1], [], []>} : vector<16x64xbf16>, vector<64x32xbf16>, vector<16x32xf32> -> vector<16x32xf32>
    %520 = vector.broadcast %516 : vector<1x32xf32> to vector<16x32xf32>
    %521 = arith.addf %519, %520 : vector<16x32xf32>
    %522 = arith.addf %501, %521 : vector<16x32xf32>
    %c1_179 = arith.constant 1 : index
    %c0_180 = arith.constant 0 : index
    %c0_181 = arith.constant 0 : index
    %523 = vector.load %arg20[%c1_179, %c0_180, %c0_181] : memref<2x1x32xf32, #tpu.memory_space<vmem>>, vector<1x1x32xf32>
    %524 = vector.shape_cast %523 : vector<1x1x32xf32> to vector<1x32xf32>
    %c1_182 = arith.constant 1 : index
    %c0_183 = arith.constant 0 : index
    %c0_184 = arith.constant 0 : index
    %525 = vector.load %arg21[%c1_182, %c0_183, %c0_184] : memref<2x1x32xf32, #tpu.memory_space<vmem>>, vector<1x1x32xf32>
    %526 = vector.shape_cast %525 : vector<1x1x32xf32> to vector<1x32xf32>
    %cst_185 = arith.constant dense<0.000000e+00> : vector<16xf32>
    %527 = vector.multi_reduction <add>, %522, %cst_185 [1] : vector<16x32xf32> to vector<16xf32>
    %528 = vector.shape_cast %527 : vector<16xf32> to vector<16x1xf32>
    %cst_186 = arith.constant 3.200000e+01 : f32
    %529 = vector.broadcast %cst_186 : f32 to vector<16x1xf32>
    %530 = arith.divf %528, %529 : vector<16x1xf32>
    %531 = vector.broadcast %530 : vector<16x1xf32> to vector<16x32xf32>
    %532 = arith.subf %522, %531 : vector<16x32xf32>
    %533 = arith.mulf %532, %532 : vector<16x32xf32>
    %cst_187 = arith.constant dense<0.000000e+00> : vector<16xf32>
    %534 = vector.multi_reduction <add>, %533, %cst_187 [1] : vector<16x32xf32> to vector<16xf32>
    %535 = vector.shape_cast %534 : vector<16xf32> to vector<16x1xf32>
    %cst_188 = arith.constant 3.200000e+01 : f32
    %536 = vector.broadcast %cst_188 : f32 to vector<16x1xf32>
    %537 = arith.divf %535, %536 : vector<16x1xf32>
    %cst_189 = arith.constant 9.99999974E-6 : f32
    %538 = vector.broadcast %cst_189 : f32 to vector<16x1xf32>
    %539 = arith.addf %537, %538 : vector<16x1xf32>
    %540 = math.rsqrt %539 : vector<16x1xf32>
    %541 = vector.broadcast %540 : vector<16x1xf32> to vector<16x32xf32>
    %542 = arith.mulf %532, %541 : vector<16x32xf32>
    %543 = vector.broadcast %524 : vector<1x32xf32> to vector<16x32xf32>
    %544 = arith.mulf %542, %543 : vector<16x32xf32>
    %545 = vector.broadcast %526 : vector<1x32xf32> to vector<16x32xf32>
    %546 = arith.addf %544, %545 : vector<16x32xf32>
    %c0_190 = arith.constant 0 : index
    %c0_191 = arith.constant 0 : index
    %547 = vector.load %arg22[%c0_190, %c0_191] : memref<32x128xf32, #tpu.memory_space<vmem>>, vector<32x128xf32>
    %c0_192 = arith.constant 0 : index
    %c0_193 = arith.constant 0 : index
    %548 = vector.load %arg23[%c0_192, %c0_193] : memref<1x128xf32, #tpu.memory_space<vmem>>, vector<1x128xf32>
    %549 = arith.truncf %546 : vector<16x32xf32> to vector<16x32xbf16>
    %550 = arith.truncf %547 : vector<32x128xf32> to vector<32x128xbf16>
    %cst_194 = arith.constant dense<0.000000e+00> : vector<16x128xf32>
    %551 = tpu.matmul %549, %550, %cst_194 {dimension_numbers = #tpu.dot_dimension_numbers<[1], [0], [0], [1], [0, 0, 1, 1], [], []>} : vector<16x32xbf16>, vector<32x128xbf16>, vector<16x128xf32> -> vector<16x128xf32>
    %552 = vector.broadcast %548 : vector<1x128xf32> to vector<16x128xf32>
    %553 = arith.addf %551, %552 : vector<16x128xf32>
    %c0_195 = arith.constant 0 : index
    %c0_196 = arith.constant 0 : index
    %554 = vector.load %arg24[%c0_195, %c0_196] : memref<16x128xf32, #tpu.memory_space<vmem>>, vector<16x128xf32>
    tpu.vector_store %arg24[%c0_195, %c0_196], %553 {strides = array<i32>} : memref<16x128xf32, #tpu.memory_space<vmem>>, vector<16x128xf32>,
    return
  }
}

</mosaic_0001>

<bundles_post_ra>
// kernel: model_forward.1
= control target key start
LH: loop header
LB: loop body
LE: loop exit
PB: predicated region body
PF: predicated region fallthrough
CT: control target
= control target key end

     0   :  { %vm96_vm0 = vcmask 261120   ;;  %s4576_s28 = smov 104   ;;  %s4578_s29 = smov 112   ;;  %vm188_vm1 = vcmask 64512   ;;  %vm485_vm2 = vcmask 1043456   ;;  %vm1130_vm10 = vcmask 130048   ;;  %s4541_s2 = inlined_call_operand.vmem [shape: f32[2,32,96], index: 2, kind: input, shape index: {}]   ;;  %s4542_s1 = inlined_call_operand.vmem [shape: f32[16,32], index: 1, kind: input, shape index: {}]   ;;  %s4543_s3 = inlined_call_operand.vmem [shape: f32[2,1,96], index: 3, kind: input, shape index: {}]   ;;  %s4544_s8 = inlined_call_operand.vmem [shape: f32[32,128], index: 8, kind: input, shape index: {}]   ;;  %s4545_s0 = inlined_call_operand.vmem [shape: f32[32,32], index: 0, kind: input, shape index: {}]   ;;  %s4546_s9 = inlined_call_operand.vmem [shape: f32[1,128], index: 9, kind: input, shape index: {}]   ;;  %s4547_s4 = inlined_call_operand.vmem [shape: f32[2,32,32], index: 4, kind: input, shape index: {}]   ;;  %s4548_s5 = inlined_call_operand.vmem [shape: f32[2,1,32], index: 5, kind: input, shape index: {}]   ;;  %s4549_s16 = inlined_call_operand.vmem [shape: f32[2,1,32], index: 16, kind: input, shape index: {}]   ;;  %s4550_s17 = inlined_call_operand.vmem [shape: f32[2,1,32], index: 17, kind: input, shape index: {}]   ;;  %s4551_s6 = inlined_call_operand.vmem [shape: f32[2,32,32], index: 6, kind: input, shape index: {}]   ;;  %s4552_s7 = inlined_call_operand.vmem [shape: f32[2,1,32], index: 7, kind: input, shape index: {}]   ;;  %s4553_s10 = inlined_call_operand.vmem [shape: f32[2,32,32], index: 10, kind: input, shape index: {}]   ;;  %s4554_s11 = inlined_call_operand.vmem [shape: f32[2,1,32], index: 11, kind: input, shape index: {}]   ;;  %s4555_s18 = inlined_call_operand.vmem [shape: f32[2,1,32], index: 18, kind: input, shape index: {}]   ;;  %s4556_s19 = inlined_call_operand.vmem [shape: f32[2,1,32], index: 19, kind: input, shape index: {}]   ;;  %s4557_s13 = inlined_call_operand.vmem [shape: f32[2,1,64], index: 13, kind: input, shape index: {}]   ;;  %s4558_s12 = inlined_call_operand.vmem [shape: f32[2,32,64], index: 12, kind: input, shape index: {}]   ;;  %s4559_s15 = inlined_call_operand.vmem [shape: f32[2,1,32], index: 15, kind: input, shape index: {}]   ;;  %s4560_s14 = inlined_call_operand.vmem [shape: f32[2,64,32], index: 14, kind: input, shape index: {}]   ;;  %s4561_s20 = inlined_call_operand.vmem [shape: f32[2,1,32], index: 20, kind: input, shape index: {}]   ;;  %s4562_s21 = inlined_call_operand.vmem [shape: f32[2,1,32], index: 21, kind: input, shape index: {}]   ;;  %s4563_s23 = inlined_call_operand.vmem [shape: f32[1,128], index: 23, kind: input, shape index: {}]   ;;  %s4564_s22 = inlined_call_operand.vmem [shape: f32[32,128], index: 22, kind: input, shape index: {}]   ;;  %s4565_s24 = inlined_call_operand.vmem [shape: f32[16,128], index: 24, kind: output, shape index: {}]  }
   0x1   :  { %4587 = sst [smem:[#allocation2_spill]] %s4541_s2  ;;  %s4582_s2 = smov 64  }
   0x2   :  { %4588 = sst [smem:[#allocation3_spill]] %s4542_s1  ;;  %s4609_s1 = smov 112  }
   0x3   :  { %4589 = sst [smem:[#allocation4_spill]] %s4543_s3  ;;  %s4574_s3 = smov 96  }
   0x4   :  { %4590 = sst [smem:[#allocation5_spill]] %s4544_s8  ;;  %s4612_s30 = smov 96  }
   0x5   :  { %4591 = sst [smem:[#allocation6_spill]] %s4545_s0 }
   0x6   :  { %4592 = sst [smem:[#allocation7_spill]] %s4546_s9 }
   0x7   :  { %4593 = sst [smem:[#allocation8_spill]] %s4547_s4  ;;  %s4580_s4 = smov 120  }
   0x8   :  { %4594 = sst [smem:[#allocation9_spill]] %s4548_s5 }
   0x9   :  { %4595 = sst [smem:[#allocation10_spill]] %s4549_s16 }
   0xa   :  { %4596 = sst [smem:[#allocation11_spill]] %s4556_s19 }
   0xb   :  { %4597 = sst [smem:[#allocation12_spill]] %s4563_s23 }
   0xc   :  { %4598 = sst [smem:[#allocation13_spill]] %s4564_s22 }
   0xd   :  { %4599 = sst [smem:[#allocation14_spill]] %s4565_s24 }
   0xe   :  { %s4600_s27 = sld [smem:[#allocation2_spill]] }
   0xf   :  { %s4601_s25 = sld [smem:[#allocation3_spill]] }
  0x10   :  { %s4602_s26 = sld [smem:[#allocation4_spill]] }
  0x11   :  { %s4603_s8 = sld [smem:[#allocation5_spill]] }
  0x12   :  { %s4604_s5 = sld [smem:[#allocation6_spill]] }
  0x13   :  { %s4606_s9 = sld [smem:[#allocation8_spill]] }
  0x14   :  { %v124_v0 = vld [vmem:[%s4600_s27 + $0x10] sm:$0xff]  ;;  %v125_v1 = vld [vmem:[%s4600_s27 + $0x18] sm:$0xff]  ;;  %v122_v2 = vld [vmem:[%s4600_s27] sm:$0xff]  ;;  %s4611_s16 = sld [smem:[#allocation10_spill]] }
  0x15   :  { %v129_v3 = vpack.c.bf16 %v125_v1, %v124_v0  ;;  %v123_v4 = vld [vmem:[%s4600_s27 + $0x8] sm:$0xff]  ;;  %v3682_v6 = vld [vmem:[%s4601_s25] sm:$0xff]  ;;  %s4614_s22 = sld [smem:[#allocation11_spill]] }
  0x16   :  { %v128_v5 = vpack.c.bf16 %v123_v4, %v122_v2  ;;  %v3687_v7 = vld [vmem:[%s4601_s25 + $0x8] sm:$0xff]  ;;  %v3355_v9 = vld [vmem:[%s4602_s26] ss:$0 sm:$0xff] }
  0x17   :  { %142 = vmatpush.bf16.msra.mxu1 %v129_v3  ;;  %v127_v8 = vpack.c.bf16 %v3687_v7, %v3682_v6  ;;  %v86_v48 = vld [vmem:[%s4603_s8 + $0x10] sm:$0xff]  ;;  %v87_v49 = vld [vmem:[%s4603_s8 + $0x18] sm:$0xff]  ;;  %v84_v51 = vld [vmem:[%s4603_s8] sm:$0xff] }
  0x18   :  { %v92_v50 = vpack.c.bf16 %v87_v49, %v86_v48  ;;  %v85_v52 = vld [vmem:[%s4603_s8 + $0x8] sm:$0xff]  ;;  %v78_v54 = vld [vmem:[%s4604_s5] sm:$0xff]  ;;  %v80_v57 = vld [vmem:[%s4604_s5 + $0x10] sm:$0xff]  ;;  %s4608_s8 = smov 120  }
  0x19   :  { %v91_v53 = vpack.c.bf16 %v85_v52, %v84_v51  ;;  %v79_v55 = vld [vmem:[%s4604_s5 + $0x8] sm:$0xff]  ;;  %v81_v58 = vld [vmem:[%s4604_s5 + $0x18] sm:$0xff]  ;;  %s4610_s5 = smov 104  }
  0x1a   :  { %109 = vmatpush.bf16.msra.mxu0 %v92_v50  ;;  %v89_v56 = vpack.c.bf16 %v79_v55, %v78_v54  ;;  %v90_v59 = vpack.c.bf16 %v81_v58, %v80_v57 }
  0x1b   :  { %143 = vmatpush.bf16.msra.mxu1 %v128_v5 }
  0x1e   :  { %3159 = vmatmul.msk.bf16.vlgmr.msra.gmra.mxu1 %vm96_vm0, %v127_v8  ;;  %110 = vmatpush.bf16.msra.mxu0 %v91_v53 }
  0x21   :  { %3157 = vmatmul.msk.bf16.vlgmr.msra.gmra.mxu0 %vm96_vm0, %v89_v56 }
  0x31   :  { %3158 = vmatmul.msk.bf16.gmra.mxu0 %vm96_vm0, %v90_v59 }
  0x9b   :  { %v145_v10 = vpop.f32.mrf.mxu1 }
  0x9c   :  { %v146_v11 = vadd.f32 %v3355_v9, %v145_v10 }
  0x9e   :  { %164 = vrot.lane.b32.xlu2 %v146_v11, %s4576_s28  ;;  %v170_v12 = vpack.c.bf16 %v146_v11, %v146_v11 }
  0xa0   :  { %v184_v13 = vunpack.c.l.b16 %v170_v12 }
  0xa2   :  { %v185_v16 = vpack.c.b16 %v184_v13, %v184_v13 }
  0xa3   :  { %v147_v14 = vpop.f32.mrf.mxu1 }
  0xa4   :  { %v148_v15 = vadd.f32 %v3355_v9, %v147_v14 }
  0xa6   :  { %166 = vrot.lane.b32.xlu1 %v148_v15, %s4576_s28  ;;  %154 = vrot.lane.b32.xlu0 %v148_v15, %s4580_s4  ;;  %v171_v17 = vpack.c.bf16 %v148_v15, %v148_v15 }
  0xa7   :  { %186 = vrot.lane.b32.xlu2 %v185_v16, %s4574_s3 }
  0xa8   :  { %v209_v18 = vunpack.c.l.b16 %v171_v17 }
  0xaa   :  { %v3699_v19 = vpack.c.b16 %v209_v18, %v209_v18 }
  0xae   :  { %158 = vrot.lane.b32.xlu1 %v146_v11, %s4578_s29  ;;  %152 = vrot.lane.b32.xlu0 %v146_v11, %s4580_s4 }
  0xaf   :  { %211 = vrot.lane.b32.xlu2 %v3699_v19, %s4574_s3 }
  0xb6   :  { %160 = vrot.lane.b32.xlu0 %v148_v15, %s4578_s29  ;;  %s4605_s29 = sld [smem:[#allocation7_spill]] }
  0xf8   :  { %v165_v20 = vpop.permute.xlu2 %164 }
  0xf9   :  { %v3720_v38 = vpack.c.bf16 %v165_v20, %v165_v20 }
  0xfb   :  { %v329_v43 = vunpack.c.l.b16 %v3720_v38 }
  0xfd   :  { %v3735_v46 = vpack.c.b16 %v329_v43, %v329_v43 }
 0x101   :  { %v187_v21 = vpop.permute.xlu2 %186 }
 0x102   :  { %v193_v22 = vsel %vm188_vm1, %v187_v21, 0 }
 0x103   :  { %202 = vmatpush.bf16.xpose.msra.mxu2 %v193_v22 }
 0x109   :  { %v212_v23 = vpop.permute.xlu2 %211 }
 0x10a   :  { %3160 = vmatmul.msk.bf16.vlgmr.msra.gmra.mxu2 %vm188_vm1, %v170_v12  ;;  %v217_v24 = vsel %vm188_vm1, %v212_v23, 0 }
 0x10b   :  { %226 = vmatpush.bf16.xpose.msra.mxu3 %v217_v24 }
 0x112   :  { %3161 = vmatmul.msk.bf16.vlgmr.msra.gmra.mxu3 %vm188_vm1, %v171_v17 }
 0x118   :  { %v167_v25 = vpop.permute.xlu1 %166  ;;  %v155_v26 = vpop.permute.xlu0 %154 }
 0x119   :  { %v3710_v27 = vpack.c.bf16 %v155_v26, %v155_v26  ;;  %v3713_v29 = vpack.c.bf16 %v167_v25, %v167_v25  ;;  %v112_v25 = vpop.f32.mrf.mxu0  ;;  %v3356_v26 = vld [vmem:[%s4605_s29] ss:$0 sm:$0xff]  ;;  %s4607_s29 = sld [smem:[#allocation9_spill]] }
 0x11b   :  { %v257_v28 = vunpack.c.l.b16 %v3710_v27  ;;  %v353_v33 = vunpack.c.l.b16 %v3713_v29 }
 0x11d   :  { %v258_v30 = vpack.c.b16 %v257_v28, %v257_v28  ;;  %v3722_v39 = vpack.c.b16 %v353_v33, %v353_v33  ;;  %v3803_v28 = vadd.f32 %v3356_v26, %v112_v25 }
 0x11f   :  { %259 = vrot.lane.b32.xlu1 %v258_v30, %s4574_s3 }
 0x120   :  { %v159_v31 = vpop.permute.xlu1 %158  ;;  %v153_v32 = vpop.permute.xlu0 %152 }
 0x121   :  { %v174_v34 = vpack.c.bf16 %v159_v31, %v159_v31  ;;  %v3717_v35 = vpack.c.bf16 %v153_v32, %v153_v32 }
 0x123   :  { %v281_v36 = vunpack.c.l.b16 %v174_v34  ;;  %v233_v37 = vunpack.c.l.b16 %v3717_v35 }
 0x125   :  { %v234_v40 = vpack.c.b16 %v233_v37, %v233_v37  ;;  %v3724_v41 = vpack.c.b16 %v281_v36, %v281_v36 }
 0x127   :  { %355 = vrot.lane.b32.xlu1 %v3722_v39, %s4574_s3  ;;  %235 = vrot.lane.b32.xlu0 %v234_v40, %s4574_s3 }
 0x128   :  { %283 = vrot.lane.b32.xlu2 %v3724_v41, %s4574_s3  ;;  %v161_v42 = vpop.permute.xlu0 %160 }
 0x129   :  { %v3732_v44 = vpack.c.bf16 %v161_v42, %v161_v42 }
 0x12b   :  { %v305_v45 = vunpack.c.l.b16 %v3732_v44 }
 0x12d   :  { %v3737_v47 = vpack.c.b16 %v305_v45, %v305_v45 }
 0x12f   :  { %331 = vrot.lane.b32.xlu0 %v3735_v46, %s4574_s3  ;;  %307 = vrot.lane.b32.xlu1 %v3737_v47, %s4574_s3 }
 0x130   :  { %480 = vrot.lane.b32.xlu2 %v185_v16, %s4582_s2 }
 0x137   :  { %544 = vrot.lane.b32.xlu0 %v258_v30, %s4582_s2  ;;  %523 = vrot.lane.b32.xlu1 %v234_v40, %s4582_s2 }
 0x182   :  { %v284_v60 = vpop.permute.xlu2 %283 }
 0x183   :  { %v289_v61 = vsel %vm188_vm1, %v284_v60, 0 }
 0x184   :  { %298 = vmatpush.bf16.xpose.msrb.mxu3 %v289_v61 }
 0x18a   :  { %v481_v62 = vpop.permute.xlu2 %480 }
 0x18b   :  { %v487_v63 = vsel %vm485_vm2, %v481_v62, 0  ;;  %3164 = vmatmul.msk.bf16.vlgmr.msrb.gmra.mxu3 %vm188_vm1, %v174_v34 }
 0x18c   :  { %496 = vmatpush.bf16.msra.mxu3 %v487_v63 }
 0x18d   :  { %v204_v0 = vpop.f32.mrf.mxu2 }
 0x18e   :  { %v3775_v1 = vmul.f32 0.35355338, %v204_v0 }
 0x190   :  { %v384_v2 = vsel %vm188_vm1, %v3775_v1, -inf }
 0x191   :  { %385 = vmax.xlane.f32.xlu0 %v384_v2  ;;  %v260_v3 = vpop.permute.xlu1 %259 }
 0x192   :  { %v265_v4 = vsel %vm188_vm1, %v260_v3, 0 }
 0x193   :  { %274 = vmatpush.bf16.xpose.msrb.mxu2 %v265_v4 }
 0x195   :  { %v206_v5 = vpop.f32.mrf.mxu2  ;;  %v228_v8 = vpop.f32.mrf.mxu3 }
 0x196   :  { %v3780_v9 = vmul.f32 0.35355338, %v228_v8 }
 0x198   :  { %v387_v10 = vsel %vm188_vm1, %v3780_v9, -inf }
 0x199   :  { %388 = vmax.xlane.f32.xlu2 %v387_v10  ;;  %v356_v11 = vpop.permute.xlu1 %355  ;;  %v236_v12 = vpop.permute.xlu0 %235 }
 0x19a   :  { %v361_v13 = vsel %vm188_vm1, %v356_v11, 0  ;;  %3163 = vmatmul.msk.bf16.vlgmr.msrb.gmra.mxu2 %vm188_vm1, %v3710_v27  ;;  %v241_v14 = vsel %vm188_vm1, %v236_v12, 0  ;;  %v114_v27 = vpop.f32.mrf.mxu0 }
 0x19b   :  { %250 = vmatpush.bf16.xpose.msrb.mxu1 %v241_v14  ;;  %370 = vmatpush.bf16.xpose.msra.mxu2 %v361_v13  ;;  %v3805_v30 = vadd.f32 %v3356_v26, %v114_v27 }
 0x19d   :  { %v230_v15 = vpop.f32.mrf.mxu3  ;;  %v3809_v31 = vpack.i.bf16 %v3805_v30, %v3803_v28 }
 0x1a1   :  { %v308_v16 = vpop.permute.xlu1 %307  ;;  %v332_v17 = vpop.permute.xlu0 %331 }
 0x1a2   :  { %v337_v18 = vsel %vm188_vm1, %v332_v17, 0  ;;  %3162 = vmatmul.msk.bf16.vlgmr.msrb.gmra.mxu1 %vm188_vm1, %v3717_v35  ;;  %v313_v20 = vsel %vm188_vm1, %v308_v16, 0 }
 0x1a3   :  { %322 = vmatpush.bf16.xpose.msrb.mxu0 %v313_v20  ;;  %346 = vmatpush.bf16.xpose.msra.mxu1 %v337_v18 }
 0x1a9   :  { %v524_v21 = vpop.permute.xlu1 %523  ;;  %v545_v22 = vpop.permute.xlu0 %544 }
 0x1aa   :  { %v529_v23 = vsel %vm485_vm2, %v524_v21, 0  ;;  %v550_v24 = vsel %vm485_vm2, %v545_v22, 0  ;;  %3165 = vmatmul.msk.bf16.vlgmr.msrb.gmra.mxu0 %vm188_vm1, %v3732_v44  ;;  %3167 = vmatmul.msk.bf16.vlgmr.msra.gmra.mxu2 %vm188_vm1, %v3713_v29  ;;  %v117_v29 = vpop.f32.mrf.mxu0 }
 0x1ab   :  { %538 = vmatpush.bf16.msrb.mxu1 %v529_v23  ;;  %559 = vmatpush.bf16.msrb.mxu2 %v550_v24  ;;  %v3811_v32 = vadd.f32 %v3356_v26, %v117_v29 }
 0x1b2   :  { %3166 = vmatmul.msk.bf16.vlgmr.msra.gmra.mxu1 %vm188_vm1, %v3720_v38  ;;  %v119_v33 = vpop.f32.mrf.mxu0 }
 0x1b3   :  { %v3813_v34 = vadd.f32 %v3356_v26, %v119_v33 }
 0x1b5   :  { %v3817_v35 = vpack.i.bf16 %v3813_v34, %v3811_v32 }
 0x204   :  { %v386_v49 = vpop.xlane.xlu0 %385 }
 0x205   :  { %v408_v53 = vsub.f32 %v3775_v1, %v386_v49 }
 0x207   :  { %v416_v55 = vmul.f32 1.442695, %v408_v53 }
 0x209   :  { %3381 = vpow2.f32 %v416_v55 }
 0x20c   :  { %v389_v57 = vpop.xlane.xlu2 %388 }
 0x20d   :  { %v409_v62 = vsub.f32 %v3780_v9, %v389_v57 }
 0x20e   :  { %v300_v36 = vpop.f32.mrf.mxu3 }
 0x20f   :  { %v380_v37 = vmul.f32 0.35355338, %v300_v36  ;;  %v418_v0 = vmul.f32 1.442695, %v409_v62  ;;  %v3382_v3 = vpop.eup %3381 }
 0x210   :  { %v432_v5 = vsel %vm188_vm1, %v3382_v3, 0.0 }
 0x211   :  { %v396_v38 = vsel %vm188_vm1, %v380_v37, -inf  ;;  %3383 = vpow2.f32 %v418_v0 }
 0x212   :  { %397 = vmax.xlane.f32.xlu0 %v396_v38 }
 0x216   :  { %v302_v40 = vpop.f32.mrf.mxu3 }
 0x217   :  { %v3384_v10 = vpop.eup %3383 }
 0x218   :  { %v435_v9 = vsel %vm188_vm1, %v3384_v10, 0.0 }
 0x21d   :  { %v276_v42 = vpop.f32.mrf.mxu2 }
 0x21e   :  { %v379_v58 = vmul.f32 0.35355338, %v276_v42 }
 0x21f   :  { %v252_v43 = vpop.f32.mrf.mxu1 }
 0x220   :  { %v378_v44 = vmul.f32 0.35355338, %v252_v43  ;;  %v393_v63 = vsel %vm188_vm1, %v379_v58, -inf }
 0x222   :  { %v390_v45 = vsel %vm188_vm1, %v378_v44, -inf }
 0x223   :  { %391 = vmax.xlane.f32.xlu1 %v390_v45 }
 0x225   :  { %v278_v48 = vpop.f32.mrf.mxu2 }
 0x226   :  { %628 = vrot.lane.b32.xlu0 %v3722_v39, %s4582_s2 }
 0x227   :  { %v254_v50 = vpop.f32.mrf.mxu1  ;;  %v324_v51 = vpop.f32.mrf.mxu0 }
 0x228   :  { %v381_v52 = vmul.f32 0.35355338, %v324_v51 }
 0x22a   :  { %v399_v54 = vsel %vm188_vm1, %v381_v52, -inf }
 0x22b   :  { %400 = vmax.xlane.f32.xlu2 %v399_v54 }
 0x22d   :  { %v372_v56 = vpop.f32.mrf.mxu2 }
 0x22e   :  { %v383_v2 = vmul.f32 0.35355338, %v372_v56 }
 0x22f   :  { %v326_v59 = vpop.f32.mrf.mxu0  ;;  %v348_v60 = vpop.f32.mrf.mxu1 }
 0x230   :  { %v382_v61 = vmul.f32 0.35355338, %v348_v60  ;;  %v405_v8 = vsel %vm188_vm1, %v383_v2, -inf }
 0x232   :  { %v402_v39 = vsel %vm188_vm1, %v382_v61, -inf }
 0x233   :  { %403 = vmax.xlane.f32.xlu1 %v402_v39  ;;  %394 = vmax.xlane.f32.xlu2 %v393_v63 }
 0x235   :  { %v374_v1 = vpop.f32.mrf.mxu2 }
 0x237   :  { %v350_v4 = vpop.f32.mrf.mxu1 }
 0x23b   :  { %433 = vadd.xlane.f32.xlu1 %v432_v5  ;;  %406 = vmax.xlane.f32.xlu2 %v405_v8 }
 0x243   :  { %436 = vadd.xlane.f32.xlu1 %v435_v9 }
 0x253   :  { %502 = vrot.lane.b32.xlu2 %v3699_v19, %s4582_s2 }
 0x285   :  { %v398_v11 = vpop.xlane.xlu0 %397 }
 0x286   :  { %v412_v12 = vsub.f32 %v380_v37, %v398_v11 }
 0x288   :  { %v424_v13 = vmul.f32 1.442695, %v412_v12  ;;  %v909_v12 = vpack.c.bf16 %v3803_v28, %v3803_v28 }
 0x28a   :  { %3385 = vpow2.f32 %v424_v13  ;;  %v910_v13 = vpack.c.bf16 %v3805_v30, %v3805_v30 }
 0x290   :  { %v3833_v14 = vpop.eup %3385 }
 0x291   :  { %v444_v15 = vsel %vm188_vm1, %v3833_v14, 0.0 }
 0x292   :  { %445 = vadd.xlane.f32.xlu1 %v444_v15 }
 0x296   :  { %v392_v16 = vpop.xlane.xlu1 %391 }
 0x297   :  { %v410_v17 = vsub.f32 %v378_v44, %v392_v16 }
 0x298   :  { %v629_v18 = vpop.permute.xlu0 %628 }
 0x299   :  { %v420_v20 = vmul.f32 1.442695, %v410_v17  ;;  %v634_v21 = vsel %vm485_vm2, %v629_v18, 0  ;;  %v179_v17 = vld [vmem:[%s4606_s9 + $0x8] sm:$0xff] }
 0x29a   :  { %643 = vmatpush.bf16.msra.mxu2 %v634_v21 }
 0x29b   :  { %3387 = vpow2.f32 %v420_v20 }
 0x29e   :  { %v401_v22 = vpop.xlane.xlu2 %400 }
 0x29f   :  { %v413_v19 = vsub.f32 %v381_v52, %v401_v22  ;;  %v677_v22 = vpack.c.bf16 %v179_v17, %v179_v17 }
 0x2a1   :  { %v3388_v23 = vpop.eup %3387  ;;  %v426_v24 = vmul.f32 1.442695, %v413_v19  ;;  %v932_v19 = vunpack.c.l.b16 %v909_v12  ;;  %v3357_v12 = vld [vmem:[%s4607_s29] ss:$0 sm:$0xff] }
 0x2a2   :  { %v438_v25 = vsel %vm188_vm1, %v3388_v23, 0.0 }
 0x2a3   :  { %3389 = vpow2.f32 %v426_v24  ;;  %439 = vadd.xlane.f32.xlu2 %v438_v25  ;;  %v682_v24 = vsel %vm485_vm2, %v677_v22, 0 }
 0x2a6   :  { %v404_v26 = vpop.xlane.xlu1 %403  ;;  %v395_v27 = vpop.xlane.xlu2 %394 }
 0x2a7   :  { %v414_v29 = vsub.f32 %v382_v61, %v404_v26  ;;  %v411_v33 = vsub.f32 %v379_v58, %v395_v27 }
 0x2a9   :  { %v3839_v36 = vpop.eup %3389  ;;  %v428_v37 = vmul.f32 1.442695, %v414_v29  ;;  %v422_v38 = vmul.f32 1.442695, %v411_v33  ;;  %v911_v33 = vpack.c.bf16 %v3811_v32, %v3811_v32 }
 0x2aa   :  { %v447_v40 = vsel %vm188_vm1, %v3839_v36, 0.0 }
 0x2ab   :  { %3391 = vpow2.f32 %v428_v37  ;;  %448 = vadd.xlane.f32.xlu1 %v447_v40  ;;  %v912_v37 = vpack.c.bf16 %v3813_v34, %v3813_v34 }
 0x2ac   :  { %3393 = vpow2.f32 %v422_v38  ;;  %v180_v38 = vld [vmem:[%s4606_s9 + $0x10] sm:$0xff] }
 0x2ad   :  { %v957_v32 = vunpack.c.l.b16 %v912_v37 }
 0x2ae   :  { %v434_v42 = vpop.xlane.xlu1 %433  ;;  %v407_v43 = vpop.xlane.xlu2 %406 }
 0x2af   :  { %3395 = vrcp.f32 %v434_v42  ;;  %v415_v44 = vsub.f32 %v383_v2, %v407_v43 }
 0x2b1   :  { %v3843_v45 = vpop.eup %3391  ;;  %v430_v48 = vmul.f32 1.442695, %v415_v44  ;;  %v701_v44 = vpack.c.bf16 %v180_v38, %v180_v38 }
 0x2b2   :  { %v3394_v49 = vpop.eup %3393  ;;  %v450_v50 = vsel %vm188_vm1, %v3843_v45, 0.0 }
 0x2b3   :  { %3397 = vpow2.f32 %v430_v48  ;;  %451 = vadd.xlane.f32.xlu2 %v450_v50  ;;  %v441_v51 = vsel %vm188_vm1, %v3394_v49, 0.0  ;;  %v956_v48 = vunpack.c.l.b16 %v911_v33 }
 0x2b4   :  { %442 = vadd.xlane.f32.xlu0 %v441_v51 }
 0x2b5   :  { %v3396_v52 = vpop.eup %3395 }
 0x2b6   :  { %v464_v53 = vmul.f32 %v3396_v52, %v3382_v3  ;;  %v437_v54 = vpop.xlane.xlu1 %436  ;;  %v503_v55 = vpop.permute.xlu2 %502 }
 0x2b7   :  { %3399 = vrcp.f32 %v437_v54  ;;  %v508_v56 = vsel %vm485_vm2, %v503_v55, 0  ;;  %v3898_v55 = vpack.c.b16 %v957_v32, %v956_v48  ;;  %v813_v48 = vld [vmem:[%s4551_s6] sm:$0xff]  ;;  %v814_v32 = vld [vmem:[%s4551_s6 + $0x8] sm:$0xff] }
 0x2b8   :  { %v472_v57 = vpack.c.bf16 %v464_v53, %v464_v53  ;;  %517 = vmatpush.bf16.msra.mxu0 %v508_v56  ;;  %v706_v53 = vsel %vm485_vm2, %v701_v44, 0 }
 0x2b9   :  { %v3849_v58 = vpop.eup %3397 }
 0x2ba   :  { %3168 = vmatmul.msk.bf16.vlgmr.msra.gmra.mxu3 %vm188_vm1, %v472_v57  ;;  %v453_v59 = vsel %vm188_vm1, %v3849_v58, 0.0 }
 0x2bc   :  { %454 = vadd.xlane.f32.xlu0 %v453_v59 }
 0x2bd   :  { %v3400_v60 = vpop.eup %3399 }
 0x2be   :  { %v465_v61 = vmul.f32 %v3400_v60, %v3384_v10  ;;  %v181_v60 = vld [vmem:[%s4606_s9 + $0x18] sm:$0xff] }
 0x2c0   :  { %v473_v62 = vpack.c.bf16 %v465_v61, %v465_v61  ;;  %v725_v61 = vpack.c.bf16 %v181_v60, %v181_v60 }
 0x2c2   :  { %3169 = vmatmul.msk.bf16.vlgmr.msra.gmra.mxu0 %vm188_vm1, %v473_v62  ;;  %v730_v62 = vsel %vm485_vm2, %v725_v61, 0 }
 0x2c4   :  { %586 = vrot.lane.b32.xlu1 %v3737_v47, %s4582_s2  ;;  %v178_v47 = vld [vmem:[%s4606_s9] sm:$0xff] }
 0x2c5   :  { %v650_v8 = vpack.c.bf16 %v178_v47, %v178_v47 }
 0x2c7   :  { %v655_v11 = vsel %vm485_vm2, %v650_v8, 0 }
 0x2cb   :  { %565 = vrot.lane.b32.xlu2 %v3724_v41, %s4582_s2 }
 0x2d0   :  { %607 = vrot.lane.b32.xlu0 %v3735_v46, %s4582_s2 }
 0x305   :  { %v446_v2 = vpop.xlane.xlu1 %445 }
 0x316   :  { %v440_v39 = vpop.xlane.xlu2 %439 }
 0x317   :  { %3401 = vrcp.f32 %v440_v39 }
 0x318   :  { %3403 = vrcp.f32 %v446_v2 }
 0x31d   :  { %v3402_v63 = vpop.eup %3401 }
 0x31e   :  { %v466_v0 = vmul.f32 %v3402_v63, %v3388_v23  ;;  %v449_v41 = vpop.xlane.xlu1 %448  ;;  %v3404_v5 = vpop.eup %3403  ;;  %v933_v23 = vunpack.c.l.b16 %v910_v13 }
 0x31f   :  { %v468_v46 = vmul.f32 %v3404_v5, %v3833_v14 }
 0x320   :  { %v474_v1 = vpack.c.bf16 %v466_v0, %v466_v0  ;;  %v3880_v26 = vpack.c.b16 %v933_v23, %v932_v19 }
 0x321   :  { %v476_v18 = vpack.c.bf16 %v468_v46, %v468_v46 }
 0x322   :  { %3170 = vmatmul.msk.bf16.vlgmr.msrb.gmra.mxu1 %vm188_vm1, %v474_v1 }
 0x326   :  { %v452_v3 = vpop.xlane.xlu2 %451 }
 0x327   :  { %v443_v4 = vpop.xlane.xlu0 %442 }
 0x328   :  { %3405 = vrcp.f32 %v443_v4 }
 0x329   :  { %3407 = vrcp.f32 %v449_v41 }
 0x32e   :  { %v3406_v10 = vpop.eup %3405  ;;  %v566_v9 = vpop.permute.xlu2 %565 }
 0x32f   :  { %v467_v15 = vmul.f32 %v3406_v10, %v3394_v49  ;;  %v571_v16 = vsel %vm485_vm2, %v566_v9, 0  ;;  %v455_v20 = vpop.xlane.xlu0 %454  ;;  %v3408_v21 = vpop.eup %3407 }
 0x330   :  { %580 = vmatpush.bf16.msrb.mxu3 %v571_v16  ;;  %3409 = vrcp.f32 %v455_v20  ;;  %v469_v28 = vmul.f32 %v3408_v21, %v3839_v36  ;;  %v939_v36 = vsel %vm188_vm1, %v3880_v26, 0 }
 0x331   :  { %v475_v14 = vpack.c.bf16 %v467_v15, %v467_v15  ;;  %3411 = vrcp.f32 %v452_v3 }
 0x332   :  { %v477_v27 = vpack.c.bf16 %v469_v28, %v469_v28 }
 0x333   :  { %3171 = vmatmul.msk.bf16.vlgmr.msrb.gmra.mxu2 %vm188_vm1, %v475_v14  ;;  %3172 = vmatmul.msk.bf16.vlgmr.msrb.gmra.mxu3 %vm188_vm1, %v476_v18 }
 0x334   :  { %664 = vmatpush.bf16.msra.mxu3 %v655_v11  ;;  %739 = vmatpush.bf16.msrb.mxu2 %v730_v62 }
 0x336   :  { %v587_v30 = vpop.permute.xlu1 %586  ;;  %v3410_v29 = vpop.eup %3409 }
 0x337   :  { %v592_v25 = vsel %vm485_vm2, %v587_v30, 0  ;;  %v471_v40 = vmul.f32 %v3410_v29, %v3849_v58  ;;  %v3412_v43 = vpop.eup %3411 }
 0x338   :  { %601 = vmatpush.bf16.msrb.mxu0 %v592_v25  ;;  %v470_v34 = vmul.f32 %v3412_v43, %v3843_v45  ;;  %v963_v45 = vsel %vm188_vm1, %v3898_v55, 0 }
 0x339   :  { %v479_v51 = vpack.c.bf16 %v471_v40, %v471_v40 }
 0x33a   :  { %v478_v56 = vpack.c.bf16 %v470_v34, %v470_v34 }
 0x33b   :  { %3173 = vmatmul.msk.bf16.vlgmr.msrb.gmra.mxu0 %vm188_vm1, %v477_v27 }
 0x33c   :  { %691 = vmatpush.bf16.msra.mxu0 %v682_v24 }
 0x33d   :  { %v498_v42 = vpop.f32.mrf.mxu3 }
 0x33f   :  { %v519_v49 = vpop.f32.mrf.mxu0 }
 0x340   :  { %948 = vmatpush.bf16.xpose.msrb.mxu0 %v939_v36  ;;  %v649_v50 = vpack.c.bf16 %v519_v49, %v498_v42  ;;  %v3540_v36 = vmov 32.0   ;;  %v815_v42 = vld [vmem:[%s4551_s6 + $0x10] sm:$0xff]  ;;  %v819_v49 = vpack.c.bf16 %v814_v32, %v813_v48 }
 0x341   :  { %3413 = vrcp.f32 %v3540_v36 }
 0x342   :  { %v608_v52 = vpop.permute.xlu0 %607 }
 0x343   :  { %v613_v54 = vsel %vm485_vm2, %v608_v52, 0  ;;  %3175 = vmatmul.msk.bf16.vlgmr.msra.gmra.mxu2 %vm188_vm1, %v479_v51  ;;  %3176 = vmatmul.msk.bf16.vlgmr.msra.gmra.mxu3 %vm188_vm1, %v649_v50 }
 0x344   :  { %622 = vmatpush.bf16.msra.mxu1 %v613_v54 }
 0x345   :  { %v500_v57 = vpop.f32.mrf.mxu3 }
 0x347   :  { %3174 = vmatmul.msk.bf16.vlgmr.msra.gmra.mxu1 %vm188_vm1, %v478_v56  ;;  %v521_v58 = vpop.f32.mrf.mxu0 }
 0x348   :  { %715 = vmatpush.bf16.msrb.mxu1 %v706_v53 }
 0x34c   :  { %972 = vmatpush.bf16.xpose.msra.mxu1 %v963_v45 }
 0x39f   :  { %v540_v59 = vpop.f32.mrf.mxu1 }
 0x3a7   :  { %v542_v39 = vpop.f32.mrf.mxu1 }
 0x3b6   :  { %v561_v63 = vpop.f32.mrf.mxu2  ;;  %v582_v0 = vpop.f32.mrf.mxu3 }
 0x3b7   :  { %v676_v1 = vpack.c.bf16 %v561_v63, %v540_v59 }
 0x3b8   :  { %v603_v2 = vpop.f32.mrf.mxu0 }
 0x3b9   :  { %v700_v3 = vpack.c.bf16 %v603_v2, %v582_v0  ;;  %3177 = vmatmul.msk.bf16.vlgmr.msra.gmra.mxu0 %vm188_vm1, %v676_v1 }
 0x3bb   :  { %3178 = vmatmul.msk.bf16.vlgmr.msrb.gmra.mxu1 %vm188_vm1, %v700_v3 }
 0x3be   :  { %v563_v4 = vpop.f32.mrf.mxu2  ;;  %v584_v47 = vpop.f32.mrf.mxu3 }
 0x3c0   :  { %v605_v41 = vpop.f32.mrf.mxu0 }
 0x3c4   :  { %v624_v5 = vpop.f32.mrf.mxu1 }
 0x3c6   :  { %v645_v8 = vpop.f32.mrf.mxu2  ;;  %v666_v11 = vpop.f32.mrf.mxu3 }
 0x3c7   :  { %v724_v46 = vpack.c.bf16 %v645_v8, %v624_v5  ;;  %v674_v15 = vadd.f32 %v3357_v12, %v666_v11 }
 0x3c9   :  { %3179 = vmatmul.msk.bf16.vlgmr.msrb.gmra.mxu2 %vm188_vm1, %v724_v46 }
 0x3cc   :  { %v626_v10 = vpop.f32.mrf.mxu1 }
 0x3ce   :  { %v647_v9 = vpop.f32.mrf.mxu2  ;;  %v668_v18 = vpop.f32.mrf.mxu3 }
 0x3cf   :  { %v675_v22 = vadd.f32 %v3357_v12, %v668_v18 }
 0x436   :  { %v693_v13 = vpop.f32.mrf.mxu0 }
 0x437   :  { %v698_v17 = vadd.f32 %v693_v13, %v674_v15 }
 0x438   :  { %v717_v16 = vpop.f32.mrf.mxu1 }
 0x439   :  { %v722_v14 = vadd.f32 %v717_v16, %v698_v17 }
 0x43e   :  { %v695_v20 = vpop.f32.mrf.mxu0 }
 0x43f   :  { %v699_v23 = vadd.f32 %v695_v20, %v675_v22 }
 0x440   :  { %v719_v30 = vpop.f32.mrf.mxu1 }
 0x441   :  { %v723_v25 = vadd.f32 %v719_v30, %v699_v23 }
 0x44c   :  { %v741_v21 = vpop.f32.mrf.mxu2 }
 0x44d   :  { %v746_v19 = vadd.f32 %v741_v21, %v722_v14 }
 0x44f   :  { %v748_v28 = vadd.f32 %v746_v19, %v3682_v6  ;;  %v3414_v6 = vpop.eup %3413 }
 0x450   :  { %v759_v38 = vmul.f32 32.0, %v3414_v6  ;;  %vm763_vm3 = vweird.f32 %v3414_v6 }
 0x451   :  { %v752_v24 = vsel %vm96_vm0, %v748_v28, 0.0 }
 0x452   :  { %753 = vadd.xlane.f32.xlu0 %v752_v24  ;;  %v760_v40 = vsub.f32 1.0, %v759_v38 }
 0x454   :  { %v743_v27 = vpop.f32.mrf.mxu2  ;;  %v761_v44 = vmul.f32 %v3414_v6, %v760_v40 }
 0x455   :  { %v747_v29 = vadd.f32 %v743_v27, %v723_v25 }
 0x456   :  { %v762_v50 = vadd.f32 %v3414_v6, %v761_v44  ;;  %v3359_v44 = vld [vmem:[%s4550_s17] ss:$0 sm:$0xff] }
 0x457   :  { %v749_v33 = vadd.f32 %v747_v29, %v3687_v7  ;;  %v816_v7 = vld [vmem:[%s4551_s6 + $0x18] sm:$0xff] }
 0x458   :  { %v820_v43 = vpack.c.bf16 %v816_v7, %v815_v42  ;;  %v3933_v34 = vsel %vm763_vm3, %v3414_v6, %v762_v50 }
 0x459   :  { %v755_v37 = vsel %vm96_vm0, %v749_v33, 0.0 }
 0x45a   :  { %756 = vadd.xlane.f32.xlu2 %v755_v37  ;;  %833 = vmatpush.bf16.msrb.mxu3 %v820_v43 }
 0x45e   :  { %834 = vmatpush.bf16.msrb.mxu3 %v819_v49 }
 0x472   :  { %3301 = vrot.lane.b32.xlu2 %v3817_v35, %s4608_s8 }
 0x47a   :  { %3321 = vrot.lane.b32.xlu2 %v3809_v31, %s4609_s1 }
 0x4c5   :  { %v754_v51 = vpop.xlane.xlu0 %753 }
 0x4c6   :  { %v765_v52 = vmul.f32 %v3933_v34, %v754_v51 }
 0x4c8   :  { %v767_v53 = vsub.f32 %v748_v28, %v765_v52 }
 0x4ca   :  { %v769_v54 = vmul.f32 %v767_v53, %v767_v53 }
 0x4cc   :  { %v771_v56 = vsel %vm96_vm0, %v769_v54, 0.0 }
 0x4cd   :  { %772 = vadd.xlane.f32.xlu1 %v771_v56  ;;  %v757_v57 = vpop.xlane.xlu2 %756 }
 0x4ce   :  { %v766_v58 = vmul.f32 %v3933_v34, %v757_v57 }
 0x4d0   :  { %v3938_v45 = vsub.f32 %v749_v33, %v766_v58  ;;  %v3358_v33 = vld [vmem:[%s4611_s16] ss:$0 sm:$0xff] }
 0x4d2   :  { %v770_v59 = vmul.f32 %v3938_v45, %v3938_v45 }
 0x4d4   :  { %v774_v60 = vsel %vm96_vm0, %v770_v59, 0.0 }
 0x4d5   :  { %775 = vadd.xlane.f32.xlu0 %v774_v60  ;;  %v3302_v61 = vpop.permute.xlu2 %3301 }
 0x4d6   :  { %v3304_v62 = vunpack.i.h.bf16 %v3302_v61  ;;  %v3303_v39 = vunpack.i.l.bf16 %v3302_v61 }
 0x4d8   :  { %v916_v63 = vpack.c.bf16 %v3304_v62, %v3304_v62  ;;  %v915_v0 = vpack.c.bf16 %v3303_v39, %v3303_v39 }
 0x4da   :  { %v1005_v1 = vunpack.c.l.b16 %v916_v63  ;;  %v1004_v2 = vunpack.c.l.b16 %v915_v0 }
 0x4dc   :  { %v3943_v3 = vpack.c.b16 %v1005_v1, %v1004_v2 }
 0x4dd   :  { %v3322_v4 = vpop.permute.xlu2 %3321 }
 0x4de   :  { %v3324_v47 = vunpack.i.h.bf16 %v3322_v4  ;;  %v3323_v41 = vunpack.i.l.bf16 %v3322_v4  ;;  %v1011_v5 = vsel %vm188_vm1, %v3943_v3, 0 }
 0x4df   :  { %1020 = vmatpush.bf16.xpose.msra.mxu3 %v1011_v5 }
 0x4e0   :  { %v918_v8 = vpack.c.bf16 %v3324_v47, %v3324_v47  ;;  %v917_v46 = vpack.c.bf16 %v3323_v41, %v3323_v41 }
 0x4e2   :  { %v1029_v10 = vunpack.c.l.b16 %v918_v8  ;;  %v1028_v9 = vunpack.c.l.b16 %v917_v46 }
 0x4e4   :  { %v3947_v11 = vpack.c.b16 %v1029_v10, %v1028_v9  ;;  %v3360_v9 = vld [vmem:[%s4552_s7] ss:$0 sm:$0xff] }
 0x4e6   :  { %v1035_v12 = vsel %vm188_vm1, %v3947_v11, 0 }
 0x4e7   :  { %1044 = vmatpush.bf16.xpose.msra.mxu0 %v1035_v12 }
 0x4e9   :  { %3296 = vrot.lane.b32.xlu0 %v3809_v31, %s4608_s8 }
 0x4f1   :  { %3311 = vrot.lane.b32.xlu0 %v3809_v31, %s4610_s5 }
 0x4f9   :  { %3316 = vrot.lane.b32.xlu0 %v3817_v35, %s4610_s5 }
 0x540   :  { %v773_v13 = vpop.xlane.xlu1 %772 }
 0x541   :  { %v777_v15 = vmul.f32 %v773_v13, %v3933_v34 }
 0x543   :  { %v779_v16 = vadd.f32 1e-05, %v777_v15 }
 0x545   :  { %3415 = vrsqrt.f32 %v779_v16  ;;  %vm787_vm5 = vweird.f32 %v779_v16 }
 0x548   :  { %v776_v17 = vpop.xlane.xlu0 %775 }
 0x549   :  { %v778_v18 = vmul.f32 %v776_v17, %v3933_v34 }
 0x54b   :  { %v3416_v14 = vpop.eup %3415  ;;  %v780_v20 = vadd.f32 1e-05, %v778_v18 }
 0x54c   :  { %v782_v21 = vmul.f32 %v3416_v14, %v779_v16  ;;  %vm788_vm4 = vweird.f32 %v3416_v14 }
 0x54d   :  { %3417 = vrsqrt.f32 %v780_v20  ;;  %vm789_vm6 = vmor %vm787_vm5, %vm788_vm4  ;;  %vm797_vm8 = vweird.f32 %v780_v20  ;;  %vm1583_vm4 = vcmask 523264  }
 0x54e   :  { %v783_v22 = vmul.f32 %v3416_v14, %v782_v21 }
 0x550   :  { %v784_v19 = vmul.f32 0.5, %v783_v22 }
 0x552   :  { %v785_v23 = vsub.f32 1.5, %v784_v19 }
 0x553   :  { %v3418_v28 = vpop.eup %3417 }
 0x554   :  { %v786_v31 = vmul.f32 %v3416_v14, %v785_v23  ;;  %v792_v30 = vmul.f32 %v3418_v28, %v780_v20  ;;  %vm798_vm7 = vweird.f32 %v3418_v28 }
 0x555   :  { %vm799_vm9 = vmor %vm797_vm8, %vm798_vm7 }
 0x556   :  { %v793_v24 = vmul.f32 %v3418_v28, %v792_v30  ;;  %v790_v25 = vsel %vm789_vm6, %v3416_v14, %v786_v31 }
 0x557   :  { %v801_v37 = vmul.f32 %v790_v25, %v767_v53 }
 0x558   :  { %v794_v27 = vmul.f32 0.5, %v793_v24 }
 0x559   :  { %v806_v48 = vmul.f32 %v3358_v33, %v801_v37 }
 0x55a   :  { %v795_v29 = vsub.f32 1.5, %v794_v27 }
 0x55b   :  { %v3297_v36 = vpop.permute.xlu0 %3296  ;;  %v3968_v53 = vadd.f32 %v3359_v44, %v806_v48 }
 0x55c   :  { %v796_v6 = vmul.f32 %v3418_v28, %v795_v29  ;;  %v3299_v38 = vunpack.i.h.bf16 %v3297_v36  ;;  %v3298_v40 = vunpack.i.l.bf16 %v3297_v36 }
 0x55e   :  { %v800_v42 = vsel %vm799_vm9, %v3418_v28, %v796_v6  ;;  %v914_v7 = vpack.c.bf16 %v3299_v38, %v3299_v38  ;;  %v913_v43 = vpack.c.bf16 %v3298_v40, %v3298_v40 }
 0x55f   :  { %v802_v32 = vmul.f32 %v800_v42, %v3938_v45 }
 0x560   :  { %v981_v49 = vunpack.c.l.b16 %v914_v7  ;;  %v980_v50 = vunpack.c.l.b16 %v913_v43 }
 0x561   :  { %v807_v51 = vmul.f32 %v3358_v33, %v802_v32 }
 0x562   :  { %v3966_v52 = vpack.c.b16 %v981_v49, %v980_v50 }
 0x563   :  { %v3970_v54 = vadd.f32 %v3359_v44, %v807_v51  ;;  %v3312_v56 = vpop.permute.xlu0 %3311 }
 0x564   :  { %v3314_v57 = vunpack.i.h.bf16 %v3312_v56  ;;  %v3313_v58 = vunpack.i.l.bf16 %v3312_v56  ;;  %v987_v59 = vsel %vm188_vm1, %v3966_v52, 0 }
 0x565   :  { %996 = vmatpush.bf16.xpose.msra.mxu2 %v987_v59  ;;  %v818_v60 = vpack.c.bf16 %v3970_v54, %v3968_v53 }
 0x566   :  { %v922_v45 = vpack.c.bf16 %v3314_v57, %v3314_v57  ;;  %v921_v61 = vpack.c.bf16 %v3313_v58, %v3313_v58 }
 0x567   :  { %3180 = vmatmul.msk.bf16.vlgmr.msrb.gmra.mxu3 %vm96_vm0, %v818_v60 }
 0x568   :  { %v1077_v62 = vunpack.c.l.b16 %v922_v45  ;;  %v1076_v39 = vunpack.c.l.b16 %v921_v61 }
 0x56a   :  { %v3977_v63 = vpack.c.b16 %v1077_v62, %v1076_v39 }
 0x56b   :  { %v3317_v0 = vpop.permute.xlu0 %3316 }
 0x56c   :  { %v3319_v1 = vunpack.i.h.bf16 %v3317_v0  ;;  %v3318_v2 = vunpack.i.l.bf16 %v3317_v0  ;;  %v1083_v4 = vsel %vm188_vm1, %v3977_v63, 0 }
 0x56d   :  { %1092 = vmatpush.bf16.xpose.msrb.mxu2 %v1083_v4 }
 0x56e   :  { %v924_v47 = vpack.c.bf16 %v3319_v1, %v3319_v1  ;;  %v923_v41 = vpack.c.bf16 %v3318_v2, %v3318_v2 }
 0x570   :  { %v1101_v5 = vunpack.c.l.b16 %v924_v47  ;;  %v1100_v8 = vunpack.c.l.b16 %v923_v41 }
 0x572   :  { %v3981_v46 = vpack.c.b16 %v1101_v5, %v1100_v8 }
 0x574   :  { %v1107_v10 = vsel %vm188_vm1, %v3981_v46, 0 }
 0x575   :  { %1116 = vmatpush.bf16.xpose.msrb.mxu3 %v1107_v10 }
 0x5ea   :  { %v836_v12 = vpop.f32.mrf.mxu3 }
 0x5eb   :  { %v837_v13 = vadd.f32 %v3360_v9, %v836_v12 }
 0x5ed   :  { %v861_v15 = vpack.c.bf16 %v837_v13, %v837_v13 }
 0x5ef   :  { %3181 = vmatmul.msk.bf16.vlgmr.msrb.gmra.mxu0 %vm188_vm1, %v861_v15 }
 0x5f2   :  { %v838_v16 = vpop.f32.mrf.mxu3 }
 0x5f3   :  { %v839_v17 = vadd.f32 %v3360_v9, %v838_v16 }
 0x5f5   :  { %v862_v18 = vpack.c.bf16 %v839_v17, %v839_v17  ;;  %v3305_v14 = vpack.i.bf16 %v839_v17, %v837_v13 }
 0x5f7   :  { %3306 = vrot.lane.b32.xlu1 %v3305_v14, %s4608_s8  ;;  %3182 = vmatmul.msk.bf16.vlgmr.msra.gmra.mxu1 %vm188_vm1, %v862_v18 }
 0x5f8   :  { %3336 = vrot.lane.b32.xlu2 %v3305_v14, %s4609_s1  ;;  %3331 = vrot.lane.b32.xlu0 %v3305_v14, %s4610_s5 }
 0x5ff   :  { %3326 = vrot.lane.b32.xlu1 %v3817_v35, %s4609_s1 }
 0x600   :  { %1284 = vrot.lane.b32.xlu0 %v3943_v3, %s4612_s30 }
 0x652   :  { %v3337_v20 = vpop.permute.xlu2 %3336 }
 0x653   :  { %v3338_v21 = vunpack.i.l.bf16 %v3337_v20  ;;  %v3339_v56 = vunpack.i.h.bf16 %v3337_v20 }
 0x655   :  { %v865_v22 = vpack.c.bf16 %v3338_v21, %v3338_v21  ;;  %v866_v60 = vpack.c.bf16 %v3339_v56, %v3339_v56 }
 0x657   :  { %3185 = vmatmul.msk.bf16.vlgmr.msra.gmra.mxu0 %vm188_vm1, %v865_v22 }
 0x669   :  { %v3307_v19 = vpop.permute.xlu1 %3306 }
 0x66a   :  { %v3309_v23 = vunpack.i.h.bf16 %v3307_v19  ;;  %v3308_v28 = vunpack.i.l.bf16 %v3307_v19  ;;  %v3332_v31 = vpop.permute.xlu0 %3331 }
 0x66b   :  { %v3334_v32 = vunpack.i.h.bf16 %v3332_v31  ;;  %v3333_v49 = vunpack.i.l.bf16 %v3332_v31 }
 0x66c   :  { %v864_v30 = vpack.c.bf16 %v3309_v23, %v3309_v23  ;;  %v863_v24 = vpack.c.bf16 %v3308_v28, %v3308_v28  ;;  %v950_v25 = vpop.f32.mrf.mxu0 }
 0x66d   :  { %v1122_v27 = vmul.f32 0.35355338, %v950_v25  ;;  %v868_v57 = vpack.c.bf16 %v3334_v32, %v3334_v32  ;;  %v867_v58 = vpack.c.bf16 %v3333_v49, %v3333_v49 }
 0x66e   :  { %3183 = vmatmul.msk.bf16.vlgmr.msra.gmra.mxu2 %vm188_vm1, %v863_v24  ;;  %3184 = vmatmul.msk.bf16.vlgmr.msra.gmra.mxu3 %vm188_vm1, %v864_v30 }
 0x66f   :  { %v1131_v35 = vsel %vm1130_vm10, %v1122_v27, -inf }
 0x670   :  { %1132 = vmax.xlane.f32.xlu2 %v1131_v35 }
 0x671   :  { %v3327_v29 = vpop.permute.xlu1 %3326 }
 0x672   :  { %v3329_v33 = vunpack.i.h.bf16 %v3327_v29  ;;  %v3328_v37 = vunpack.i.l.bf16 %v3327_v29  ;;  %v1285_v36 = vpop.permute.xlu0 %1284 }
 0x673   :  { %1297 = vmatpush.bf16.msra.mxu3 %v1285_v36 }
 0x674   :  { %v920_v6 = vpack.c.bf16 %v3329_v33, %v3329_v33  ;;  %v919_v38 = vpack.c.bf16 %v3328_v37, %v3328_v37  ;;  %v952_v40 = vpop.f32.mrf.mxu0  ;;  %v974_v42 = vpop.f32.mrf.mxu1 }
 0x675   :  { %v1123_v7 = vmul.f32 0.35355338, %v974_v42 }
 0x676   :  { %v1053_v43 = vunpack.c.l.b16 %v920_v6  ;;  %v1052_v44 = vunpack.c.l.b16 %v919_v38 }
 0x677   :  { %v1134_v48 = vsel %vm1130_vm10, %v1123_v7, -inf }
 0x678   :  { %v4002_v50 = vpack.c.b16 %v1053_v43, %v1052_v44  ;;  %1135 = vmax.xlane.f32.xlu1 %v1134_v48 }
 0x67a   :  { %v1059_v51 = vsel %vm188_vm1, %v4002_v50, 0 }
 0x67b   :  { %1068 = vmatpush.bf16.xpose.msrb.mxu1 %v1059_v51 }
 0x67c   :  { %v976_v59 = vpop.f32.mrf.mxu1 }
 0x67e   :  { %3187 = vmatmul.msk.bf16.vlgmr.msrb.gmra.mxu2 %vm188_vm1, %v867_v58  ;;  %3188 = vmatmul.msk.bf16.vlgmr.msrb.gmra.mxu3 %vm188_vm1, %v868_v57 }
 0x682   :  { %3186 = vmatmul.msk.bf16.vlgmr.msrb.gmra.mxu1 %vm188_vm1, %v866_v60 }
 0x688   :  { %1227 = vrot.lane.b32.xlu2 %v3880_v26, %s4612_s30 }
 0x6d4   :  { %v1046_v45 = vpop.f32.mrf.mxu0 }
 0x6d5   :  { %v1126_v61 = vmul.f32 0.35355338, %v1046_v45 }
 0x6d7   :  { %v1143_v62 = vsel %vm1130_vm10, %v1126_v61, -inf }
 0x6d8   :  { %1144 = vmax.xlane.f32.xlu1 %v1143_v62 }
 0x6dc   :  { %v1048_v39 = vpop.f32.mrf.mxu0 }
 0x6e3   :  { %v1133_v0 = vpop.xlane.xlu2 %1132 }
 0x6e4   :  { %v1155_v13 = vsub.f32 %v1122_v27, %v1133_v0 }
 0x6e6   :  { %v1163_v17 = vmul.f32 1.442695, %v1155_v13 }
 0x6eb   :  { %v1136_v1 = vpop.xlane.xlu1 %1135  ;;  %v1228_v2 = vpop.permute.xlu2 %1227 }
 0x6ec   :  { %v1156_v4 = vsub.f32 %v1123_v7, %v1136_v1  ;;  %1240 = vmatpush.bf16.msrb.mxu0 %v1228_v2 }
 0x6ee   :  { %v1165_v47 = vmul.f32 1.442695, %v1156_v4 }
 0x6f0   :  { %3419 = vpow2.f32 %v1165_v47 }
 0x6f1   :  { %v998_v41 = vpop.f32.mrf.mxu2  ;;  %v1022_v5 = vpop.f32.mrf.mxu3  ;;  %3421 = vpow2.f32 %v1163_v17 }
 0x6f2   :  { %v1124_v8 = vmul.f32 0.35355338, %v998_v41  ;;  %v1125_v27 = vmul.f32 0.35355338, %v1022_v5 }
 0x6f4   :  { %v1137_v10 = vsel %vm1130_vm10, %v1124_v8, -inf  ;;  %v1140_v35 = vsel %vm1130_vm10, %v1125_v27, -inf }
 0x6f5   :  { %1138 = vmax.xlane.f32.xlu1 %v1137_v10 }
 0x6f6   :  { %v4013_v9 = vpop.eup %3419 }
 0x6f7   :  { %v1182_v12 = vsel %vm1130_vm10, %v4013_v9, 0.0  ;;  %v3422_v28 = vpop.eup %3421 }
 0x6f8   :  { %1183 = vadd.xlane.f32.xlu2 %v1182_v12  ;;  %v1179_v25 = vsel %vm1130_vm10, %v3422_v28, 0.0 }
 0x6f9   :  { %v1000_v15 = vpop.f32.mrf.mxu2  ;;  %v1024_v16 = vpop.f32.mrf.mxu3 }
 0x6ff   :  { %v1070_v18 = vpop.f32.mrf.mxu1 }
 0x700   :  { %v1127_v14 = vmul.f32 0.35355338, %v1070_v18 }
 0x701   :  { %v1094_v20 = vpop.f32.mrf.mxu2  ;;  %v1118_v21 = vpop.f32.mrf.mxu3 }
 0x702   :  { %v1129_v22 = vmul.f32 0.35355338, %v1118_v21  ;;  %v1146_v19 = vsel %vm1130_vm10, %v1127_v14, -inf  ;;  %v1128_v29 = vmul.f32 0.35355338, %v1094_v20 }
 0x703   :  { %1147 = vmax.xlane.f32.xlu0 %v1146_v19 }
 0x704   :  { %v1152_v23 = vsel %vm1130_vm10, %v1129_v22, -inf  ;;  %v1149_v33 = vsel %vm1130_vm10, %v1128_v29, -inf }
 0x705   :  { %1153 = vmax.xlane.f32.xlu2 %v1152_v23 }
 0x707   :  { %v1072_v31 = vpop.f32.mrf.mxu1 }
 0x709   :  { %v1096_v30 = vpop.f32.mrf.mxu2  ;;  %v1120_v24 = vpop.f32.mrf.mxu3 }
 0x70b   :  { %1180 = vadd.xlane.f32.xlu0 %v1179_v25 }
 0x70e   :  { %1265 = vrot.lane.b32.xlu1 %v3966_v52, %s4612_s30 }
 0x713   :  { %1141 = vmax.xlane.f32.xlu0 %v1140_v35 }
 0x71b   :  { %1150 = vmax.xlane.f32.xlu0 %v1149_v33 }
 0x72f   :  { %1246 = vrot.lane.b32.xlu0 %v3898_v55, %s4612_s30 }
 0x74b   :  { %v1145_v37 = vpop.xlane.xlu1 %1144 }
 0x74c   :  { %v1159_v36 = vsub.f32 %v1126_v61, %v1145_v37 }
 0x74e   :  { %v1171_v6 = vmul.f32 1.442695, %v1159_v36 }
 0x750   :  { %3423 = vpow2.f32 %v1171_v6 }
 0x756   :  { %v4026_v38 = vpop.eup %3423 }
 0x757   :  { %v1191_v40 = vsel %vm1130_vm10, %v4026_v38, 0.0 }
 0x759   :  { %1192 = vadd.xlane.f32.xlu0 %v1191_v40 }
 0x768   :  { %v1139_v42 = vpop.xlane.xlu1 %1138 }
 0x769   :  { %v1157_v7 = vsub.f32 %v1124_v8, %v1139_v42 }
 0x76b   :  { %v1167_v43 = vmul.f32 1.442695, %v1157_v7  ;;  %v1184_v44 = vpop.xlane.xlu2 %1183 }
 0x76d   :  { %3425 = vpow2.f32 %v1167_v43  ;;  %1360 = vrot.lane.b32.xlu0 %v3981_v46, %s4612_s30 }
 0x773   :  { %v3426_v48 = vpop.eup %3425 }
 0x774   :  { %v1185_v32 = vsel %vm1130_vm10, %v3426_v48, 0.0 }
 0x775   :  { %1322 = vrot.lane.b32.xlu0 %v4002_v50, %s4612_s30  ;;  %1186 = vadd.xlane.f32.xlu2 %v1185_v32 }
 0x776   :  { %v1148_v49 = vpop.xlane.xlu0 %1147 }
 0x777   :  { %v1160_v51 = vsub.f32 %v1127_v14, %v1148_v49 }
 0x778   :  { %v1154_v56 = vpop.xlane.xlu2 %1153 }
 0x779   :  { %v1173_v57 = vmul.f32 1.442695, %v1160_v51  ;;  %v1162_v58 = vsub.f32 %v1129_v22, %v1154_v56 }
 0x77b   :  { %3427 = vpow2.f32 %v1173_v57  ;;  %v1177_v59 = vmul.f32 1.442695, %v1162_v58 }
 0x77e   :  { %v1181_v60 = vpop.xlane.xlu0 %1180 }
 0x77f   :  { %3429 = vrcp.f32 %v1181_v60 }
 0x780   :  { %v1266_v45 = vpop.permute.xlu1 %1265  ;;  %3431 = vpow2.f32 %v1177_v59 }
 0x781   :  { %v3428_v61 = vpop.eup %3427  ;;  %1278 = vmatpush.bf16.msra.mxu2 %v1266_v45 }
 0x782   :  { %v1194_v62 = vsel %vm1130_vm10, %v3428_v61, 0.0 }
 0x783   :  { %1195 = vadd.xlane.f32.xlu2 %v1194_v62 }
 0x785   :  { %v3430_v39 = vpop.eup %3429 }
 0x786   :  { %v1211_v0 = vmul.f32 %v3430_v39, %v3422_v28  ;;  %v1142_v1 = vpop.xlane.xlu0 %1141  ;;  %v4036_v2 = vpop.eup %3431 }
 0x787   :  { %v1158_v4 = vsub.f32 %v1125_v27, %v1142_v1  ;;  %v1200_v5 = vsel %vm1130_vm10, %v4036_v2, 0.0  ;;  %v927_v1 = vld [vmem:[%s4553_s10 + $0x10] sm:$0xff] }
 0x788   :  { %v1219_v47 = vpack.c.bf16 %v1211_v0, %v1211_v0 }
 0x789   :  { %v1169_v41 = vmul.f32 1.442695, %v1158_v4 }
 0x78a   :  { %3189 = vmatmul.msk.bf16.vlgmr.msrb.gmra.mxu0 %vm1130_vm10, %v1219_v47  ;;  %v926_v47 = vld [vmem:[%s4553_s10 + $0x8] sm:$0xff] }
 0x78b   :  { %3433 = vpow2.f32 %v1169_v41  ;;  %1201 = vadd.xlane.f32.xlu2 %v1200_v5  ;;  %v1407_v41 = vpack.c.bf16 %v926_v47, %v926_v47 }
 0x78d   :  { %v1412_v5 = vsel %vm485_vm2, %v1407_v41, 0 }
 0x78e   :  { %v1151_v8 = vpop.xlane.xlu0 %1150 }
 0x78f   :  { %v1161_v10 = vsub.f32 %v1128_v29, %v1151_v8  ;;  %v925_v29 = vld [vmem:[%s4553_s10] sm:$0xff] }
 0x790   :  { %v1380_v36 = vpack.c.bf16 %v925_v29, %v925_v29 }
 0x791   :  { %v3434_v12 = vpop.eup %3433  ;;  %v1175_v13 = vmul.f32 1.442695, %v1161_v10 }
 0x792   :  { %v1188_v15 = vsel %vm1130_vm10, %v3434_v12, 0.0  ;;  %v1385_v40 = vsel %vm485_vm2, %v1380_v36, 0 }
 0x793   :  { %3435 = vpow2.f32 %v1175_v13  ;;  %1189 = vadd.xlane.f32.xlu1 %v1188_v15 }
 0x794   :  { %3437 = vrcp.f32 %v1184_v44 }
 0x799   :  { %v3436_v16 = vpop.eup %3435 }
 0x79a   :  { %v1197_v17 = vsel %vm1130_vm10, %v3436_v16, 0.0  ;;  %v3438_v18 = vpop.eup %3437 }
 0x79b   :  { %1198 = vadd.xlane.f32.xlu1 %v1197_v17  ;;  %v1212_v14 = vmul.f32 %v3438_v18, %v4013_v9  ;;  %v928_v17 = vld [vmem:[%s4553_s10 + $0x18] sm:$0xff] }
 0x79c   :  { %v1455_v18 = vpack.c.bf16 %v928_v17, %v928_v17 }
 0x79d   :  { %v1220_v21 = vpack.c.bf16 %v1212_v14, %v1212_v14 }
 0x79e   :  { %v1460_v14 = vsel %vm485_vm2, %v1455_v18, 0 }
 0x7a1   :  { %v1247_v20 = vpop.permute.xlu0 %1246 }
 0x7a2   :  { %1259 = vmatpush.bf16.msra.mxu1 %v1247_v20 }
 0x7a3   :  { %1303 = vrot.lane.b32.xlu2 %v3947_v11, %s4612_s30 }
 0x7a5   :  { %3190 = vmatmul.msk.bf16.vlgmr.msra.gmra.mxu1 %vm1130_vm10, %v1220_v21 }
 0x7b4   :  { %1341 = vrot.lane.b32.xlu1 %v3977_v63, %s4612_s30 }
 0x7cc   :  { %v1193_v22 = vpop.xlane.xlu0 %1192 }
 0x7df   :  { %v1361_v19 = vpop.permute.xlu0 %1360 }
 0x7e0   :  { %1373 = vmatpush.bf16.msrb.mxu3 %v1361_v19 }
 0x7e7   :  { %v1323_v23 = vpop.permute.xlu0 %1322 }
 0x7e8   :  { %1335 = vmatpush.bf16.msrb.mxu1 %v1323_v23  ;;  %v1187_v28 = vpop.xlane.xlu2 %1186 }
 0x7e9   :  { %3439 = vrcp.f32 %v1187_v28 }
 0x7ec   :  { %1421 = vmatpush.bf16.msra.mxu1 %v1412_v5  ;;  %v1536_v5 = vld [vmem:[%s4558_s12] sm:$0xff] }
 0x7ef   :  { %v3440_v31 = vpop.eup %3439 }
 0x7f0   :  { %v1213_v9 = vmul.f32 %v3440_v31, %v3426_v48 }
 0x7f2   :  { %v1221_v30 = vpack.c.bf16 %v1213_v9, %v1213_v9 }
 0x7f4   :  { %3191 = vmatmul.msk.bf16.vlgmr.msra.gmra.mxu2 %vm1130_vm10, %v1221_v30 }
 0x7f6   :  { %v1196_v24 = vpop.xlane.xlu2 %1195 }
 0x7f7   :  { %3441 = vrcp.f32 %v1196_v24 }
 0x7f8   :  { %3443 = vrcp.f32 %v1193_v22 }
 0x7fd   :  { %v3442_v25 = vpop.eup %3441 }
 0x7fe   :  { %v1216_v27 = vmul.f32 %v3442_v25, %v3428_v61  ;;  %v1202_v35 = vpop.xlane.xlu2 %1201  ;;  %v3444_v37 = vpop.eup %3443  ;;  %v3361_v25 = vld [vmem:[%s4554_s11] ss:$0 sm:$0xff] }
 0x7ff   :  { %v1215_v6 = vmul.f32 %v3444_v37, %v4026_v38 }
 0x800   :  { %v1224_v33 = vpack.c.bf16 %v1216_v27, %v1216_v27 }
 0x801   :  { %v1223_v44 = vpack.c.bf16 %v1215_v6, %v1215_v6 }
 0x802   :  { %3194 = vmatmul.msk.bf16.vlgmr.msrb.gmra.mxu1 %vm1130_vm10, %v1224_v33 }
 0x806   :  { %v1304_v42 = vpop.permute.xlu2 %1303  ;;  %v1190_v7 = vpop.xlane.xlu1 %1189 }
 0x807   :  { %3445 = vrcp.f32 %v1190_v7  ;;  %v1242_v43 = vpop.f32.mrf.mxu0  ;;  %1316 = vmatpush.bf16.msra.mxu0 %v1304_v42 }
 0x808   :  { %3447 = vrcp.f32 %v1202_v35 }
 0x80a   :  { %3193 = vmatmul.msk.bf16.vlgmr.msra.gmra.mxu0 %vm1130_vm10, %v1223_v44 }
 0x80b   :  { %1394 = vmatpush.bf16.msrb.mxu0 %v1385_v40 }
 0x80d   :  { %v3446_v48 = vpop.eup %3445 }
 0x80e   :  { %v1214_v32 = vmul.f32 %v3446_v48, %v3434_v12  ;;  %v1199_v56 = vpop.xlane.xlu1 %1198  ;;  %v3448_v38 = vpop.eup %3447 }
 0x80f   :  { %v1244_v49 = vpop.f32.mrf.mxu0  ;;  %3449 = vrcp.f32 %v1199_v56  ;;  %v1218_v57 = vmul.f32 %v3448_v38, %v4036_v2  ;;  %v1431_v2 = vpack.c.bf16 %v927_v1, %v927_v1 }
 0x810   :  { %v1222_v51 = vpack.c.bf16 %v1214_v32, %v1214_v32 }
 0x811   :  { %v1226_v58 = vpack.c.bf16 %v1218_v57, %v1218_v57  ;;  %v1436_v4 = vsel %vm485_vm2, %v1431_v2, 0  ;;  %v1539_v2 = vld [vmem:[%s4558_s12 + $0x18] sm:$0xff] }
 0x812   :  { %3192 = vmatmul.msk.bf16.vlgmr.msra.gmra.mxu3 %vm1130_vm10, %v1222_v51 }
 0x813   :  { %1469 = vmatpush.bf16.msra.mxu3 %v1460_v14 }
 0x815   :  { %v3450_v59 = vpop.eup %3449 }
 0x816   :  { %v1217_v61 = vmul.f32 %v3450_v59, %v3436_v16 }
 0x818   :  { %v1225_v39 = vpack.c.bf16 %v1217_v61, %v1217_v61 }
 0x822   :  { %v1261_v60 = vpop.f32.mrf.mxu1  ;;  %3196 = vmatmul.msk.bf16.vlgmr.msrb.gmra.mxu3 %vm1130_vm10, %v1226_v58 }
 0x823   :  { %v1379_v45 = vpack.c.bf16 %v1261_v60, %v1242_v43 }
 0x825   :  { %3197 = vmatmul.msk.bf16.vlgmr.msrb.gmra.mxu0 %vm188_vm1, %v1379_v45 }
 0x826   :  { %v1342_v62 = vpop.permute.xlu1 %1341 }
 0x827   :  { %1354 = vmatpush.bf16.msrb.mxu2 %v1342_v62 }
 0x82a   :  { %v1263_v0 = vpop.f32.mrf.mxu1  ;;  %3195 = vmatmul.msk.bf16.vlgmr.msrb.gmra.mxu2 %vm1130_vm10, %v1225_v39 }
 0x82b   :  { %1445 = vmatpush.bf16.msra.mxu2 %v1436_v4 }
 0x877   :  { %v1280_v8 = vpop.f32.mrf.mxu2 }
 0x87f   :  { %v1282_v10 = vpop.f32.mrf.mxu2  ;;  %v1337_v12 = vpop.f32.mrf.mxu1 }
 0x887   :  { %v1318_v13 = vpop.f32.mrf.mxu0  ;;  %v1339_v15 = vpop.f32.mrf.mxu1 }
 0x888   :  { %v1430_v16 = vpack.c.bf16 %v1337_v12, %v1318_v13 }
 0x88a   :  { %3199 = vmatmul.msk.bf16.vlgmr.msra.gmra.mxu2 %vm188_vm1, %v1430_v16 }
 0x88f   :  { %v1320_v20 = vpop.f32.mrf.mxu0 }
 0x895   :  { %v1299_v21 = vpop.f32.mrf.mxu3 }
 0x896   :  { %v1406_v22 = vpack.c.bf16 %v1299_v21, %v1280_v8  ;;  %v1537_v8 = vld [vmem:[%s4558_s12 + $0x8] sm:$0xff] }
 0x897   :  { %v1542_v12 = vpack.c.bf16 %v1537_v8, %v1536_v5 }
 0x898   :  { %3198 = vmatmul.msk.bf16.vlgmr.msra.gmra.mxu1 %vm188_vm1, %v1406_v22 }
 0x89d   :  { %v1301_v19 = vpop.f32.mrf.mxu3 }
 0x8a2   :  { %v1396_v24 = vpop.f32.mrf.mxu0 }
 0x8a3   :  { %v1404_v35 = vadd.f32 %v3361_v25, %v1396_v24  ;;  %v3362_v24 = vld [vmem:[%s4555_s18] ss:$0 sm:$0xff] }
 0x8a5   :  { %v1375_v23 = vpop.f32.mrf.mxu3 }
 0x8aa   :  { %v1398_v37 = vpop.f32.mrf.mxu0 }
 0x8ab   :  { %v1405_v42 = vadd.f32 %v3361_v25, %v1398_v37 }
 0x8ad   :  { %v1356_v28 = vpop.f32.mrf.mxu2  ;;  %v1377_v31 = vpop.f32.mrf.mxu3 }
 0x8ae   :  { %v1454_v9 = vpack.c.bf16 %v1375_v23, %v1356_v28 }
 0x8b0   :  { %3200 = vmatmul.msk.bf16.vlgmr.msra.gmra.mxu3 %vm188_vm1, %v1454_v9 }
 0x8b5   :  { %v1358_v30 = vpop.f32.mrf.mxu2 }
 0x90d   :  { %v1447_v33 = vpop.f32.mrf.mxu2 }
 0x915   :  { %v1423_v27 = vpop.f32.mrf.mxu1  ;;  %v1449_v32 = vpop.f32.mrf.mxu2 }
 0x916   :  { %v1428_v29 = vadd.f32 %v1423_v27, %v1404_v35 }
 0x918   :  { %v1452_v36 = vadd.f32 %v1447_v33, %v1428_v29  ;;  %v3363_v29 = vld [vmem:[%s4556_s19] ss:$0 sm:$0xff] }
 0x91d   :  { %v1425_v6 = vpop.f32.mrf.mxu1 }
 0x91e   :  { %v1429_v43 = vadd.f32 %v1425_v6, %v1405_v42 }
 0x920   :  { %v1453_v49 = vadd.f32 %v1449_v32, %v1429_v43  ;;  %v1573_v43 = vld [vmem:[%s4560_s14 + $0x38] sm:$0xff]  ;;  %v1571_v32 = vld [vmem:[%s4560_s14 + $0x28] sm:$0xff] }
 0x933   :  { %v1471_v40 = vpop.f32.mrf.mxu3 }
 0x934   :  { %v1476_v7 = vadd.f32 %v1471_v40, %v1452_v36 }
 0x936   :  { %v1478_v44 = vadd.f32 %v1476_v7, %v3968_v53  ;;  %v1572_v7 = vld [vmem:[%s4560_s14 + $0x30] sm:$0xff] }
 0x938   :  { %v1482_v48 = vsel %vm96_vm0, %v1478_v44, 0.0 }
 0x939   :  { %1483 = vadd.xlane.f32.xlu1 %v1482_v48  ;;  %v1570_v48 = vld [vmem:[%s4560_s14 + $0x20] sm:$0xff] }
 0x93b   :  { %v1473_v51 = vpop.f32.mrf.mxu3 }
 0x93c   :  { %v1477_v56 = vadd.f32 %v1473_v51, %v1453_v49  ;;  %v1578_v49 = vpack.c.bf16 %v1571_v32, %v1570_v48  ;;  %v1568_v51 = vld [vmem:[%s4560_s14 + $0x10] sm:$0xff] }
 0x93e   :  { %v1479_v38 = vadd.f32 %v1477_v56, %v3970_v54  ;;  %v1538_v54 = vld [vmem:[%s4558_s12 + $0x10] sm:$0xff]  ;;  %v1569_v56 = vld [vmem:[%s4560_s14 + $0x18] sm:$0xff] }
 0x93f   :  { %v1543_v4 = vpack.c.bf16 %v1539_v2, %v1538_v54  ;;  %v3365_v54 = vld [vmem:[%s4559_s15] ss:$0 sm:$0xff] }
 0x940   :  { %v1485_v57 = vsel %vm96_vm0, %v1479_v38, 0.0 }
 0x941   :  { %1486 = vadd.xlane.f32.xlu2 %v1485_v57  ;;  %1556 = vmatpush.bf16.msra.mxu0 %v1543_v4  ;;  %v1566_v57 = vld [vmem:[%s4560_s14] sm:$0xff] }
 0x945   :  { %1557 = vmatpush.bf16.msra.mxu0 %v1542_v12 }
 0x9ac   :  { %v1484_v58 = vpop.xlane.xlu1 %1483 }
 0x9ad   :  { %v1488_v59 = vmul.f32 %v1484_v58, %v3933_v34  ;;  %v1567_v58 = vld [vmem:[%s4560_s14 + $0x8] sm:$0xff] }
 0x9af   :  { %v1490_v60 = vsub.f32 %v1478_v44, %v1488_v59  ;;  %v1579_v44 = vpack.c.bf16 %v1573_v43, %v1572_v7  ;;  %v1576_v59 = vpack.c.bf16 %v1567_v58, %v1566_v57 }
 0x9b1   :  { %v1492_v45 = vmul.f32 %v1490_v60, %v1490_v60  ;;  %1591 = vmatpush.bf16.msrb.mxu1 %v1579_v44 }
 0x9b3   :  { %v1494_v61 = vsel %vm96_vm0, %v1492_v45, 0.0  ;;  %v3364_v45 = vld [vmem:[%s4557_s13] ss:$0 sm:$0xff] }
 0x9b4   :  { %1495 = vadd.xlane.f32.xlu0 %v1494_v61  ;;  %v1487_v53 = vpop.xlane.xlu2 %1486 }
 0x9b5   :  { %v1489_v62 = vmul.f32 %v1487_v53, %v3933_v34  ;;  %1592 = vmatpush.bf16.msrb.mxu1 %v1578_v49 }
 0x9b7   :  { %v1491_v39 = vsub.f32 %v1479_v38, %v1489_v62  ;;  %v1577_v38 = vpack.c.bf16 %v1569_v56, %v1568_v51 }
 0x9b9   :  { %v1493_v0 = vmul.f32 %v1491_v39, %v1491_v39  ;;  %1593 = vmatpush.bf16.msrb.mxu1 %v1577_v38  ;;  %v3366_v38 = vld [vmem:[%s4561_s20] ss:$0 sm:$0xff] }
 0x9bb   :  { %v1497_v1 = vsel %vm96_vm0, %v1493_v0, 0.0 }
 0x9bc   :  { %1498 = vadd.xlane.f32.xlu1 %v1497_v1 }
 0x9bd   :  { %1594 = vmatpush.bf16.msrb.mxu1 %v1576_v59 }
 0xa27   :  { %v1496_v47 = vpop.xlane.xlu0 %1495 }
 0xa28   :  { %v1500_v41 = vmul.f32 %v1496_v47, %v3933_v34 }
 0xa2a   :  { %v1502_v10 = vadd.f32 1e-05, %v1500_v41 }
 0xa2c   :  { %3451 = vrsqrt.f32 %v1502_v10  ;;  %vm1510_vm12 = vweird.f32 %v1502_v10 }
 0xa2f   :  { %v1499_v13 = vpop.xlane.xlu1 %1498 }
 0xa30   :  { %v1501_v15 = vmul.f32 %v1499_v13, %v3933_v34 }
 0xa32   :  { %v3452_v16 = vpop.eup %3451  ;;  %v1503_v17 = vadd.f32 1e-05, %v1501_v15 }
 0xa33   :  { %v1505_v18 = vmul.f32 %v3452_v16, %v1502_v10  ;;  %vm1511_vm11 = vweird.f32 %v3452_v16 }
 0xa34   :  { %3453 = vrsqrt.f32 %v1503_v17  ;;  %vm1512_vm13 = vmor %vm1510_vm12, %vm1511_vm11  ;;  %vm1520_vm15 = vweird.f32 %v1503_v17 }
 0xa35   :  { %v1506_v14 = vmul.f32 %v3452_v16, %v1505_v18 }
 0xa37   :  { %v1507_v20 = vmul.f32 0.5, %v1506_v14 }
 0xa39   :  { %v1508_v21 = vsub.f32 1.5, %v1507_v20 }
 0xa3a   :  { %v3454_v22 = vpop.eup %3453 }
 0xa3b   :  { %v1509_v19 = vmul.f32 %v3452_v16, %v1508_v21  ;;  %v1515_v23 = vmul.f32 %v3454_v22, %v1503_v17  ;;  %vm1521_vm14 = vweird.f32 %v3454_v22 }
 0xa3c   :  { %vm1522_vm3 = vmor %vm1520_vm15, %vm1521_vm14 }
 0xa3d   :  { %v1516_v28 = vmul.f32 %v3454_v22, %v1515_v23  ;;  %v1513_v31 = vsel %vm1512_vm13, %v3452_v16, %v1509_v19  ;;  %v3205_v23 = vld [vmem:[%s4600_s27 + $0x30] sm:$0xff] }
 0xa3e   :  { %v1524_v25 = vmul.f32 %v1513_v31, %v1490_v60 }
 0xa3f   :  { %v1517_v9 = vmul.f32 0.5, %v1516_v28  ;;  %v3206_v28 = vld [vmem:[%s4600_s27 + $0x38] sm:$0xff] }
 0xa40   :  { %v1529_v33 = vmul.f32 %v3362_v24, %v1524_v25  ;;  %v1668_v31 = vpack.c.bf16 %v3206_v28, %v3205_v23  ;;  %v3204_v25 = vld [vmem:[%s4600_s27 + $0x28] sm:$0xff] }
 0xa41   :  { %v1518_v30 = vsub.f32 1.5, %v1517_v9 }
 0xa42   :  { %v1534_v6 = vadd.f32 %v3363_v29, %v1529_v33  ;;  %1681 = vmatpush.bf16.msrb.mxu2 %v1668_v31 }
 0xa43   :  { %v1519_v27 = vmul.f32 %v3454_v22, %v1518_v30 }
 0xa45   :  { %v1523_v35 = vsel %vm1522_vm3, %v3454_v22, %v1519_v27 }
 0xa46   :  { %v1525_v37 = vmul.f32 %v1523_v35, %v1491_v39 }
 0xa48   :  { %v1530_v36 = vmul.f32 %v3362_v24, %v1525_v37  ;;  %v3203_v24 = vld [vmem:[%s4600_s27 + $0x20] sm:$0xff] }
 0xa49   :  { %v1667_v35 = vpack.c.bf16 %v3204_v25, %v3203_v24 }
 0xa4a   :  { %v1535_v40 = vadd.f32 %v3363_v29, %v1530_v36 }
 0xa4b   :  { %1682 = vmatpush.bf16.msrb.mxu2 %v1667_v35 }
 0xa4c   :  { %v1541_v42 = vpack.c.bf16 %v1535_v40, %v1534_v6 }
 0xa4e   :  { %3201 = vmatmul.msk.bf16.vlgmr.msra.gmra.mxu0 %vm96_vm0, %v1541_v42 }
 0xacb   :  { %v1559_v60 = vpop.f32.mrf.mxu0 }
 0xacc   :  { %v1560_v61 = vadd.f32 %v3364_v45, %v1559_v60  ;;  %v3367_v60 = vld [vmem:[%s4562_s21] ss:$0 sm:$0xff] }
 0xace   :  { %v1564_v39 = vmax.f32 %v1560_v61, 0.0 }
 0xad3   :  { %v1561_v53 = vpop.f32.mrf.mxu0 }
 0xad4   :  { %v1562_v62 = vadd.f32 %v3364_v45, %v1561_v53 }
 0xad6   :  { %v1565_v0 = vmax.f32 %v1562_v62, 0.0 }
 0xad8   :  { %v1575_v1 = vpack.c.bf16 %v1565_v0, %v1564_v39 }
 0xada   :  { %3202 = vmatmul.msk.bf16.vlgmr.msrb.gmra.mxu1 %vm1583_vm4, %v1575_v1  ;;  %v3368_v1 = vld [vmem:[%s4602_s26 + $0x1] ss:$0 sm:$0xff]  ;;  %s4613_s26 = smov 64  }
 0xb57   :  { %v1596_v2 = vpop.f32.mrf.mxu1 }
 0xb58   :  { %v1597_v4 = vadd.f32 %v3365_v54, %v1596_v2 }
 0xb5a   :  { %v1601_v47 = vadd.f32 %v1597_v4, %v1534_v6 }
 0xb5c   :  { %v1605_v41 = vsel %vm96_vm0, %v1601_v47, 0.0 }
 0xb5d   :  { %1606 = vadd.xlane.f32.xlu2 %v1605_v41 }
 0xb5f   :  { %v1598_v5 = vpop.f32.mrf.mxu1 }
 0xb60   :  { %v1599_v8 = vadd.f32 %v3365_v54, %v1598_v5 }
 0xb62   :  { %v1602_v10 = vadd.f32 %v1599_v8, %v1535_v40 }
 0xb64   :  { %v1608_v12 = vsel %vm96_vm0, %v1602_v10, 0.0 }
 0xb65   :  { %1609 = vadd.xlane.f32.xlu0 %v1608_v12 }
 0xbd0   :  { %v1607_v13 = vpop.xlane.xlu2 %1606 }
 0xbd1   :  { %v1611_v15 = vmul.f32 %v1607_v13, %v3933_v34 }
 0xbd3   :  { %v1613_v16 = vsub.f32 %v1601_v47, %v1611_v15 }
 0xbd5   :  { %v1615_v17 = vmul.f32 %v1613_v16, %v1613_v16 }
 0xbd7   :  { %v1617_v18 = vsel %vm96_vm0, %v1615_v17, 0.0 }
 0xbd8   :  { %v1610_v14 = vpop.xlane.xlu0 %1609  ;;  %1618 = vadd.xlane.f32.xlu1 %v1617_v18 }
 0xbd9   :  { %v1612_v20 = vmul.f32 %v1610_v14, %v3933_v34 }
 0xbdb   :  { %v1614_v21 = vsub.f32 %v1602_v10, %v1612_v20 }
 0xbdd   :  { %v1616_v22 = vmul.f32 %v1614_v21, %v1614_v21 }
 0xbdf   :  { %v1620_v19 = vsel %vm96_vm0, %v1616_v22, 0.0 }
 0xbe0   :  { %1621 = vadd.xlane.f32.xlu2 %v1620_v19 }
 0xc4b   :  { %v1619_v9 = vpop.xlane.xlu1 %1618 }
 0xc4c   :  { %v1623_v30 = vmul.f32 %v1619_v9, %v3933_v34 }
 0xc4e   :  { %v1625_v27 = vadd.f32 1e-05, %v1623_v30 }
 0xc50   :  { %3455 = vrsqrt.f32 %v1625_v27  ;;  %vm1633_vm6 = vweird.f32 %v1625_v27 }
 0xc53   :  { %v1622_v29 = vpop.xlane.xlu2 %1621 }
 0xc54   :  { %v1624_v33 = vmul.f32 %v1622_v29, %v3933_v34 }
 0xc56   :  { %v3456_v37 = vpop.eup %3455  ;;  %v1626_v36 = vadd.f32 1e-05, %v1624_v33 }
 0xc57   :  { %v1628_v6 = vmul.f32 %v3456_v37, %v1625_v27  ;;  %vm1634_vm5 = vweird.f32 %v3456_v37 }
 0xc58   :  { %3457 = vrsqrt.f32 %v1626_v36  ;;  %vm1635_vm7 = vmor %vm1633_vm6, %vm1634_vm5  ;;  %vm1643_vm9 = vweird.f32 %v1626_v36 }
 0xc59   :  { %v1629_v40 = vmul.f32 %v3456_v37, %v1628_v6 }
 0xc5b   :  { %v1630_v42 = vmul.f32 0.5, %v1629_v40 }
 0xc5d   :  { %v1631_v7 = vsub.f32 1.5, %v1630_v42 }
 0xc5e   :  { %v3458_v43 = vpop.eup %3457 }
 0xc5f   :  { %v1632_v44 = vmul.f32 %v3456_v37, %v1631_v7  ;;  %v1638_v48 = vmul.f32 %v3458_v43, %v1626_v36  ;;  %vm1644_vm8 = vweird.f32 %v3458_v43 }
 0xc60   :  { %vm1645_vm11 = vmor %vm1643_vm9, %vm1644_vm8 }
 0xc61   :  { %v1639_v32 = vmul.f32 %v3458_v43, %v1638_v48  ;;  %v1636_v49 = vsel %vm1635_vm7, %v3456_v37, %v1632_v44 }
 0xc62   :  { %v1647_v57 = vmul.f32 %v1636_v49, %v1613_v16 }
 0xc63   :  { %v1640_v51 = vmul.f32 0.5, %v1639_v32 }
 0xc64   :  { %v1652_v45 = vmul.f32 %v3366_v38, %v1647_v57 }
 0xc65   :  { %v1641_v56 = vsub.f32 1.5, %v1640_v51 }
 0xc66   :  { %v4166_v62 = vadd.f32 %v3367_v60, %v1652_v45 }
 0xc67   :  { %v1642_v58 = vmul.f32 %v3458_v43, %v1641_v56 }
 0xc69   :  { %v1646_v59 = vsel %vm1645_vm11, %v3458_v43, %v1642_v58 }
 0xc6a   :  { %v1648_v61 = vmul.f32 %v1646_v59, %v1614_v21 }
 0xc6c   :  { %v1653_v53 = vmul.f32 %v3366_v38, %v1648_v61 }
 0xc6e   :  { %v4168_v39 = vadd.f32 %v3367_v60, %v1653_v53 }
 0xc70   :  { %v1666_v0 = vpack.c.bf16 %v4168_v39, %v4166_v62 }
 0xc72   :  { %3208 = vmatmul.msk.bf16.vlgmr.msrb.gmra.mxu2 %vm96_vm0, %v1666_v0 }
 0xcf5   :  { %v1684_v54 = vpop.f32.mrf.mxu2 }
 0xcf6   :  { %v1685_v2 = vadd.f32 %v3368_v1, %v1684_v54 }
 0xcf8   :  { %1691 = vrot.lane.b32.xlu1 %v1685_v2, %s4608_s8  ;;  %v1709_v41 = vpack.c.bf16 %v1685_v2, %v1685_v2 }
 0xcfa   :  { %v1725_v5 = vunpack.c.l.b16 %v1709_v41 }
 0xcfc   :  { %v1726_v8 = vpack.c.b16 %v1725_v5, %v1725_v5 }
 0xcfd   :  { %v1686_v4 = vpop.f32.mrf.mxu2 }
 0xcfe   :  { %v1687_v47 = vadd.f32 %v3368_v1, %v1686_v4 }
 0xd00   :  { %1705 = vrot.lane.b32.xlu2 %v1687_v47, %s4610_s5  ;;  %1693 = vrot.lane.b32.xlu0 %v1687_v47, %s4608_s8  ;;  %v1710_v28 = vpack.c.bf16 %v1687_v47, %v1687_v47 }
 0xd01   :  { %1703 = vrot.lane.b32.xlu1 %v1685_v2, %s4610_s5 }
 0xd02   :  { %v1749_v24 = vunpack.c.l.b16 %v1710_v28 }
 0xd04   :  { %v4192_v33 = vpack.c.b16 %v1749_v24, %v1749_v24 }
 0xd08   :  { %1697 = vrot.lane.b32.xlu0 %v1685_v2, %s4609_s1 }
 0xd09   :  { %1727 = vrot.lane.b32.xlu1 %v1726_v8, %s4612_s30 }
 0xd10   :  { %1699 = vrot.lane.b32.xlu0 %v1687_v47, %s4609_s1 }
 0xd5a   :  { %v1706_v10 = vpop.permute.xlu2 %1705 }
 0xd5b   :  { %v1716_v12 = vpack.c.bf16 %v1706_v10, %v1706_v10 }
 0xd5d   :  { %v1893_v13 = vunpack.c.l.b16 %v1716_v12 }
 0xd5f   :  { %v4183_v15 = vpack.c.b16 %v1893_v13, %v1893_v13 }
 0xd61   :  { %1895 = vrot.lane.b32.xlu1 %v4183_v15, %s4612_s30 }
 0xd6a   :  { %v1692_v16 = vpop.permute.xlu1 %1691 }
 0xd6b   :  { %v1711_v17 = vpack.c.bf16 %v1692_v16, %v1692_v16 }
 0xd6d   :  { %v1773_v18 = vunpack.c.l.b16 %v1711_v17 }
 0xd6f   :  { %v1774_v14 = vpack.c.b16 %v1773_v18, %v1773_v18 }
 0xd71   :  { %1775 = vrot.lane.b32.xlu0 %v1774_v14, %s4612_s30 }
 0xd72   :  { %v1694_v20 = vpop.permute.xlu0 %1693 }
 0xd73   :  { %v1712_v21 = vpack.c.bf16 %v1694_v20, %v1694_v20  ;;  %v1704_v22 = vpop.permute.xlu1 %1703 }
 0xd74   :  { %v1715_v35 = vpack.c.bf16 %v1704_v22, %v1704_v22 }
 0xd75   :  { %v1797_v19 = vunpack.c.l.b16 %v1712_v21 }
 0xd76   :  { %v1869_v36 = vunpack.c.l.b16 %v1715_v35 }
 0xd77   :  { %v1798_v23 = vpack.c.b16 %v1797_v19, %v1797_v19 }
 0xd78   :  { %v4199_v42 = vpack.c.b16 %v1869_v36, %v1869_v36 }
 0xd79   :  { %1799 = vrot.lane.b32.xlu2 %v1798_v23, %s4612_s30 }
 0xd7a   :  { %v1698_v31 = vpop.permute.xlu0 %1697 }
 0xd7b   :  { %v1713_v9 = vpack.c.bf16 %v1698_v31, %v1698_v31  ;;  %v1728_v30 = vpop.permute.xlu1 %1727 }
 0xd7c   :  { %v1733_v25 = vsel %vm188_vm1, %v1728_v30, 0 }
 0xd7d   :  { %v1821_v27 = vunpack.c.l.b16 %v1713_v9  ;;  %1742 = vmatpush.bf16.xpose.msrb.mxu3 %v1733_v25 }
 0xd7f   :  { %v4190_v29 = vpack.c.b16 %v1821_v27, %v1821_v27 }
 0xd81   :  { %1751 = vrot.lane.b32.xlu2 %v4192_v33, %s4612_s30  ;;  %1823 = vrot.lane.b32.xlu0 %v4190_v29, %s4612_s30 }
 0xd82   :  { %v1700_v37 = vpop.permute.xlu0 %1699 }
 0xd83   :  { %v1714_v6 = vpack.c.bf16 %v1700_v37, %v1700_v37 }
 0xd84   :  { %3214 = vmatmul.msk.bf16.vlgmr.msrb.gmra.mxu3 %vm188_vm1, %v1709_v41 }
 0xd85   :  { %v1845_v40 = vunpack.c.l.b16 %v1714_v6 }
 0xd87   :  { %v4201_v7 = vpack.c.b16 %v1845_v40, %v1845_v40 }
 0xd89   :  { %2062 = vrot.lane.b32.xlu0 %v1774_v14, %s4613_s26  ;;  %1871 = vrot.lane.b32.xlu2 %v4199_v42, %s4612_s30 }
 0xd8a   :  { %1847 = vrot.lane.b32.xlu1 %v4201_v7, %s4612_s30 }
 0xd91   :  { %2020 = vrot.lane.b32.xlu2 %v1726_v8, %s4613_s26 }
 0xd92   :  { %2083 = vrot.lane.b32.xlu1 %v1798_v23, %s4613_s26 }
 0xdd3   :  { %v1800_v43 = vpop.permute.xlu2 %1799  ;;  %v1896_v44 = vpop.permute.xlu1 %1895 }
 0xdd4   :  { %v1805_v48 = vsel %vm188_vm1, %v1800_v43, 0  ;;  %v1901_v32 = vsel %vm188_vm1, %v1896_v44, 0 }
 0xdd5   :  { %1814 = vmatpush.bf16.xpose.msra.mxu2 %v1805_v48 }
 0xddb   :  { %v1752_v49 = vpop.permute.xlu2 %1751 }
 0xddc   :  { %v1757_v51 = vsel %vm188_vm1, %v1752_v49, 0  ;;  %3217 = vmatmul.msk.bf16.vlgmr.msra.gmra.mxu2 %vm188_vm1, %v1712_v21 }
 0xddd   :  { %1910 = vmatpush.bf16.xpose.msrb.mxu2 %v1901_v32  ;;  %1766 = vmatpush.bf16.xpose.msrb.mxu0 %v1757_v51 }
 0xde3   :  { %v1776_v56 = vpop.permute.xlu0 %1775  ;;  %v1872_v38 = vpop.permute.xlu2 %1871 }
 0xde4   :  { %v1781_v57 = vsel %vm188_vm1, %v1776_v56, 0  ;;  %v1877_v58 = vsel %vm188_vm1, %v1872_v38, 0  ;;  %3215 = vmatmul.msk.bf16.vlgmr.msrb.gmra.mxu0 %vm188_vm1, %v1710_v28 }
 0xde5   :  { %1790 = vmatpush.bf16.xpose.msra.mxu1 %v1781_v57 }
 0xdeb   :  { %v2021_v59 = vpop.permute.xlu2 %2020 }
 0xdec   :  { %3216 = vmatmul.msk.bf16.vlgmr.msra.gmra.mxu1 %vm188_vm1, %v1711_v17  ;;  %3221 = vmatmul.msk.bf16.vlgmr.msrb.gmra.mxu2 %vm188_vm1, %v1716_v12  ;;  %v2026_v61 = vsel %vm485_vm2, %v2021_v59, 0 }
 0xded   :  { %1886 = vmatpush.bf16.xpose.msrb.mxu1 %v1877_v58 }
 0xdf3   :  { %v1824_v60 = vpop.permute.xlu0 %1823 }
 0xdf4   :  { %v1829_v45 = vsel %vm188_vm1, %v1824_v60, 0 }
 0xdf5   :  { %1838 = vmatpush.bf16.xpose.msra.mxu3 %v1829_v45 }
 0xdfb   :  { %v2063_v53 = vpop.permute.xlu0 %2062 }
 0xdfc   :  { %v2068_v0 = vsel %vm485_vm2, %v2063_v53, 0  ;;  %v1848_v1 = vpop.permute.xlu1 %1847  ;;  %3218 = vmatmul.msk.bf16.vlgmr.msra.gmra.mxu3 %vm188_vm1, %v1713_v9  ;;  %3220 = vmatmul.msk.bf16.vlgmr.msrb.gmra.mxu1 %vm188_vm1, %v1715_v35 }
 0xdfd   :  { %2035 = vmatpush.bf16.msrb.mxu3 %v2026_v61  ;;  %v1853_v54 = vsel %vm188_vm1, %v1848_v1, 0  ;;  %2077 = vmatpush.bf16.msra.mxu1 %v2068_v0 }
 0xdfe   :  { %1862 = vmatpush.bf16.xpose.msra.mxu0 %v1853_v54 }
 0xe04   :  { %v2084_v2 = vpop.permute.xlu1 %2083 }
 0xe05   :  { %v2089_v4 = vsel %vm485_vm2, %v2084_v2, 0  ;;  %3219 = vmatmul.msk.bf16.vlgmr.msra.gmra.mxu0 %vm188_vm1, %v1714_v6 }
 0xe06   :  { %2098 = vmatpush.bf16.msra.mxu2 %v2089_v4 }
 0xe07   :  { %v1744_v47 = vpop.f32.mrf.mxu3 }
 0xe08   :  { %v1916_v41 = vmul.f32 0.35355338, %v1744_v47 }
 0xe0a   :  { %v1924_v5 = vsel %vm188_vm1, %v1916_v41, -inf }
 0xe0b   :  { %1925 = vmax.xlane.f32.xlu2 %v1924_v5 }
 0xe0f   :  { %v1746_v8 = vpop.f32.mrf.mxu3 }
 0xe5f   :  { %v1816_v10 = vpop.f32.mrf.mxu2 }
 0xe60   :  { %v1919_v18 = vmul.f32 0.35355338, %v1816_v10 }
 0xe61   :  { %v1768_v12 = vpop.f32.mrf.mxu0 }
 0xe62   :  { %v1917_v13 = vmul.f32 0.35355338, %v1768_v12  ;;  %v1933_v22 = vsel %vm188_vm1, %v1919_v18, -inf }
 0xe64   :  { %v1927_v16 = vsel %vm188_vm1, %v1917_v13, -inf }
 0xe65   :  { %1928 = vmax.xlane.f32.xlu0 %v1927_v16 }
 0xe67   :  { %v1818_v17 = vpop.f32.mrf.mxu2 }
 0xe69   :  { %v1770_v14 = vpop.f32.mrf.mxu0  ;;  %v1792_v20 = vpop.f32.mrf.mxu1 }
 0xe6a   :  { %v1918_v21 = vmul.f32 0.35355338, %v1792_v20 }
 0xe6c   :  { %v1930_v19 = vsel %vm188_vm1, %v1918_v21, -inf }
 0xe6d   :  { %1934 = vmax.xlane.f32.xlu0 %v1933_v22  ;;  %1931 = vmax.xlane.f32.xlu1 %v1930_v19 }
 0xe6f   :  { %v1912_v23 = vpop.f32.mrf.mxu2 }
 0xe70   :  { %v1923_v51 = vmul.f32 0.35355338, %v1912_v23 }
 0xe71   :  { %v1794_v28 = vpop.f32.mrf.mxu1 }
 0xe72   :  { %v1945_v57 = vsel %vm188_vm1, %v1923_v51, -inf }
 0xe77   :  { %v1914_v31 = vpop.f32.mrf.mxu2 }
 0xe79   :  { %v1888_v9 = vpop.f32.mrf.mxu1 }
 0xe7a   :  { %v1922_v30 = vmul.f32 0.35355338, %v1888_v9 }
 0xe7c   :  { %v1942_v24 = vsel %vm188_vm1, %v1922_v30, -inf }
 0xe7d   :  { %1943 = vmax.xlane.f32.xlu0 %v1942_v24 }
 0xe7e   :  { %v1926_v25 = vpop.xlane.xlu2 %1925 }
 0xe7f   :  { %v1948_v27 = vsub.f32 %v1916_v41, %v1926_v25  ;;  %v1840_v35 = vpop.f32.mrf.mxu3 }
 0xe80   :  { %v1920_v37 = vmul.f32 0.35355338, %v1840_v35 }
 0xe81   :  { %v1956_v36 = vmul.f32 1.442695, %v1948_v27  ;;  %v1890_v6 = vpop.f32.mrf.mxu1 }
 0xe82   :  { %v1864_v40 = vpop.f32.mrf.mxu0  ;;  %v1936_v43 = vsel %vm188_vm1, %v1920_v37, -inf }
 0xe83   :  { %3459 = vpow2.f32 %v1956_v36  ;;  %v1921_v44 = vmul.f32 0.35355338, %v1864_v40  ;;  %1937 = vmax.xlane.f32.xlu1 %v1936_v43 }
 0xe85   :  { %v1939_v48 = vsel %vm188_vm1, %v1921_v44, -inf }
 0xe86   :  { %1940 = vmax.xlane.f32.xlu2 %v1939_v48 }
 0xe87   :  { %v1842_v32 = vpop.f32.mrf.mxu3 }
 0xe89   :  { %v3460_v49 = vpop.eup %3459 }
 0xe8a   :  { %v1866_v56 = vpop.f32.mrf.mxu0  ;;  %v1972_v38 = vsel %vm188_vm1, %v3460_v49, 0.0 }
 0xe8b   :  { %1973 = vadd.xlane.f32.xlu0 %v1972_v38 }
 0xe8e   :  { %1946 = vmax.xlane.f32.xlu2 %v1945_v57 }
 0xe9c   :  { %2167 = vrot.lane.b32.xlu1 %v4183_v15, %s4613_s26 }
 0xea6   :  { %2041 = vrot.lane.b32.xlu2 %v4192_v33, %s4613_s26 }
 0xed8   :  { %v1929_v58 = vpop.xlane.xlu0 %1928 }
 0xed9   :  { %v1949_v59 = vsub.f32 %v1917_v13, %v1929_v58 }
 0xedb   :  { %v1958_v60 = vmul.f32 1.442695, %v1949_v59 }
 0xedd   :  { %3461 = vpow2.f32 %v1958_v60 }
 0xee0   :  { %v1935_v45 = vpop.xlane.xlu0 %1934  ;;  %v1932_v61 = vpop.xlane.xlu1 %1931 }
 0xee1   :  { %v1951_v53 = vsub.f32 %v1919_v18, %v1935_v45  ;;  %v1950_v0 = vsub.f32 %v1918_v21, %v1932_v61 }
 0xee3   :  { %v3462_v1 = vpop.eup %3461  ;;  %v1962_v54 = vmul.f32 1.442695, %v1951_v53  ;;  %v1960_v2 = vmul.f32 1.442695, %v1950_v0 }
 0xee4   :  { %v1975_v4 = vsel %vm188_vm1, %v3462_v1, 0.0 }
 0xee5   :  { %3463 = vpow2.f32 %v1962_v54  ;;  %1976 = vadd.xlane.f32.xlu0 %v1975_v4 }
 0xee6   :  { %3465 = vpow2.f32 %v1960_v2 }
 0xeeb   :  { %v3464_v15 = vpop.eup %3463 }
 0xeec   :  { %v3466_v47 = vpop.eup %3465  ;;  %v1981_v33 = vsel %vm188_vm1, %v3464_v15, 0.0 }
 0xeed   :  { %1982 = vadd.xlane.f32.xlu1 %v1981_v33  ;;  %v1978_v41 = vsel %vm188_vm1, %v3466_v47, 0.0 }
 0xeee   :  { %1979 = vadd.xlane.f32.xlu2 %v1978_v41 }
 0xef0   :  { %v1944_v5 = vpop.xlane.xlu0 %1943 }
 0xef1   :  { %v1954_v8 = vsub.f32 %v1922_v30, %v1944_v5 }
 0xef3   :  { %v1968_v10 = vmul.f32 1.442695, %v1954_v8 }
 0xef5   :  { %3467 = vpow2.f32 %v1968_v10 }
 0xef6   :  { %v1938_v12 = vpop.xlane.xlu1 %1937 }
 0xef7   :  { %v1952_v13 = vsub.f32 %v1920_v37, %v1938_v12 }
 0xef9   :  { %v1964_v16 = vmul.f32 1.442695, %v1952_v13  ;;  %v1941_v17 = vpop.xlane.xlu2 %1940 }
 0xefa   :  { %v1953_v18 = vsub.f32 %v1921_v44, %v1941_v17 }
 0xefb   :  { %v4243_v14 = vpop.eup %3467  ;;  %3469 = vpow2.f32 %v1964_v16 }
 0xefc   :  { %v1990_v20 = vsel %vm188_vm1, %v4243_v14, 0.0  ;;  %v1966_v21 = vmul.f32 1.442695, %v1953_v18 }
 0xefd   :  { %1991 = vadd.xlane.f32.xlu2 %v1990_v20 }
 0xefe   :  { %v1974_v22 = vpop.xlane.xlu0 %1973 }
 0xeff   :  { %3471 = vrcp.f32 %v1974_v22 }
 0xf00   :  { %3473 = vpow2.f32 %v1966_v21 }
 0xf01   :  { %v3470_v19 = vpop.eup %3469  ;;  %v1947_v23 = vpop.xlane.xlu2 %1946 }
 0xf02   :  { %v1955_v28 = vsub.f32 %v1923_v51, %v1947_v23  ;;  %v1984_v31 = vsel %vm188_vm1, %v3470_v19, 0.0 }
 0xf03   :  { %1985 = vadd.xlane.f32.xlu0 %v1984_v31 }
 0xf04   :  { %v1970_v9 = vmul.f32 1.442695, %v1955_v28  ;;  %v3210_v28 = vld [vmem:[%s4606_s9 + $0x28] sm:$0xff] }
 0xf05   :  { %v3472_v30 = vpop.eup %3471  ;;  %v2216_v31 = vpack.c.bf16 %v3210_v28, %v3210_v28 }
 0xf06   :  { %v2004_v24 = vmul.f32 %v3472_v30, %v3460_v49  ;;  %3475 = vpow2.f32 %v1970_v9  ;;  %v4248_v25 = vpop.eup %3473 }
 0xf07   :  { %v1987_v36 = vsel %vm188_vm1, %v4248_v25, 0.0  ;;  %v2221_v9 = vsel %vm485_vm2, %v2216_v31, 0 }
 0xf08   :  { %v2012_v27 = vpack.c.bf16 %v2004_v24, %v2004_v24 }
 0xf09   :  { %v2042_v35 = vpop.permute.xlu2 %2041 }
 0xf0a   :  { %v2047_v37 = vsel %vm485_vm2, %v2042_v35, 0  ;;  %3222 = vmatmul.msk.bf16.vlgmr.msrb.gmra.mxu3 %vm188_vm1, %v2012_v27 }
 0xf0b   :  { %2056 = vmatpush.bf16.msrb.mxu0 %v2047_v37  ;;  %1988 = vadd.xlane.f32.xlu0 %v1987_v36  ;;  %v3212_v36 = vld [vmem:[%s4606_s9 + $0x38] sm:$0xff] }
 0xf0c   :  { %v3476_v6 = vpop.eup %3475 }
 0xf0d   :  { %v1993_v40 = vsel %vm188_vm1, %v3476_v6, 0.0 }
 0xf0e   :  { %1994 = vadd.xlane.f32.xlu1 %v1993_v40  ;;  %v2168_v43 = vpop.permute.xlu1 %2167 }
 0xf0f   :  { %v2173_v44 = vsel %vm485_vm2, %v2168_v43, 0 }
 0xf10   :  { %2182 = vmatpush.bf16.msrb.mxu2 %v2173_v44 }
 0xf15   :  { %2104 = vrot.lane.b32.xlu2 %v4190_v29, %s4613_s26 }
 0xf1f   :  { %2146 = vrot.lane.b32.xlu0 %v4199_v42, %s4613_s26 }
 0xf27   :  { %2125 = vrot.lane.b32.xlu1 %v4201_v7, %s4613_s26 }
 0xf58   :  { %v1977_v48 = vpop.xlane.xlu0 %1976 }
 0xf59   :  { %3477 = vrcp.f32 %v1977_v48  ;;  %v3211_v48 = vld [vmem:[%s4606_s9 + $0x30] sm:$0xff] }
 0xf5f   :  { %v3478_v32 = vpop.eup %3477 }
 0xf60   :  { %v2005_v49 = vmul.f32 %v3478_v32, %v3462_v1  ;;  %v1983_v51 = vpop.xlane.xlu1 %1982  ;;  %v2240_v32 = vpack.c.bf16 %v3211_v48, %v3211_v48 }
 0xf61   :  { %v1980_v56 = vpop.xlane.xlu2 %1979  ;;  %3479 = vrcp.f32 %v1983_v51 }
 0xf62   :  { %v2013_v38 = vpack.c.bf16 %v2005_v49, %v2005_v49  ;;  %3481 = vrcp.f32 %v1980_v56  ;;  %v2245_v49 = vsel %vm485_vm2, %v2240_v32, 0 }
 0xf64   :  { %3223 = vmatmul.msk.bf16.vlgmr.msrb.gmra.mxu0 %vm188_vm1, %v2013_v38 }
 0xf67   :  { %v3480_v57 = vpop.eup %3479 }
 0xf68   :  { %v3482_v58 = vpop.eup %3481  ;;  %v2007_v29 = vmul.f32 %v3480_v57, %v3464_v15 }
 0xf69   :  { %v2006_v59 = vmul.f32 %v3482_v58, %v3466_v47 }
 0xf6a   :  { %v2015_v60 = vpack.c.bf16 %v2007_v29, %v2007_v29 }
 0xf6b   :  { %v2014_v42 = vpack.c.bf16 %v2006_v59, %v2006_v59 }
 0xf6c   :  { %3225 = vmatmul.msk.bf16.vlgmr.msra.gmra.mxu2 %vm188_vm1, %v2015_v60 }
 0xf6d   :  { %3224 = vmatmul.msk.bf16.vlgmr.msra.gmra.mxu1 %vm188_vm1, %v2014_v42 }
 0xf70   :  { %v1992_v7 = vpop.xlane.xlu2 %1991 }
 0xf76   :  { %v1986_v45 = vpop.xlane.xlu0 %1985 }
 0xf77   :  { %3483 = vrcp.f32 %v1986_v45 }
 0xf78   :  { %v2105_v61 = vpop.permute.xlu2 %2104 }
 0xf79   :  { %v2110_v53 = vsel %vm485_vm2, %v2105_v61, 0  ;;  %v3369_v61 = vld [vmem:[%s4607_s29 + $0x1] ss:$0 sm:$0xff]  ;;  %s3541_s29 = smov 32  }
 0xf7a   :  { %2119 = vmatpush.bf16.msra.mxu3 %v2110_v53 }
 0xf7d   :  { %v3484_v0 = vpop.eup %3483 }
 0xf7e   :  { %v2008_v1 = vmul.f32 %v3484_v0, %v3470_v19  ;;  %v1989_v15 = vpop.xlane.xlu0 %1988 }
 0xf80   :  { %v2016_v54 = vpack.c.bf16 %v2008_v1, %v2008_v1 }
 0xf81   :  { %v1995_v2 = vpop.xlane.xlu1 %1994 }
 0xf82   :  { %3485 = vrcp.f32 %v1995_v2  ;;  %3226 = vmatmul.msk.bf16.vlgmr.msra.gmra.mxu3 %vm188_vm1, %v2016_v54 }
 0xf83   :  { %3487 = vrcp.f32 %v1992_v7 }
 0xf84   :  { %3489 = vrcp.f32 %v1989_v15 }
 0xf88   :  { %v3486_v4 = vpop.eup %3485 }
 0xf89   :  { %v2011_v47 = vmul.f32 %v3486_v4, %v3476_v6  ;;  %v3488_v41 = vpop.eup %3487  ;;  %v2264_v6 = vpack.c.bf16 %v3212_v36, %v3212_v36 }
 0xf8a   :  { %v2010_v8 = vmul.f32 %v3488_v41, %v4243_v14  ;;  %v3490_v16 = vpop.eup %3489  ;;  %v3209_v14 = vld [vmem:[%s4606_s9 + $0x20] sm:$0xff] }
 0xf8b   :  { %v2019_v33 = vpack.c.bf16 %v2011_v47, %v2011_v47  ;;  %v2009_v18 = vmul.f32 %v3490_v16, %v4248_v25  ;;  %v2189_v19 = vpack.c.bf16 %v3209_v14, %v3209_v14  ;;  %v2269_v43 = vsel %vm485_vm2, %v2264_v6, 0  ;;  %v3237_v14 = vld [vmem:[%s4551_s6 + $0x28] sm:$0xff] }
 0xf8c   :  { %v2018_v13 = vpack.c.bf16 %v2010_v8, %v2010_v8  ;;  %2278 = vmatpush.bf16.msra.mxu2 %v2269_v43 }
 0xf8d   :  { %v2037_v5 = vpop.f32.mrf.mxu3  ;;  %3229 = vmatmul.msk.bf16.vlgmr.msrb.gmra.mxu2 %vm188_vm1, %v2019_v33  ;;  %v2017_v22 = vpack.c.bf16 %v2009_v18, %v2009_v18  ;;  %v2194_v23 = vsel %vm485_vm2, %v2189_v19, 0 }
 0xf8e   :  { %2203 = vmatpush.bf16.msrb.mxu3 %v2194_v23 }
 0xf91   :  { %v2147_v10 = vpop.permute.xlu0 %2146 }
 0xf92   :  { %v2152_v12 = vsel %vm485_vm2, %v2147_v10, 0 }
 0xf93   :  { %2161 = vmatpush.bf16.msrb.mxu1 %v2152_v12 }
 0xf95   :  { %v2039_v17 = vpop.f32.mrf.mxu3 }
 0xf96   :  { %3228 = vmatmul.msk.bf16.vlgmr.msrb.gmra.mxu1 %vm188_vm1, %v2018_v13 }
 0xf97   :  { %2254 = vmatpush.bf16.msra.mxu1 %v2245_v49 }
 0xf99   :  { %v2126_v20 = vpop.permute.xlu1 %2125 }
 0xf9a   :  { %v2131_v21 = vsel %vm485_vm2, %v2126_v20, 0 }
 0xf9b   :  { %2140 = vmatpush.bf16.msra.mxu0 %v2131_v21 }
 0xf9e   :  { %3227 = vmatmul.msk.bf16.vlgmr.msra.gmra.mxu0 %vm188_vm1, %v2017_v22  ;;  %v3236_v22 = vld [vmem:[%s4551_s6 + $0x20] sm:$0xff] }
 0xf9f   :  { %2230 = vmatpush.bf16.msrb.mxu0 %v2221_v9  ;;  %v2355_v19 = vpack.c.bf16 %v3237_v14, %v3236_v22 }
 0xfe1   :  { %v2058_v30 = vpop.f32.mrf.mxu0 }
 0xfe2   :  { %v2188_v24 = vpack.c.bf16 %v2058_v30, %v2037_v5 }
 0xfe4   :  { %3230 = vmatmul.msk.bf16.vlgmr.msrb.gmra.mxu3 %vm188_vm1, %v2188_v24 }
 0xfe9   :  { %v2060_v25 = vpop.f32.mrf.mxu0 }
 0xfea   :  { %v2079_v27 = vpop.f32.mrf.mxu1 }
 0xfef   :  { %v2100_v35 = vpop.f32.mrf.mxu2 }
 0xff0   :  { %v2215_v37 = vpack.c.bf16 %v2100_v35, %v2079_v27 }
 0xff2   :  { %v2081_v40 = vpop.f32.mrf.mxu1  ;;  %3231 = vmatmul.msk.bf16.vlgmr.msrb.gmra.mxu0 %vm188_vm1, %v2215_v37 }
 0xff7   :  { %v2102_v44 = vpop.f32.mrf.mxu2 }
0x1005   :  { %v2121_v51 = vpop.f32.mrf.mxu3 }
0x100d   :  { %v2123_v56 = vpop.f32.mrf.mxu3 }
0x1010   :  { %v2184_v38 = vpop.f32.mrf.mxu2 }
0x1013   :  { %v2163_v57 = vpop.f32.mrf.mxu1 }
0x1014   :  { %v2263_v58 = vpack.c.bf16 %v2184_v38, %v2163_v57 }
0x1016   :  { %3233 = vmatmul.msk.bf16.vlgmr.msra.gmra.mxu2 %vm188_vm1, %v2263_v58 }
0x1018   :  { %v2186_v29 = vpop.f32.mrf.mxu2 }
0x101b   :  { %v2142_v59 = vpop.f32.mrf.mxu0  ;;  %v2165_v60 = vpop.f32.mrf.mxu1 }
0x101c   :  { %v2239_v42 = vpack.c.bf16 %v2142_v59, %v2121_v51 }
0x101e   :  { %3232 = vmatmul.msk.bf16.vlgmr.msra.gmra.mxu1 %vm188_vm1, %v2239_v42 }
0x1023   :  { %v2144_v7 = vpop.f32.mrf.mxu0 }
0x1067   :  { %v2205_v45 = vpop.f32.mrf.mxu3 }
0x1068   :  { %v2213_v0 = vadd.f32 %v3369_v61, %v2205_v45 }
0x106f   :  { %v2232_v53 = vpop.f32.mrf.mxu0  ;;  %v2207_v15 = vpop.f32.mrf.mxu3 }
0x1070   :  { %v2237_v1 = vadd.f32 %v2232_v53, %v2213_v0  ;;  %v2214_v41 = vadd.f32 %v3369_v61, %v2207_v15 }
0x1077   :  { %v2234_v33 = vpop.f32.mrf.mxu0 }
0x1078   :  { %v2238_v8 = vadd.f32 %v2234_v33, %v2214_v41  ;;  %v3370_v41 = vld [vmem:[%s4611_s16 + $0x1] ss:$0 sm:$0xff] }
0x1099   :  { %v2280_v54 = vpop.f32.mrf.mxu2 }
0x109b   :  { %v2256_v2 = vpop.f32.mrf.mxu1 }
0x109c   :  { %v2261_v4 = vadd.f32 %v2256_v2, %v2237_v1 }
0x109e   :  { %v2285_v47 = vadd.f32 %v2280_v54, %v2261_v4 }
0x10a0   :  { %v2287_v5 = vadd.f32 %v2285_v47, %v4166_v62  ;;  %v3238_v62 = vld [vmem:[%s4551_s6 + $0x30] sm:$0xff] }
0x10a1   :  { %v2282_v16 = vpop.f32.mrf.mxu2 }
0x10a2   :  { %v2293_v10 = vsel %vm96_vm0, %v2287_v5, 0.0 }
0x10a3   :  { %v2258_v12 = vpop.f32.mrf.mxu1  ;;  %2294 = vadd.xlane.f32.xlu0 %v2293_v10 }
0x10a4   :  { %v2262_v13 = vadd.f32 %v2258_v12, %v2238_v8  ;;  %v3371_v12 = vld [vmem:[%s4550_s17 + $0x1] ss:$0 sm:$0xff] }
0x10a6   :  { %v2286_v17 = vadd.f32 %v2282_v16, %v2262_v13 }
0x10a8   :  { %v2288_v18 = vadd.f32 %v2286_v17, %v4168_v39  ;;  %v3239_v39 = vld [vmem:[%s4551_s6 + $0x38] sm:$0xff] }
0x10a9   :  { %v2356_v21 = vpack.c.bf16 %v3239_v39, %v3238_v62  ;;  %v3372_v39 = vld [vmem:[%s4552_s7 + $0x1] ss:$0 sm:$0xff] }
0x10aa   :  { %v2296_v20 = vsel %vm96_vm0, %v2288_v18, 0.0 }
0x10ab   :  { %2297 = vadd.xlane.f32.xlu1 %v2296_v20  ;;  %2369 = vmatpush.bf16.msra.mxu3 %v2356_v21 }
0x10af   :  { %2370 = vmatpush.bf16.msra.mxu3 %v2355_v19 }
0x10b7   :  { %2454 = vrot.lane.b32.xlu0 %v3966_v52, %s4613_s26 }
0x10bf   :  { %2412 = vrot.lane.b32.xlu0 %v3880_v26, %s4613_s26 }
0x10c4   :  { %2475 = vrot.lane.b32.xlu1 %v3943_v3, %s4613_s26 }
0x10c7   :  { %2538 = vrot.lane.b32.xlu0 %v3977_v63, %s4613_s26 }
0x10cc   :  { %2433 = vrot.lane.b32.xlu1 %v3898_v55, %s4613_s26 }
0x10cf   :  { %2496 = vrot.lane.b32.xlu0 %v3947_v11, %s4613_s26 }
0x10d7   :  { %2722 = vrot.lane.b32.xlu0 %v3966_v52, %s3541_s29 }
0x1116   :  { %v2295_v52 = vpop.xlane.xlu0 %2294 }
0x1117   :  { %v2299_v23 = vmul.f32 %v2295_v52, %v3933_v34 }
0x1119   :  { %v2301_v28 = vsub.f32 %v2287_v5, %v2299_v23 }
0x111b   :  { %v2303_v31 = vmul.f32 %v2301_v28, %v2301_v28 }
0x111d   :  { %v2305_v9 = vsel %vm96_vm0, %v2303_v31, 0.0 }
0x111e   :  { %2306 = vadd.xlane.f32.xlu2 %v2305_v9  ;;  %v2298_v30 = vpop.xlane.xlu1 %2297 }
0x111f   :  { %v2300_v24 = vmul.f32 %v2298_v30, %v3933_v34 }
0x1121   :  { %v2302_v25 = vsub.f32 %v2288_v18, %v2300_v24 }
0x1123   :  { %v2304_v27 = vmul.f32 %v2302_v25, %v2302_v25 }
0x1125   :  { %v2308_v35 = vsel %vm96_vm0, %v2304_v27, 0.0 }
0x1126   :  { %2309 = vadd.xlane.f32.xlu2 %v2308_v35 }
0x1129   :  { %v2455_v37 = vpop.permute.xlu0 %2454 }
0x112a   :  { %v2460_v36 = vsel %vm188_vm1, %v2455_v37, 0 }
0x112b   :  { %2469 = vmatpush.bf16.xpose.msrb.mxu2 %v2460_v36 }
0x1131   :  { %v2413_v6 = vpop.permute.xlu0 %2412 }
0x1132   :  { %v2418_v40 = vsel %vm188_vm1, %v2413_v6, 0 }
0x1133   :  { %2427 = vmatpush.bf16.xpose.msra.mxu0 %v2418_v40 }
0x1136   :  { %v2476_v43 = vpop.permute.xlu1 %2475 }
0x1137   :  { %v2481_v44 = vsel %vm188_vm1, %v2476_v43, 0 }
0x1138   :  { %2490 = vmatpush.bf16.xpose.msrb.mxu3 %v2481_v44 }
0x1139   :  { %v2539_v48 = vpop.permute.xlu0 %2538 }
0x113a   :  { %v2544_v32 = vsel %vm188_vm1, %v2539_v48, 0 }
0x113b   :  { %2553 = vmatpush.bf16.xpose.msra.mxu2 %v2544_v32 }
0x113e   :  { %v2434_v49 = vpop.permute.xlu1 %2433 }
0x113f   :  { %v2439_v51 = vsel %vm188_vm1, %v2434_v49, 0 }
0x1140   :  { %2448 = vmatpush.bf16.xpose.msrb.mxu1 %v2439_v51 }
0x1141   :  { %v2497_v56 = vpop.permute.xlu0 %2496 }
0x1142   :  { %v2502_v38 = vsel %vm188_vm1, %v2497_v56, 0 }
0x1143   :  { %2511 = vmatpush.bf16.xpose.msrb.mxu0 %v2502_v38 }
0x1149   :  { %v2723_v27 = vpop.permute.xlu0 %2722 }
0x1191   :  { %v2307_v57 = vpop.xlane.xlu2 %2306 }
0x1192   :  { %v2311_v58 = vmul.f32 %v2307_v57, %v3933_v34 }
0x1194   :  { %v2313_v29 = vadd.f32 1e-05, %v2311_v58 }
0x1196   :  { %3491 = vrsqrt.f32 %v2313_v29  ;;  %vm2321_vm13 = vweird.f32 %v2313_v29 }
0x1199   :  { %v2310_v59 = vpop.xlane.xlu2 %2309 }
0x119a   :  { %v2312_v60 = vmul.f32 %v2310_v59, %v3933_v34 }
0x119c   :  { %v3492_v42 = vpop.eup %3491  ;;  %v2314_v7 = vadd.f32 1e-05, %v2312_v60 }
0x119d   :  { %v2316_v45 = vmul.f32 %v3492_v42, %v2313_v29  ;;  %vm2322_vm12 = vweird.f32 %v3492_v42 }
0x119e   :  { %3493 = vrsqrt.f32 %v2314_v7  ;;  %vm2323_vm14 = vmor %vm2321_vm13, %vm2322_vm12  ;;  %vm2331_vm3 = vweird.f32 %v2314_v7 }
0x119f   :  { %v2317_v61 = vmul.f32 %v3492_v42, %v2316_v45 }
0x11a1   :  { %v2318_v53 = vmul.f32 0.5, %v2317_v61 }
0x11a3   :  { %v2319_v0 = vsub.f32 1.5, %v2318_v53 }
0x11a4   :  { %v3494_v1 = vpop.eup %3493 }
0x11a5   :  { %v2320_v54 = vmul.f32 %v3492_v42, %v2319_v0  ;;  %v2326_v2 = vmul.f32 %v3494_v1, %v2314_v7  ;;  %vm2332_vm15 = vweird.f32 %v3494_v1 }
0x11a6   :  { %vm2333_vm5 = vmor %vm2331_vm3, %vm2332_vm15 }
0x11a7   :  { %v2327_v4 = vmul.f32 %v3494_v1, %v2326_v2  ;;  %v2324_v15 = vsel %vm2323_vm14, %v3492_v42, %v2320_v54 }
0x11a8   :  { %v2335_v5 = vmul.f32 %v2324_v15, %v2301_v28 }
0x11a9   :  { %v2328_v47 = vmul.f32 0.5, %v2327_v4 }
0x11aa   :  { %v2340_v13 = vmul.f32 %v3370_v41, %v2335_v5 }
0x11ab   :  { %v2329_v33 = vsub.f32 1.5, %v2328_v47 }
0x11ac   :  { %v4345_v18 = vadd.f32 %v3371_v12, %v2340_v13 }
0x11ad   :  { %v2330_v8 = vmul.f32 %v3494_v1, %v2329_v33 }
0x11af   :  { %v2334_v10 = vsel %vm2333_vm5, %v3494_v1, %v2330_v8 }
0x11b0   :  { %v2336_v16 = vmul.f32 %v2334_v10, %v2302_v25 }
0x11b2   :  { %v2341_v17 = vmul.f32 %v3370_v41, %v2336_v16 }
0x11b4   :  { %v4347_v20 = vadd.f32 %v3371_v12, %v2341_v17 }
0x11b6   :  { %v2354_v62 = vpack.c.bf16 %v4347_v20, %v4345_v18 }
0x11b8   :  { %3241 = vmatmul.msk.bf16.vlgmr.msra.gmra.mxu3 %vm96_vm0, %v2354_v62 }
0x123b   :  { %v2372_v21 = vpop.f32.mrf.mxu3 }
0x123c   :  { %v2373_v22 = vadd.f32 %v3372_v39, %v2372_v21 }
0x123e   :  { %v2397_v14 = vpack.c.bf16 %v2373_v22, %v2373_v22 }
0x1240   :  { %3247 = vmatmul.msk.bf16.vlgmr.msra.gmra.mxu0 %vm188_vm1, %v2397_v14 }
0x1243   :  { %v2374_v19 = vpop.f32.mrf.mxu3 }
0x1244   :  { %v2375_v52 = vadd.f32 %v3372_v39, %v2374_v19 }
0x1246   :  { %v2398_v23 = vpack.c.bf16 %v2375_v52, %v2375_v52  ;;  %v3345_v28 = vpack.i.bf16 %v2375_v52, %v2373_v22 }
0x1248   :  { %3346 = vrot.lane.b32.xlu1 %v3345_v28, %s4610_s5  ;;  %3341 = vrot.lane.b32.xlu2 %v3345_v28, %s4608_s8 }
0x1249   :  { %3248 = vmatmul.msk.bf16.vlgmr.msrb.gmra.mxu1 %vm188_vm1, %v2398_v23 }
0x1250   :  { %3351 = vrot.lane.b32.xlu1 %v3345_v28, %s4609_s1  ;;  %2559 = vrot.lane.b32.xlu2 %v3981_v46, %s4613_s26 }
0x1258   :  { %2517 = vrot.lane.b32.xlu2 %v4002_v50, %s4613_s26  ;;  %s4617_s26 = sld [smem:[#allocation14_spill]] }
0x12a2   :  { %v3342_v31 = vpop.permute.xlu2 %3341 }
0x12a3   :  { %v3344_v9 = vunpack.i.h.bf16 %v3342_v31  ;;  %v3343_v30 = vunpack.i.l.bf16 %v3342_v31 }
0x12a5   :  { %v2400_v24 = vpack.c.bf16 %v3344_v9, %v3344_v9  ;;  %v2399_v25 = vpack.c.bf16 %v3343_v30, %v3343_v30 }
0x12a7   :  { %3249 = vmatmul.msk.bf16.vlgmr.msrb.gmra.mxu2 %vm188_vm1, %v2399_v25  ;;  %3250 = vmatmul.msk.bf16.vlgmr.msrb.gmra.mxu3 %vm188_vm1, %v2400_v24 }
0x12a8   :  { %2735 = vmatpush.bf16.msrb.mxu2 %v2723_v27 }
0x12aa   :  { %v2560_v35 = vpop.permute.xlu2 %2559 }
0x12ab   :  { %v2565_v37 = vsel %vm188_vm1, %v2560_v35, 0 }
0x12ac   :  { %2574 = vmatpush.bf16.xpose.msra.mxu3 %v2565_v37 }
0x12b2   :  { %v2518_v36 = vpop.permute.xlu2 %2517 }
0x12b3   :  { %v2523_v6 = vsel %vm188_vm1, %v2518_v36, 0 }
0x12b4   :  { %2532 = vmatpush.bf16.xpose.msra.mxu1 %v2523_v6 }
0x12ba   :  { %v3347_v40 = vpop.permute.xlu1 %3346 }
0x12bb   :  { %v3349_v43 = vunpack.i.h.bf16 %v3347_v40  ;;  %v3348_v44 = vunpack.i.l.bf16 %v3347_v40 }
0x12bd   :  { %v2404_v48 = vpack.c.bf16 %v3349_v43, %v3349_v43  ;;  %v2403_v32 = vpack.c.bf16 %v3348_v44, %v3348_v44  ;;  %v2429_v49 = vpop.f32.mrf.mxu0 }
0x12be   :  { %v2580_v51 = vmul.f32 0.35355338, %v2429_v49 }
0x12bf   :  { %3253 = vmatmul.msk.bf16.vlgmr.msra.gmra.mxu2 %vm188_vm1, %v2403_v32  ;;  %3254 = vmatmul.msk.bf16.vlgmr.msra.gmra.mxu3 %vm188_vm1, %v2404_v48 }
0x12c0   :  { %v2588_v56 = vsel %vm1130_vm10, %v2580_v51, -inf }
0x12c1   :  { %2589 = vmax.xlane.f32.xlu1 %v2588_v56 }
0x12c2   :  { %v3352_v38 = vpop.permute.xlu1 %3351 }
0x12c3   :  { %v3354_v57 = vunpack.i.h.bf16 %v3352_v38  ;;  %v3353_v58 = vunpack.i.l.bf16 %v3352_v38 }
0x12c5   :  { %v2402_v29 = vpack.c.bf16 %v3354_v57, %v3354_v57  ;;  %v2401_v59 = vpack.c.bf16 %v3353_v58, %v3353_v58  ;;  %v2431_v60 = vpop.f32.mrf.mxu0 }
0x12c6   :  { %v2450_v42 = vpop.f32.mrf.mxu1 }
0x12c7   :  { %v2581_v7 = vmul.f32 0.35355338, %v2450_v42  ;;  %3251 = vmatmul.msk.bf16.vlgmr.msrb.gmra.mxu0 %vm188_vm1, %v2401_v59  ;;  %3252 = vmatmul.msk.bf16.vlgmr.msra.gmra.mxu1 %vm188_vm1, %v2402_v29 }
0x12c9   :  { %v2591_v45 = vsel %vm1130_vm10, %v2581_v7, -inf }
0x12ca   :  { %2592 = vmax.xlane.f32.xlu0 %v2591_v45 }
0x12ce   :  { %v2452_v61 = vpop.f32.mrf.mxu1 }
0x132a   :  { %v2471_v53 = vpop.f32.mrf.mxu2  ;;  %v2492_v0 = vpop.f32.mrf.mxu3 }
0x132b   :  { %v2582_v19 = vmul.f32 0.35355338, %v2471_v53  ;;  %v2583_v25 = vmul.f32 0.35355338, %v2492_v0 }
0x132d   :  { %v2594_v30 = vsel %vm1130_vm10, %v2582_v19, -inf  ;;  %v2597_v27 = vsel %vm1130_vm10, %v2583_v25, -inf }
0x1332   :  { %v2473_v1 = vpop.f32.mrf.mxu2  ;;  %v2494_v54 = vpop.f32.mrf.mxu3 }
0x1334   :  { %v2590_v2 = vpop.xlane.xlu1 %2589 }
0x1335   :  { %v2612_v15 = vsub.f32 %v2580_v51, %v2590_v2 }
0x1337   :  { %v2620_v41 = vmul.f32 1.442695, %v2612_v15 }
0x133d   :  { %v2593_v4 = vpop.xlane.xlu0 %2592 }
0x133e   :  { %v2613_v47 = vsub.f32 %v2581_v7, %v2593_v4 }
0x1340   :  { %v2622_v33 = vmul.f32 1.442695, %v2613_v47 }
0x1342   :  { %3495 = vpow2.f32 %v2622_v33  ;;  %v2555_v5 = vpop.f32.mrf.mxu2  ;;  %v2576_v8 = vpop.f32.mrf.mxu3 }
0x1343   :  { %3497 = vpow2.f32 %v2620_v41  ;;  %v2587_v31 = vmul.f32 0.35355338, %v2576_v8  ;;  %v2586_v35 = vmul.f32 0.35355338, %v2555_v5 }
0x1344   :  { %v2513_v10 = vpop.f32.mrf.mxu0  ;;  %v2534_v12 = vpop.f32.mrf.mxu1 }
0x1345   :  { %v2584_v13 = vmul.f32 0.35355338, %v2513_v10  ;;  %v2585_v16 = vmul.f32 0.35355338, %v2534_v12  ;;  %v2609_v24 = vsel %vm1130_vm10, %v2587_v31, -inf  ;;  %v2606_v37 = vsel %vm1130_vm10, %v2586_v35, -inf }
0x1347   :  { %v2603_v17 = vsel %vm1130_vm10, %v2585_v16, -inf  ;;  %v2600_v62 = vsel %vm1130_vm10, %v2584_v13, -inf }
0x1348   :  { %v3496_v39 = vpop.eup %3495  ;;  %2604 = vmax.xlane.f32.xlu2 %v2603_v17  ;;  %2601 = vmax.xlane.f32.xlu0 %v2600_v62 }
0x1349   :  { %v2639_v21 = vsel %vm1130_vm10, %v3496_v39, 0.0  ;;  %v4377_v52 = vpop.eup %3497 }
0x134a   :  { %2640 = vadd.xlane.f32.xlu1 %v2639_v21  ;;  %v2557_v22 = vpop.f32.mrf.mxu2  ;;  %v2578_v14 = vpop.f32.mrf.mxu3  ;;  %v2636_v9 = vsel %vm1130_vm10, %v4377_v52, 0.0 }
0x134c   :  { %v2515_v23 = vpop.f32.mrf.mxu0  ;;  %v2536_v28 = vpop.f32.mrf.mxu1 }
0x1350   :  { %2637 = vadd.xlane.f32.xlu2 %v2636_v9  ;;  %2595 = vmax.xlane.f32.xlu0 %v2594_v30 }
0x1352   :  { %2610 = vmax.xlane.f32.xlu1 %v2609_v24 }
0x1358   :  { %2598 = vmax.xlane.f32.xlu2 %v2597_v27 }
0x1360   :  { %2607 = vmax.xlane.f32.xlu2 %v2606_v37 }
0x1364   :  { %2703 = vrot.lane.b32.xlu0 %v3898_v55, %s3541_s29 }
0x136b   :  { %2684 = vrot.lane.b32.xlu1 %v3880_v26, %s3541_s29 }
0x136c   :  { %2798 = vrot.lane.b32.xlu0 %v3977_v63, %s3541_s29 }
0x1378   :  { %2741 = vrot.lane.b32.xlu2 %v3943_v3, %s3541_s29 }
0x13bb   :  { %v2605_v36 = vpop.xlane.xlu2 %2604  ;;  %v2602_v6 = vpop.xlane.xlu0 %2601 }
0x13bc   :  { %v2617_v40 = vsub.f32 %v2585_v16, %v2605_v36  ;;  %v2616_v43 = vsub.f32 %v2584_v13, %v2602_v6 }
0x13bd   :  { %v2641_v32 = vpop.xlane.xlu1 %2640 }
0x13be   :  { %v2630_v44 = vmul.f32 1.442695, %v2617_v40  ;;  %v2628_v48 = vmul.f32 1.442695, %v2616_v43 }
0x13c0   :  { %3499 = vpow2.f32 %v2630_v44 }
0x13c1   :  { %3501 = vpow2.f32 %v2628_v48 }
0x13c3   :  { %v2638_v49 = vpop.xlane.xlu2 %2637  ;;  %v2596_v55 = vpop.xlane.xlu0 %2595 }
0x13c4   :  { %v2614_v51 = vsub.f32 %v2582_v19, %v2596_v55 }
0x13c5   :  { %v2611_v57 = vpop.xlane.xlu1 %2610 }
0x13c6   :  { %v4393_v56 = vpop.eup %3499  ;;  %v2624_v26 = vmul.f32 1.442695, %v2614_v51  ;;  %v2619_v60 = vsub.f32 %v2587_v31, %v2611_v57 }
0x13c7   :  { %v4395_v38 = vpop.eup %3501  ;;  %v2651_v3 = vsel %vm1130_vm10, %v4393_v56, 0.0 }
0x13c8   :  { %3503 = vpow2.f32 %v2624_v26  ;;  %v2648_v63 = vsel %vm1130_vm10, %v4395_v38, 0.0  ;;  %2652 = vadd.xlane.f32.xlu2 %v2651_v3  ;;  %v2634_v61 = vmul.f32 1.442695, %v2619_v60 }
0x13c9   :  { %2649 = vadd.xlane.f32.xlu1 %v2648_v63  ;;  %3505 = vrcp.f32 %v2641_v32 }
0x13cb   :  { %v2599_v58 = vpop.xlane.xlu2 %2598 }
0x13cc   :  { %v2615_v29 = vsub.f32 %v2583_v25, %v2599_v58 }
0x13ce   :  { %v3504_v59 = vpop.eup %3503  ;;  %v2626_v42 = vmul.f32 1.442695, %v2615_v29  ;;  %v3243_v29 = vld [vmem:[%s4553_s10 + $0x28] sm:$0xff] }
0x13cf   :  { %v2642_v7 = vsel %vm1130_vm10, %v3504_v59, 0.0  ;;  %v3506_v45 = vpop.eup %3505 }
0x13d0   :  { %3507 = vpow2.f32 %v2626_v42  ;;  %v2669_v0 = vmul.f32 %v3506_v45, %v3496_v39  ;;  %v3245_v45 = vld [vmem:[%s4553_s10 + $0x38] sm:$0xff] }
0x13d1   :  { %2643 = vadd.xlane.f32.xlu1 %v2642_v7  ;;  %3509 = vrcp.f32 %v2638_v49 }
0x13d2   :  { %3511 = vpow2.f32 %v2634_v61  ;;  %v2677_v33 = vpack.c.bf16 %v2669_v0, %v2669_v0  ;;  %v2912_v61 = vpack.c.bf16 %v3245_v45, %v3245_v45 }
0x13d3   :  { %v2608_v53 = vpop.xlane.xlu2 %2607 }
0x13d4   :  { %v2618_v1 = vsub.f32 %v2586_v35, %v2608_v53  ;;  %v2917_v53 = vsel %vm485_vm2, %v2912_v61, 0 }
0x13d6   :  { %v3508_v54 = vpop.eup %3507  ;;  %v2632_v2 = vmul.f32 1.442695, %v2618_v1  ;;  %v2704_v4 = vpop.permute.xlu0 %2703 }
0x13d7   :  { %2716 = vmatpush.bf16.msrb.mxu1 %v2704_v4  ;;  %v2645_v15 = vsel %vm1130_vm10, %v3508_v54, 0.0  ;;  %v3510_v47 = vpop.eup %3509 }
0x13d8   :  { %3513 = vpow2.f32 %v2632_v2  ;;  %2646 = vadd.xlane.f32.xlu0 %v2645_v15  ;;  %v2668_v41 = vmul.f32 %v3510_v47, %v4377_v52  ;;  %v3512_v8 = vpop.eup %3511 }
0x13d9   :  { %v2657_v17 = vsel %vm1130_vm10, %v3512_v8, 0.0 }
0x13da   :  { %3256 = vmatmul.msk.bf16.vlgmr.msrb.gmra.mxu1 %vm1130_vm10, %v2677_v33  ;;  %v2676_v16 = vpack.c.bf16 %v2668_v41, %v2668_v41 }
0x13db   :  { %v2742_v5 = vpop.permute.xlu2 %2741 }
0x13dc   :  { %2754 = vmatpush.bf16.msrb.mxu3 %v2742_v5 }
0x13dd   :  { %v2685_v10 = vpop.permute.xlu1 %2684 }
0x13de   :  { %v3514_v12 = vpop.eup %3513  ;;  %2697 = vmatpush.bf16.msra.mxu0 %v2685_v10  ;;  %v2799_v13 = vpop.permute.xlu0 %2798 }
0x13df   :  { %2811 = vmatpush.bf16.msra.mxu2 %v2799_v13  ;;  %v2654_v62 = vsel %vm1130_vm10, %v3514_v12, 0.0 }
0x13e0   :  { %2658 = vadd.xlane.f32.xlu0 %v2657_v17  ;;  %2655 = vadd.xlane.f32.xlu2 %v2654_v62  ;;  %v3373_v62 = vld [vmem:[%s4554_s11 + $0x1] ss:$0 sm:$0xff] }
0x13e1   :  { %3255 = vmatmul.msk.bf16.vlgmr.msra.gmra.mxu0 %vm1130_vm10, %v2676_v16 }
0x13ea   :  { %2817 = vrot.lane.b32.xlu1 %v3981_v46, %s3541_s29 }
0x13f4   :  { %2779 = vrot.lane.b32.xlu0 %v4002_v50, %s3541_s29  ;;  %v3242_v50 = vld [vmem:[%s4553_s10 + $0x20] sm:$0xff] }
0x13f5   :  { %v2837_v24 = vpack.c.bf16 %v3242_v50, %v3242_v50 }
0x13f7   :  { %v2842_v35 = vsel %vm485_vm2, %v2837_v24, 0 }
0x13f8   :  { %2760 = vrot.lane.b32.xlu2 %v3947_v11, %s3541_s29 }
0x143b   :  { %v2653_v14 = vpop.xlane.xlu2 %2652 }
0x143c   :  { %v2650_v39 = vpop.xlane.xlu1 %2649 }
0x1444   :  { %v2644_v21 = vpop.xlane.xlu1 %2643 }
0x1445   :  { %3515 = vrcp.f32 %v2644_v21 }
0x144b   :  { %v3516_v22 = vpop.eup %3515  ;;  %v2647_v19 = vpop.xlane.xlu0 %2646 }
0x144c   :  { %v2670_v52 = vmul.f32 %v3516_v22, %v3504_v59  ;;  %3517 = vrcp.f32 %v2647_v19  ;;  %v2864_v59 = vpack.c.bf16 %v3243_v29, %v3243_v29 }
0x144d   :  { %3519 = vrcp.f32 %v2650_v39 }
0x144e   :  { %v2678_v23 = vpack.c.bf16 %v2670_v52, %v2670_v52  ;;  %v2869_v60 = vsel %vm485_vm2, %v2864_v59, 0 }
0x1450   :  { %3257 = vmatmul.msk.bf16.vlgmr.msrb.gmra.mxu2 %vm1130_vm10, %v2678_v23 }
0x1452   :  { %v3518_v28 = vpop.eup %3517 }
0x1453   :  { %v2671_v46 = vmul.f32 %v3518_v28, %v3508_v54  ;;  %v2656_v31 = vpop.xlane.xlu2 %2655  ;;  %v2659_v9 = vpop.xlane.xlu0 %2658 }
0x1454   :  { %3521 = vrcp.f32 %v2656_v31  ;;  %v3520_v30 = vpop.eup %3519 }
0x1455   :  { %v2679_v11 = vpack.c.bf16 %v2671_v46, %v2671_v46  ;;  %3523 = vrcp.f32 %v2659_v9  ;;  %v2672_v27 = vmul.f32 %v3520_v30, %v4395_v38 }
0x1456   :  { %3525 = vrcp.f32 %v2653_v14 }
0x1457   :  { %v2718_v25 = vpop.f32.mrf.mxu1  ;;  %3258 = vmatmul.msk.bf16.vlgmr.msrb.gmra.mxu3 %vm1130_vm10, %v2679_v11  ;;  %v2680_v43 = vpack.c.bf16 %v2672_v27, %v2672_v27 }
0x145a   :  { %v3522_v37 = vpop.eup %3521 }
0x145b   :  { %v2761_v36 = vpop.permute.xlu2 %2760  ;;  %v2674_v6 = vmul.f32 %v3522_v37, %v3514_v12  ;;  %v3524_v44 = vpop.eup %3523 }
0x145c   :  { %v2818_v40 = vpop.permute.xlu1 %2817  ;;  %2773 = vmatpush.bf16.msrb.mxu0 %v2761_v36  ;;  %v3526_v55 = vpop.eup %3525  ;;  %v2675_v51 = vmul.f32 %v3524_v44, %v3512_v8 }
0x145d   :  { %2830 = vmatpush.bf16.msra.mxu3 %v2818_v40  ;;  %v2682_v48 = vpack.c.bf16 %v2674_v6, %v2674_v6  ;;  %v2673_v26 = vmul.f32 %v3526_v55, %v4393_v56  ;;  %v3244_v56 = vld [vmem:[%s4553_s10 + $0x30] sm:$0xff] }
0x145e   :  { %v2699_v32 = vpop.f32.mrf.mxu0  ;;  %v2683_v38 = vpack.c.bf16 %v2675_v51, %v2675_v51  ;;  %v2888_v42 = vpack.c.bf16 %v3244_v56, %v3244_v56  ;;  %v3272_v51 = vld [vmem:[%s4558_s12 + $0x38] sm:$0xff] }
0x145f   :  { %v2720_v49 = vpop.f32.mrf.mxu1  ;;  %3259 = vmatmul.msk.bf16.vlgmr.msrb.gmra.mxu0 %vm1130_vm10, %v2680_v43  ;;  %v2681_v57 = vpack.c.bf16 %v2673_v26, %v2673_v26  ;;  %v2836_v58 = vpack.c.bf16 %v2718_v25, %v2699_v32 }
0x1460   :  { %2851 = vmatpush.bf16.msra.mxu0 %v2842_v35  ;;  %3261 = vmatmul.msk.bf16.vlgmr.msra.gmra.mxu2 %vm1130_vm10, %v2682_v48  ;;  %v2893_v7 = vsel %vm485_vm2, %v2888_v42, 0 }
0x1461   :  { %2902 = vmatpush.bf16.msrb.mxu2 %v2893_v7  ;;  %2926 = vmatpush.bf16.msrb.mxu3 %v2917_v53 }
0x1466   :  { %v2701_v3 = vpop.f32.mrf.mxu0  ;;  %v2780_v63 = vpop.permute.xlu0 %2779 }
0x1467   :  { %2792 = vmatpush.bf16.msra.mxu1 %v2780_v63  ;;  %3262 = vmatmul.msk.bf16.vlgmr.msra.gmra.mxu3 %vm1130_vm10, %v2683_v38  ;;  %v3269_v63 = vld [vmem:[%s4558_s12 + $0x20] sm:$0xff] }
0x146a   :  { %3260 = vmatmul.msk.bf16.vlgmr.msra.gmra.mxu1 %vm1130_vm10, %v2681_v57  ;;  %v3270_v57 = vld [vmem:[%s4558_s12 + $0x28] sm:$0xff] }
0x146b   :  { %2878 = vmatpush.bf16.msrb.mxu1 %v2869_v60  ;;  %v3003_v29 = vpack.c.bf16 %v3270_v57, %v3269_v63 }
0x146f   :  { %3263 = vmatmul.msk.bf16.vlgmr.msra.gmra.mxu0 %vm188_vm1, %v2836_v58 }
0x14d3   :  { %v2737_v0 = vpop.f32.mrf.mxu2 }
0x14da   :  { %v2756_v1 = vpop.f32.mrf.mxu3 }
0x14db   :  { %v2739_v54 = vpop.f32.mrf.mxu2  ;;  %v2863_v2 = vpack.c.bf16 %v2756_v1, %v2737_v0 }
0x14dc   :  { %v2775_v4 = vpop.f32.mrf.mxu0 }
0x14dd   :  { %3264 = vmatmul.msk.bf16.vlgmr.msrb.gmra.mxu1 %vm188_vm1, %v2863_v2 }
0x14e2   :  { %v2758_v15 = vpop.f32.mrf.mxu3 }
0x14e3   :  { %v2813_v47 = vpop.f32.mrf.mxu2 }
0x14e4   :  { %v2777_v33 = vpop.f32.mrf.mxu0 }
0x14e5   :  { %v3374_v33 = vld [vmem:[%s4555_s18 + $0x1] ss:$0 sm:$0xff] }
0x14e7   :  { %v2794_v41 = vpop.f32.mrf.mxu1 }
0x14e8   :  { %v2887_v5 = vpack.c.bf16 %v2794_v41, %v2775_v4 }
0x14ea   :  { %v2832_v8 = vpop.f32.mrf.mxu3  ;;  %3265 = vmatmul.msk.bf16.vlgmr.msrb.gmra.mxu2 %vm188_vm1, %v2887_v5 }
0x14eb   :  { %v2815_v10 = vpop.f32.mrf.mxu2  ;;  %v2911_v12 = vpack.c.bf16 %v2832_v8, %v2813_v47 }
0x14ec   :  { %v2853_v17 = vpop.f32.mrf.mxu0  ;;  %v3375_v10 = vld [vmem:[%s4614_s22 + $0x1] ss:$0 sm:$0xff] }
0x14ed   :  { %3266 = vmatmul.msk.bf16.vlgmr.msrb.gmra.mxu3 %vm188_vm1, %v2911_v12  ;;  %v2861_v21 = vadd.f32 %v3373_v62, %v2853_v17 }
0x14ef   :  { %v2796_v13 = vpop.f32.mrf.mxu1 }
0x14f2   :  { %v2834_v16 = vpop.f32.mrf.mxu3 }
0x14f4   :  { %v2855_v52 = vpop.f32.mrf.mxu0 }
0x14f5   :  { %v2862_v31 = vadd.f32 %v3373_v62, %v2855_v52  ;;  %v3280_v52 = vld [vmem:[%s4560_s14 + $0x68] sm:$0xff] }
0x155a   :  { %v2880_v39 = vpop.f32.mrf.mxu1 }
0x155b   :  { %v2885_v22 = vadd.f32 %v2880_v39, %v2861_v21  ;;  %v3281_v21 = vld [vmem:[%s4560_s14 + $0x70] sm:$0xff] }
0x1562   :  { %v2882_v28 = vpop.f32.mrf.mxu1 }
0x1563   :  { %v2886_v11 = vadd.f32 %v2882_v28, %v2862_v31  ;;  %v3277_v28 = vld [vmem:[%s4560_s14 + $0x50] sm:$0xff] }
0x156d   :  { %v2904_v14 = vpop.f32.mrf.mxu2 }
0x156e   :  { %v2909_v19 = vadd.f32 %v2904_v14, %v2885_v22  ;;  %v3282_v22 = vld [vmem:[%s4560_s14 + $0x78] sm:$0xff] }
0x156f   :  { %v3042_v14 = vpack.c.bf16 %v3282_v22, %v3281_v21 }
0x1570   :  { %v2928_v23 = vpop.f32.mrf.mxu3 }
0x1571   :  { %v2933_v46 = vadd.f32 %v2928_v23, %v2909_v19  ;;  %3053 = vmatpush.bf16.msra.mxu1 %v3042_v14  ;;  %v3279_v19 = vld [vmem:[%s4560_s14 + $0x60] sm:$0xff] }
0x1572   :  { %v3041_v23 = vpack.c.bf16 %v3280_v52, %v3279_v19  ;;  %v3379_v19 = vld [vmem:[%s4562_s21 + $0x1] ss:$0 sm:$0xff] }
0x1573   :  { %v2935_v50 = vadd.f32 %v2933_v46, %v4345_v18  ;;  %v3278_v46 = vld [vmem:[%s4560_s14 + $0x58] sm:$0xff] }
0x1574   :  { %v3040_v31 = vpack.c.bf16 %v3278_v46, %v3277_v28 }
0x1575   :  { %v2906_v9 = vpop.f32.mrf.mxu2  ;;  %v2941_v30 = vsel %vm96_vm0, %v2935_v50, 0.0  ;;  %3054 = vmatpush.bf16.msra.mxu1 %v3041_v23 }
0x1576   :  { %v2910_v24 = vadd.f32 %v2906_v9, %v2886_v11  ;;  %2942 = vadd.xlane.f32.xlu1 %v2941_v30  ;;  %v3276_v11 = vld [vmem:[%s4560_s14 + $0x48] sm:$0xff] }
0x1578   :  { %v2930_v25 = vpop.f32.mrf.mxu3 }
0x1579   :  { %v2934_v27 = vadd.f32 %v2930_v25, %v2910_v24  ;;  %3055 = vmatpush.bf16.msra.mxu1 %v3040_v31  ;;  %v3376_v24 = vld [vmem:[%s4557_s13 + $0x1] ss:$0 sm:$0xff] }
0x157b   :  { %v2936_v35 = vadd.f32 %v2934_v27, %v4347_v20  ;;  %v3271_v20 = vld [vmem:[%s4558_s12 + $0x30] sm:$0xff] }
0x157c   :  { %v3004_v26 = vpack.c.bf16 %v3272_v51, %v3271_v20 }
0x157d   :  { %v2944_v37 = vsel %vm96_vm0, %v2936_v35, 0.0 }
0x157e   :  { %2945 = vadd.xlane.f32.xlu0 %v2944_v37  ;;  %3017 = vmatpush.bf16.msrb.mxu0 %v3004_v26 }
0x1582   :  { %3018 = vmatpush.bf16.msrb.mxu0 %v3003_v29 }
0x15e9   :  { %v2943_v36 = vpop.xlane.xlu1 %2942 }
0x15ea   :  { %v2947_v6 = vmul.f32 %v2943_v36, %v3933_v34 }
0x15ec   :  { %v2949_v40 = vsub.f32 %v2935_v50, %v2947_v6  ;;  %v3275_v50 = vld [vmem:[%s4560_s14 + $0x40] sm:$0xff] }
0x15ed   :  { %v3039_v9 = vpack.c.bf16 %v3276_v11, %v3275_v50 }
0x15ee   :  { %v2951_v43 = vmul.f32 %v2949_v40, %v2949_v40 }
0x15ef   :  { %3056 = vmatpush.bf16.msra.mxu1 %v3039_v9 }
0x15f0   :  { %v2953_v18 = vsel %vm96_vm0, %v2951_v43, 0.0 }
0x15f1   :  { %2954 = vadd.xlane.f32.xlu2 %v2953_v18  ;;  %v2946_v44 = vpop.xlane.xlu0 %2945 }
0x15f2   :  { %v2948_v48 = vmul.f32 %v2946_v44, %v3933_v34 }
0x15f4   :  { %v2950_v32 = vsub.f32 %v2936_v35, %v2948_v48 }
0x15f6   :  { %v2952_v49 = vmul.f32 %v2950_v32, %v2950_v32 }
0x15f8   :  { %v2956_v55 = vsel %vm96_vm0, %v2952_v49, 0.0 }
0x15f9   :  { %2957 = vadd.xlane.f32.xlu1 %v2956_v55 }
0x1664   :  { %v2955_v38 = vpop.xlane.xlu2 %2954 }
0x1665   :  { %v2959_v3 = vmul.f32 %v2955_v38, %v3933_v34 }
0x1667   :  { %v2961_v58 = vadd.f32 1e-05, %v2959_v3 }
0x1669   :  { %3527 = vrsqrt.f32 %v2961_v58  ;;  %vm2969_vm2 = vweird.f32 %v2961_v58 }
0x166c   :  { %v2958_v59 = vpop.xlane.xlu1 %2957 }
0x166d   :  { %v2960_v60 = vmul.f32 %v2958_v59, %v3933_v34 }
0x166f   :  { %v3528_v56 = vpop.eup %3527  ;;  %v2962_v42 = vadd.f32 1e-05, %v2960_v60 }
0x1670   :  { %v2964_v7 = vmul.f32 %v3528_v56, %v2961_v58  ;;  %vm2970_vm1 = vweird.f32 %v3528_v56 }
0x1671   :  { %3529 = vrsqrt.f32 %v2962_v42  ;;  %vm2971_vm10 = vmor %vm2969_vm2, %vm2970_vm1  ;;  %vm2979_vm7 = vweird.f32 %v2962_v42 }
0x1672   :  { %v2965_v45 = vmul.f32 %v3528_v56, %v2964_v7 }
0x1674   :  { %v2966_v61 = vmul.f32 0.5, %v2965_v45 }
0x1676   :  { %v2967_v53 = vsub.f32 1.5, %v2966_v61 }
0x1677   :  { %v3530_v0 = vpop.eup %3529 }
0x1678   :  { %v2968_v1 = vmul.f32 %v3528_v56, %v2967_v53  ;;  %v2974_v54 = vmul.f32 %v3530_v0, %v2962_v42  ;;  %vm2980_vm6 = vweird.f32 %v3530_v0 }
0x1679   :  { %vm2981_vm8 = vmor %vm2979_vm7, %vm2980_vm6 }
0x167a   :  { %v2975_v2 = vmul.f32 %v3530_v0, %v2974_v54  ;;  %v2972_v4 = vsel %vm2971_vm10, %v3528_v56, %v2968_v1 }
0x167b   :  { %v2983_v41 = vmul.f32 %v2972_v4, %v2949_v40  ;;  %v3377_v40 = vld [vmem:[%s4559_s15 + $0x1] ss:$0 sm:$0xff]  ;;  %s4615_s15 = sld [smem:[#allocation13_spill]] }
0x167c   :  { %v2976_v15 = vmul.f32 0.5, %v2975_v2 }
0x167d   :  { %v2988_v12 = vmul.f32 %v3374_v33, %v2983_v41 }
0x167e   :  { %v2977_v47 = vsub.f32 1.5, %v2976_v15 }
0x167f   :  { %v2993_v17 = vadd.f32 %v3375_v10, %v2988_v12 }
0x1680   :  { %v2978_v5 = vmul.f32 %v3530_v0, %v2977_v47 }
0x1681   :  { %v3125_v56 = vld [vmem:[%s4615_s15 + $0x10] sm:$0xff]  ;;  %v3126_v42 = vld [vmem:[%s4615_s15 + $0x18] sm:$0xff]  ;;  %v3123_v53 = vld [vmem:[%s4615_s15] sm:$0xff] }
0x1682   :  { %v2982_v8 = vsel %vm2981_vm8, %v3530_v0, %v2978_v5  ;;  %v3130_v7 = vpack.c.bf16 %v3126_v42, %v3125_v56  ;;  %v3124_v0 = vld [vmem:[%s4615_s15 + $0x8] sm:$0xff] }
0x1683   :  { %v2984_v13 = vmul.f32 %v2982_v8, %v2950_v32  ;;  %v3129_v54 = vpack.c.bf16 %v3124_v0, %v3123_v53 }
0x1684   :  { %3143 = vmatpush.bf16.msra.mxu2 %v3130_v7 }
0x1685   :  { %v2989_v16 = vmul.f32 %v3374_v33, %v2984_v13 }
0x1687   :  { %v2994_v62 = vadd.f32 %v3375_v10, %v2989_v16 }
0x1688   :  { %3144 = vmatpush.bf16.msra.mxu2 %v3129_v54 }
0x1689   :  { %v3002_v39 = vpack.c.bf16 %v2994_v62, %v2993_v17 }
0x168b   :  { %3274 = vmatmul.msk.bf16.vlgmr.msrb.gmra.mxu0 %vm96_vm0, %v3002_v39 }
0x1708   :  { %v3020_v30 = vpop.f32.mrf.mxu0 }
0x1709   :  { %v3021_v25 = vadd.f32 %v3376_v24, %v3020_v30 }
0x170b   :  { %v3025_v37 = vmax.f32 %v3021_v25, 0.0 }
0x1710   :  { %v3022_v27 = vpop.f32.mrf.mxu0 }
0x1711   :  { %v3023_v35 = vadd.f32 %v3376_v24, %v3022_v27 }
0x1713   :  { %v3026_v36 = vmax.f32 %v3023_v35, 0.0 }
0x1715   :  { %v3038_v6 = vpack.c.bf16 %v3026_v36, %v3025_v37 }
0x1717   :  { %3284 = vmatmul.msk.bf16.vlgmr.msra.gmra.mxu1 %vm1583_vm4, %v3038_v6 }
0x1794   :  { %v3058_v43 = vpop.f32.mrf.mxu1 }
0x1795   :  { %v3059_v18 = vadd.f32 %v3377_v40, %v3058_v43 }
0x1797   :  { %v3063_v44 = vadd.f32 %v3059_v18, %v2993_v17 }
0x1799   :  { %v3069_v48 = vsel %vm96_vm0, %v3063_v44, 0.0 }
0x179a   :  { %3070 = vadd.xlane.f32.xlu0 %v3069_v48 }
0x179c   :  { %v3060_v32 = vpop.f32.mrf.mxu1 }
0x179d   :  { %v3061_v49 = vadd.f32 %v3377_v40, %v3060_v32 }
0x179f   :  { %v3064_v55 = vadd.f32 %v3061_v49, %v2994_v62 }
0x17a1   :  { %v3072_v20 = vsel %vm96_vm0, %v3064_v55, 0.0 }
0x17a2   :  { %3073 = vadd.xlane.f32.xlu2 %v3072_v20 }
0x180d   :  { %v3071_v51 = vpop.xlane.xlu0 %3070 }
0x180e   :  { %v3075_v26 = vmul.f32 %v3071_v51, %v3933_v34 }
0x1810   :  { %v3077_v38 = vsub.f32 %v3063_v44, %v3075_v26 }
0x1812   :  { %v3079_v3 = vmul.f32 %v3077_v38, %v3077_v38 }
0x1814   :  { %v3081_v63 = vsel %vm96_vm0, %v3079_v3, 0.0 }
0x1815   :  { %v3074_v57 = vpop.xlane.xlu2 %3073  ;;  %3082 = vadd.xlane.f32.xlu1 %v3081_v63 }
0x1816   :  { %v3076_v58 = vmul.f32 %v3074_v57, %v3933_v34 }
0x1818   :  { %v3078_v29 = vsub.f32 %v3064_v55, %v3076_v58 }
0x181a   :  { %v3080_v59 = vmul.f32 %v3078_v29, %v3078_v29 }
0x181c   :  { %v3084_v60 = vsel %vm96_vm0, %v3080_v59, 0.0 }
0x181d   :  { %3085 = vadd.xlane.f32.xlu0 %v3084_v60 }
0x1888   :  { %v3083_v45 = vpop.xlane.xlu1 %3082 }
0x1889   :  { %v3087_v61 = vmul.f32 %v3083_v45, %v3933_v34 }
0x188b   :  { %v3089_v1 = vadd.f32 1e-05, %v3087_v61 }
0x188d   :  { %3531 = vrsqrt.f32 %v3089_v1  ;;  %vm3097_vm9 = vweird.f32 %v3089_v1 }
0x1890   :  { %v3086_v2 = vpop.xlane.xlu0 %3085 }
0x1891   :  { %v3088_v4 = vmul.f32 %v3086_v2, %v3933_v34  ;;  %v3378_v34 = vld [vmem:[%s4561_s20 + $0x1] ss:$0 sm:$0xff]  ;;  %s4616_s20 = sld [smem:[#allocation12_spill]] }
0x1893   :  { %v3532_v15 = vpop.eup %3531  ;;  %v3090_v47 = vadd.f32 1e-05, %v3088_v4 }
0x1894   :  { %v3092_v33 = vmul.f32 %v3532_v15, %v3089_v1  ;;  %vm3098_vm4 = vweird.f32 %v3532_v15 }
0x1895   :  { %3533 = vrsqrt.f32 %v3090_v47  ;;  %vm3099_vm11 = vmor %vm3097_vm9, %vm3098_vm4  ;;  %vm3107_vm13 = vweird.f32 %v3090_v47 }
0x1896   :  { %v3093_v41 = vmul.f32 %v3532_v15, %v3092_v33 }
0x1897   :  { %v3380_v11 = vld [vmem:[%s4616_s20] ss:$0 sm:$0xff] }
0x1898   :  { %v3094_v5 = vmul.f32 0.5, %v3093_v41 }
0x189a   :  { %v3095_v8 = vsub.f32 1.5, %v3094_v5 }
0x189b   :  { %v3534_v10 = vpop.eup %3533 }
0x189c   :  { %v3096_v12 = vmul.f32 %v3532_v15, %v3095_v8  ;;  %v3102_v13 = vmul.f32 %v3534_v10, %v3090_v47  ;;  %vm3108_vm12 = vweird.f32 %v3534_v10 }
0x189d   :  { %vm3109_vm14 = vmor %vm3107_vm13, %vm3108_vm12 }
0x189e   :  { %v3103_v16 = vmul.f32 %v3534_v10, %v3102_v13  ;;  %v3100_v17 = vsel %vm3099_vm11, %v3532_v15, %v3096_v12 }
0x189f   :  { %v3111_v21 = vmul.f32 %v3100_v17, %v3077_v38 }
0x18a0   :  { %v3104_v62 = vmul.f32 0.5, %v3103_v16 }
0x18a1   :  { %v3116_v52 = vmul.f32 %v3378_v34, %v3111_v21 }
0x18a2   :  { %v3105_v39 = vsub.f32 1.5, %v3104_v62 }
0x18a3   :  { %v3121_v46 = vadd.f32 %v3379_v19, %v3116_v52 }
0x18a4   :  { %v3106_v22 = vmul.f32 %v3534_v10, %v3105_v39 }
0x18a6   :  { %v3110_v14 = vsel %vm3109_vm14, %v3534_v10, %v3106_v22 }
0x18a7   :  { %v3112_v23 = vmul.f32 %v3110_v14, %v3078_v29 }
0x18a9   :  { %v3117_v28 = vmul.f32 %v3378_v34, %v3112_v23 }
0x18ab   :  { %v3122_v31 = vadd.f32 %v3379_v19, %v3117_v28 }
0x18ad   :  { %v3128_v50 = vpack.c.bf16 %v3122_v31, %v3121_v46 }
0x18af   :  { %3287 = vmatmul.msk.bf16.vlgmr.msra.gmra.mxu2 %vm96_vm0, %v3128_v50 }
0x1932   :  { %v3146_v9 = vpop.f32.mrf.mxu2 }
0x1933   :  { %v3147_v30 = vadd.f32 %v3380_v11, %v3146_v9 }
0x1935   :  { %3151 = vst [vmem:[%s4617_s26] sm:$0xff] %v3147_v30 }
0x193a   :  { %v3148_v24 = vpop.f32.mrf.mxu2 }
0x193b   :  { %v3149_v25 = vadd.f32 %v3380_v11, %v3148_v24 }
0x193d   :  { %3152 = vst [vmem:[%s4617_s26 + $0x8] sm:$0xff] %v3149_v25 }

</bundles_post_ra>
